<compile_context>
chip_gen: v6e
topology: v6e:2x2x1
jax: 0.10.0
libtpu: 0.0.40
codegen_flags: <defaults>
</compile_context>

<pallas_src>
import functools

import jax
import jax.numpy as jnp
import numpy as np
from jax import lax
from jax.experimental import pallas as pl
from jax.experimental.pallas import tpu as pltpu


def _round_up(x, m):
    return ((x + m - 1) // m) * m


_ALIGN = 16  # sublane alignment good for both f32 (8,128) and bf16 (16,128) tiles


def _choose_tiles(M, tm_max):
    """Balanced M tiles: minimal padding, >=2 grid steps when M allows (v7x megacore)."""
    n_tiles = max(1, pl.cdiv(M, tm_max))
    if M >= 2 * _ALIGN:
        n_tiles = max(n_tiles, 2)
    n_tiles = min(n_tiles, max(1, M // _ALIGN))
    tm = _round_up(pl.cdiv(M, n_tiles), _ALIGN)
    m_pad = _round_up(M, tm)
    return tm, m_pad


# ----------------------------------------------------------------------------
# Pallas kernel 1: (X @ W + b) with optional fused ReLU, gridded over M.
# X/W in bf16, accumulate in f32, bias+ReLU in f32, store in out dtype.
# ----------------------------------------------------------------------------
def _matmul_bias_relu_kernel(x_ref, w_ref, b_ref, o_ref, *, apply_relu):
    acc = jnp.dot(x_ref[...], w_ref[...], preferred_element_type=jnp.float32)
    acc = acc + b_ref[...]                      # (1, N) broadcasts over rows
    if apply_relu:
        acc = jnp.maximum(acc, 0.0)
    o_ref[...] = acc.astype(o_ref.dtype)


def pallas_matmul_bias(x, w, b_row, *, apply_relu, out_dtype=None, tm_max=512):
    """y = x @ w + b (optionally ReLU).  x: (M,K), w: (K,N), b_row: (1,N)."""
    M, K = x.shape
    K2, N = w.shape
    assert K == K2
    out_dtype = out_dtype or x.dtype

    tm, m_pad = _choose_tiles(M, tm_max)
    x_p = jnp.pad(x, ((0, m_pad - M), (0, 0))) if m_pad != M else x

    kernel = functools.partial(_matmul_bias_relu_kernel, apply_relu=apply_relu)
    out = pl.pallas_call(
        kernel,
        out_shape=jax.ShapeDtypeStruct((m_pad, N), out_dtype),
        grid_spec=pltpu.PrefetchScalarGridSpec(
            num_scalar_prefetch=0,
            grid=(m_pad // tm,),
            in_specs=[
                pl.BlockSpec((tm, K), lambda i: (i, 0)),
                pl.BlockSpec((K, N), lambda i: (0, 0)),
                pl.BlockSpec((1, N), lambda i: (0, 0)),
            ],
            out_specs=pl.BlockSpec((tm, N), lambda i: (i, 0)),
        ),
        compiler_params=pltpu.CompilerParams(
            dimension_semantics=("parallel",),
            vmem_limit_bytes=32 << 20,
        ),
    )(x_p, w, b_row)
    return out[:M] if m_pad != M else out


# ----------------------------------------------------------------------------
# Pallas kernel 2: fused FC head  q = relu(x @ W1 + b1) @ W2 + b2.
# ----------------------------------------------------------------------------
def _fc_fused_kernel(x_ref, w1_ref, b1_ref, w2_ref, b2_ref, o_ref):
    h = jnp.dot(x_ref[...], w1_ref[...], preferred_element_type=jnp.float32)
    h = jnp.maximum(h + b1_ref[...], 0.0)
    q = jnp.dot(h.astype(w2_ref.dtype), w2_ref[...],
                preferred_element_type=jnp.float32)
    o_ref[...] = (q + b2_ref[...]).astype(o_ref.dtype)


def pallas_fc_fused(x, w1, b1, w2, b2, *, tm_max=512):
    M, K1 = x.shape
    K1b, H = w1.shape
    Hb, N2 = w2.shape
    assert K1 == K1b and H == Hb

    tm, m_pad = _choose_tiles(M, tm_max)
    x_p = jnp.pad(x, ((0, m_pad - M), (0, 0))) if m_pad != M else x

    out = pl.pallas_call(
        _fc_fused_kernel,
        out_shape=jax.ShapeDtypeStruct((m_pad, N2), jnp.float32),
        grid_spec=pltpu.PrefetchScalarGridSpec(
            num_scalar_prefetch=0,
            grid=(m_pad // tm,),
            in_specs=[
                pl.BlockSpec((tm, K1), lambda i: (i, 0)),
                pl.BlockSpec((K1, H), lambda i: (0, 0)),
                pl.BlockSpec((1, H), lambda i: (0, 0)),
                pl.BlockSpec((H, N2), lambda i: (0, 0)),
                pl.BlockSpec((1, N2), lambda i: (0, 0)),
            ],
            out_specs=pl.BlockSpec((tm, N2), lambda i: (i, 0)),
        ),
        compiler_params=pltpu.CompilerParams(
            dimension_semantics=("parallel",),
            vmem_limit_bytes=32 << 20,
        ),
    )(x_p, w1, b1, w2, b2)
    return out[:M] if m_pad != M else out


# ----------------------------------------------------------------------------
# Channel-last conv: im2col via slices+concat (no transposes) + Pallas matmul.
# Weight already reshaped to (KH*KW*Cin, Cout) in (di, dj, c) row order (bf16).
# ----------------------------------------------------------------------------
def conv2d_relu_cl(x_nhwc, w_mat, b_row, *, kh, kw, stride):
    n, H, W, c = x_nhwc.shape
    oh = (H - kh) // stride + 1
    ow = (W - kw) // stride + 1
    cols = []
    for di in range(kh):
        for dj in range(kw):
            cols.append(
                x_nhwc[:, di:di + (oh - 1) * stride + 1:stride,
                          dj:dj + (ow - 1) * stride + 1:stride, :]
            )  # (N, OH, OW, C)
    patches = jnp.concatenate(cols, axis=-1).reshape(n * oh * ow, kh * kw * c)
    # TODO(synk): fuse this im2col into the matmul kernel (per-image NHWC tile
    # in VMEM + in-kernel slices) so patches never hit HBM.
    y = pallas_matmul_bias(patches, w_mat, b_row, apply_relu=True,
                           out_dtype=jnp.bfloat16)          # (M, Cout)
    return y.reshape(n, oh, ow, w_mat.shape[1])


# ----------------------------------------------------------------------------
# Parameter init (deterministic, synthetic — mimics the nn.Module shapes)
# and one-time prep into the kernel-friendly (channel-last, bf16) layout.
# ----------------------------------------------------------------------------
def init_params(key, no_of_actions=18):
    ks = jax.random.split(key, 10)

    def u(k, shape, fan_in):
        bound = 1.0 / np.sqrt(fan_in)
        return jax.random.uniform(k, shape, jnp.float32, -bound, bound)

    p = {}
    p["c1_w"] = u(ks[0], (32, 4, 8, 8), 4 * 8 * 8)
    p["c1_b"] = u(ks[1], (32,), 4 * 8 * 8)
    p["c2_w"] = u(ks[2], (64, 32, 4, 4), 32 * 4 * 4)
    p["c2_b"] = u(ks[3], (64,), 32 * 4 * 4)
    p["c3_w"] = u(ks[4], (64, 64, 3, 3), 64 * 3 * 3)
    p["c3_b"] = u(ks[5], (64,), 64 * 3 * 3)
    p["fc1_w"] = u(ks[6], (512, 64 * 7 * 7), 64 * 7 * 7)
    p["fc1_b"] = u(ks[7], (512,), 64 * 7 * 7)
    p["fc2_w"] = u(ks[8], (no_of_actions, 512), 512)
    p["fc2_b"] = u(ks[9], (no_of_actions,), 512)       # bug fix: (n_actions,)
    return p


def prepare_params(params):
    """One-time layout prep: real-Cin/Cout conv weight matrices (bf16), conv1
    rows reordered for the factor-4 space-to-depth input, fc1 columns permuted
    to the channel-last flatten order, biases kept in f32."""
    def prep_conv(w_oihw, b):
        cout, cin, kh, kw = w_oihw.shape
        w = jnp.transpose(w_oihw, (2, 3, 1, 0)).reshape(kh * kw * cin, cout)
        return w.astype(jnp.bfloat16), b.reshape(1, cout).astype(jnp.float32)

    p = {}
    # conv1 folded with factor-4 space-to-depth of the input:
    # (k=8, s=4) over (84,84,4)  ==  (k=2, s=1) over (21,21,64).
    w1 = jnp.transpose(params["c1_w"], (2, 3, 1, 0))        # (di, dj, c, cout) = (8,8,4,32)
    w1 = w1.reshape(2, 4, 2, 4, 4, 32)                      # (dI, h_off, dJ, w_off, c, cout)
    w1 = jnp.transpose(w1, (0, 2, 1, 3, 4, 5))              # (dI, dJ, h_off, w_off, c, cout)
    p["c1_w"] = w1.reshape(2 * 2 * 4 * 4 * 4, 32).astype(jnp.bfloat16)   # (256, 32)
    p["c1_b"] = params["c1_b"].reshape(1, 32).astype(jnp.float32)

    p["c2_w"], p["c2_b"] = prep_conv(params["c2_w"], params["c2_b"])     # (512, 64)
    p["c3_w"], p["c3_b"] = prep_conv(params["c3_w"], params["c3_b"])     # (576, 64)

    # fc1: our flatten order is (h, w, c); PyTorch's is (c, h, w).  Permute the
    # weight columns once so no activation transpose/slice is ever needed.
    hh, ww, cc = np.meshgrid(np.arange(7), np.arange(7), np.arange(64), indexing="ij")
    torch_cols = (cc * 49 + hh * 7 + ww).reshape(-1)        # our col j = h*448 + w*64 + c
    p["fc1_w"] = jnp.transpose(params["fc1_w"][:, torch_cols]).astype(jnp.bfloat16)  # (3136,512)
    p["fc1_b"] = params["fc1_b"].reshape(1, -1).astype(jnp.float32)

    p["fc2_w"] = jnp.transpose(params["fc2_w"]).astype(jnp.bfloat16)     # (512, n_actions)
    p["fc2_b"] = params["fc2_b"].reshape(1, -1).astype(jnp.float32)
    return p


# ----------------------------------------------------------------------------
# Forward pass (matches DeepQNetwork.forward).
# ----------------------------------------------------------------------------
@jax.jit
def dqn_forward(prepped, x_nchw):
    n = x_nchw.shape[0]
    # NCHW -> NHWC plus factor-4 space-to-depth, once:
    # (N,4,84,84) -> (N,21,21,64) with channel index = h_off*16 + w_off*4 + c.
    x = jnp.transpose(x_nchw, (0, 2, 3, 1))                  # (N,84,84,4)
    x = x.reshape(n, 21, 4, 21, 4, 4)
    x = jnp.transpose(x, (0, 1, 3, 2, 4, 5)).reshape(n, 21, 21, 64)
    x = x.astype(jnp.bfloat16)

    h = conv2d_relu_cl(x, prepped["c1_w"], prepped["c1_b"], kh=2, kw=2, stride=1)  # (N,20,20,32)
    h = conv2d_relu_cl(h, prepped["c2_w"], prepped["c2_b"], kh=4, kw=4, stride=2)  # (N,9,9,64)
    h = conv2d_relu_cl(h, prepped["c3_w"], prepped["c3_b"], kh=3, kw=3, stride=1)  # (N,7,7,64)

    flat = h.reshape(n, -1)                                  # (N, 3136), (h,w,c) order
    return pallas_fc_fused(flat, prepped["fc1_w"], prepped["fc1_b"],
                           prepped["fc2_w"], prepped["fc2_b"])   # (N, n_actions) f32


# Pure-JAX reference (PyTorch semantics, NCHW, f32) for a sanity check.
def dqn_forward_ref(params, x):
    dn = lax.conv_dimension_numbers(x.shape, params["c1_w"].shape, ("NCHW", "OIHW", "NCHW"))
    h = lax.conv_general_dilated(x, params["c1_w"], (4, 4), "VALID", dimension_numbers=dn)
    h = jax.nn.relu(h + params["c1_b"][None, :, None, None])
    h = lax.conv_general_dilated(h, params["c2_w"], (2, 2), "VALID", dimension_numbers=dn)
    h = jax.nn.relu(h + params["c2_b"][None, :, None, None])
    h = lax.conv_general_dilated(h, params["c3_w"], (1, 1), "VALID", dimension_numbers=dn)
    h = jax.nn.relu(h + params["c3_b"][None, :, None, None])
    flat = h.reshape(h.shape[0], -1)
    h = jax.nn.relu(flat @ params["fc1_w"].T + params["fc1_b"])
    return h @ params["fc2_w"].T + params["fc2_b"]


if __name__ == "__main__":
    key = jax.random.PRNGKey(0)
    k_param, k_x = jax.random.split(key)

    NO_OF_ACTIONS = 18
    params = init_params(k_param, NO_OF_ACTIONS)
    prepped = prepare_params(params)

    # batch=2; spatial must be 84x84 so the flatten matches Linear(64*7*7, 512).
    x = jax.random.uniform(k_x, (2, 4, 84, 84), jnp.float32)

    q = jax.block_until_ready(dqn_forward(prepped, x))
    assert q.shape == (2, NO_OF_ACTIONS), q.shape

    q_ref = jax.block_until_ready(dqn_forward_ref(params, x))
    # bf16 matmul inputs with f32 accumulation -> loose-ish tolerance vs f32 ref.
    np.testing.assert_allclose(np.asarray(q), np.asarray(q_ref), rtol=5e-2, atol=2e-2)

    print("KERNEL_OK")
</pallas_src>

<mosaic_0001>
module attributes {stable_mosaic.version = 11 : i64} {
  func.func @_matmul_bias_relu_kernel(%arg0: i32, %arg1: memref<400x256xbf16, #tpu.memory_space<vmem>>, %arg2: memref<256x32xbf16, #tpu.memory_space<vmem>>, %arg3: memref<1x32xf32, #tpu.memory_space<vmem>>, %arg4: memref<400x32xbf16, #tpu.memory_space<vmem>>) attributes {dimension_semantics = [#tpu.dimension_semantics<parallel>], iteration_bounds = array<i64: 2>, scalar_prefetch = 0 : i64, scratch_operands = 0 : i64, tpu.core_type = #tpu.core_type<tc>, window_params = [{transform_indices = @transform_0, window_bounds = array<i64: 400, 256>}, {pipeline_mode = #tpu.pipeline_mode<synchronous>, transform_indices = @transform_1, window_bounds = array<i64: 256, 32>}, {pipeline_mode = #tpu.pipeline_mode<synchronous>, transform_indices = @transform_2, window_bounds = array<i64: 1, 32>}, {transform_indices = @transform_3, window_bounds = array<i64: 400, 32>}]} {
    %c0 = arith.constant 0 : index
    %c0_0 = arith.constant 0 : index
    %0 = vector.load %arg1[%c0, %c0_0] : memref<400x256xbf16, #tpu.memory_space<vmem>>, vector<400x256xbf16>
    %c0_1 = arith.constant 0 : index
    %c0_2 = arith.constant 0 : index
    %1 = vector.load %arg2[%c0_1, %c0_2] : memref<256x32xbf16, #tpu.memory_space<vmem>>, vector<256x32xbf16>
    %cst = arith.constant dense<0.000000e+00> : vector<400x32xf32>
    %2 = tpu.matmul %0, %1, %cst {dimension_numbers = #tpu.dot_dimension_numbers<[1], [0], [0], [1], [0, 0, 1, 1], [], []>} : vector<400x256xbf16>, vector<256x32xbf16>, vector<400x32xf32> -> vector<400x32xf32>
    %c0_3 = arith.constant 0 : index
    %c0_4 = arith.constant 0 : index
    %3 = vector.load %arg3[%c0_3, %c0_4] : memref<1x32xf32, #tpu.memory_space<vmem>>, vector<1x32xf32>
    %4 = vector.broadcast %3 : vector<1x32xf32> to vector<400x32xf32>
    %5 = arith.addf %2, %4 : vector<400x32xf32>
    %cst_5 = arith.constant 0.000000e+00 : f32
    %6 = vector.broadcast %cst_5 : f32 to vector<400x32xf32>
    %7 = arith.maximumf %5, %6 : vector<400x32xf32>
    %8 = arith.truncf %7 : vector<400x32xf32> to vector<400x32xbf16>
    %c0_6 = arith.constant 0 : index
    %c0_7 = arith.constant 0 : index
    %9 = vector.load %arg4[%c0_6, %c0_7] : memref<400x32xbf16, #tpu.memory_space<vmem>>, vector<400x32xbf16>
    tpu.vector_store %arg4[%c0_6, %c0_7], %8 {strides = array<i32>} : memref<400x32xbf16, #tpu.memory_space<vmem>>, vector<400x32xbf16>,
    return
  }
  func.func @transform_0(%arg0: i32) -> (i32, i32) {
    %c0_i32 = arith.constant 0 : i32
    %c0_i32_0 = arith.constant 0 : i32
    return %arg0, %c0_i32 : i32, i32
  }
  func.func @transform_1(%arg0: i32) -> (i32, i32) {
    %c0_i32 = arith.constant 0 : i32
    %c0_i32_0 = arith.constant 0 : i32
    %c0_i32_1 = arith.constant 0 : i32
    return %c0_i32, %c0_i32_0 : i32, i32
  }
  func.func @transform_2(%arg0: i32) -> (i32, i32) {
    %c0_i32 = arith.constant 0 : i32
    %c0_i32_0 = arith.constant 0 : i32
    %c0_i32_1 = arith.constant 0 : i32
    return %c0_i32, %c0_i32_0 : i32, i32
  }
  func.func @transform_3(%arg0: i32) -> (i32, i32) {
    %c0_i32 = arith.constant 0 : i32
    %c0_i32_0 = arith.constant 0 : i32
    return %arg0, %c0_i32 : i32, i32
  }
}

module attributes {stable_mosaic.version = 11 : i64} {
  func.func @_matmul_bias_relu_kernel(%arg0: i32, %arg1: memref<96x512xbf16, #tpu.memory_space<vmem>>, %arg2: memref<512x64xbf16, #tpu.memory_space<vmem>>, %arg3: memref<1x64xf32, #tpu.memory_space<vmem>>, %arg4: memref<96x64xbf16, #tpu.memory_space<vmem>>) attributes {dimension_semantics = [#tpu.dimension_semantics<parallel>], iteration_bounds = array<i64: 2>, scalar_prefetch = 0 : i64, scratch_operands = 0 : i64, tpu.core_type = #tpu.core_type<tc>, window_params = [{transform_indices = @transform_0, window_bounds = array<i64: 96, 512>}, {pipeline_mode = #tpu.pipeline_mode<synchronous>, transform_indices = @transform_1, window_bounds = array<i64: 512, 64>}, {pipeline_mode = #tpu.pipeline_mode<synchronous>, transform_indices = @transform_2, window_bounds = array<i64: 1, 64>}, {transform_indices = @transform_3, window_bounds = array<i64: 96, 64>}]} {
    %c0 = arith.constant 0 : index
    %c0_0 = arith.constant 0 : index
    %0 = vector.load %arg1[%c0, %c0_0] : memref<96x512xbf16, #tpu.memory_space<vmem>>, vector<96x512xbf16>
    %c0_1 = arith.constant 0 : index
    %c0_2 = arith.constant 0 : index
    %1 = vector.load %arg2[%c0_1, %c0_2] : memref<512x64xbf16, #tpu.memory_space<vmem>>, vector<512x64xbf16>
    %cst = arith.constant dense<0.000000e+00> : vector<96x64xf32>
    %2 = tpu.matmul %0, %1, %cst {dimension_numbers = #tpu.dot_dimension_numbers<[1], [0], [0], [1], [0, 0, 1, 1], [], []>} : vector<96x512xbf16>, vector<512x64xbf16>, vector<96x64xf32> -> vector<96x64xf32>
    %c0_3 = arith.constant 0 : index
    %c0_4 = arith.constant 0 : index
    %3 = vector.load %arg3[%c0_3, %c0_4] : memref<1x64xf32, #tpu.memory_space<vmem>>, vector<1x64xf32>
    %4 = vector.broadcast %3 : vector<1x64xf32> to vector<96x64xf32>
    %5 = arith.addf %2, %4 : vector<96x64xf32>
    %cst_5 = arith.constant 0.000000e+00 : f32
    %6 = vector.broadcast %cst_5 : f32 to vector<96x64xf32>
    %7 = arith.maximumf %5, %6 : vector<96x64xf32>
    %8 = arith.truncf %7 : vector<96x64xf32> to vector<96x64xbf16>
    %c0_6 = arith.constant 0 : index
    %c0_7 = arith.constant 0 : index
    %9 = vector.load %arg4[%c0_6, %c0_7] : memref<96x64xbf16, #tpu.memory_space<vmem>>, vector<96x64xbf16>
    tpu.vector_store %arg4[%c0_6, %c0_7], %8 {strides = array<i32>} : memref<96x64xbf16, #tpu.memory_space<vmem>>, vector<96x64xbf16>,
    return
  }
  func.func @transform_0(%arg0: i32) -> (i32, i32) {
    %c0_i32 = arith.constant 0 : i32
    %c0_i32_0 = arith.constant 0 : i32
    return %arg0, %c0_i32 : i32, i32
  }
  func.func @transform_1(%arg0: i32) -> (i32, i32) {
    %c0_i32 = arith.constant 0 : i32
    %c0_i32_0 = arith.constant 0 : i32
    %c0_i32_1 = arith.constant 0 : i32
    return %c0_i32, %c0_i32_0 : i32, i32
  }
  func.func @transform_2(%arg0: i32) -> (i32, i32) {
    %c0_i32 = arith.constant 0 : i32
    %c0_i32_0 = arith.constant 0 : i32
    %c0_i32_1 = arith.constant 0 : i32
    return %c0_i32, %c0_i32_0 : i32, i32
  }
  func.func @transform_3(%arg0: i32) -> (i32, i32) {
    %c0_i32 = arith.constant 0 : i32
    %c0_i32_0 = arith.constant 0 : i32
    return %arg0, %c0_i32 : i32, i32
  }
}

module attributes {stable_mosaic.version = 11 : i64} {
  func.func @_matmul_bias_relu_kernel(%arg0: i32, %arg1: memref<64x576xbf16, #tpu.memory_space<vmem>>, %arg2: memref<576x64xbf16, #tpu.memory_space<vmem>>, %arg3: memref<1x64xf32, #tpu.memory_space<vmem>>, %arg4: memref<64x64xbf16, #tpu.memory_space<vmem>>) attributes {dimension_semantics = [#tpu.dimension_semantics<parallel>], iteration_bounds = array<i64: 2>, scalar_prefetch = 0 : i64, scratch_operands = 0 : i64, tpu.core_type = #tpu.core_type<tc>, window_params = [{transform_indices = @transform_0, window_bounds = array<i64: 64, 576>}, {pipeline_mode = #tpu.pipeline_mode<synchronous>, transform_indices = @transform_1, window_bounds = array<i64: 576, 64>}, {pipeline_mode = #tpu.pipeline_mode<synchronous>, transform_indices = @transform_2, window_bounds = array<i64: 1, 64>}, {transform_indices = @transform_3, window_bounds = array<i64: 64, 64>}]} {
    %c0 = arith.constant 0 : index
    %c0_0 = arith.constant 0 : index
    %0 = vector.load %arg1[%c0, %c0_0] : memref<64x576xbf16, #tpu.memory_space<vmem>>, vector<64x576xbf16>
    %c0_1 = arith.constant 0 : index
    %c0_2 = arith.constant 0 : index
    %1 = vector.load %arg2[%c0_1, %c0_2] : memref<576x64xbf16, #tpu.memory_space<vmem>>, vector<576x64xbf16>
    %cst = arith.constant dense<0.000000e+00> : vector<64x64xf32>
    %2 = tpu.matmul %0, %1, %cst {dimension_numbers = #tpu.dot_dimension_numbers<[1], [0], [0], [1], [0, 0, 1, 1], [], []>} : vector<64x576xbf16>, vector<576x64xbf16>, vector<64x64xf32> -> vector<64x64xf32>
    %c0_3 = arith.constant 0 : index
    %c0_4 = arith.constant 0 : index
    %3 = vector.load %arg3[%c0_3, %c0_4] : memref<1x64xf32, #tpu.memory_space<vmem>>, vector<1x64xf32>
    %4 = vector.broadcast %3 : vector<1x64xf32> to vector<64x64xf32>
    %5 = arith.addf %2, %4 : vector<64x64xf32>
    %cst_5 = arith.constant 0.000000e+00 : f32
    %6 = vector.broadcast %cst_5 : f32 to vector<64x64xf32>
    %7 = arith.maximumf %5, %6 : vector<64x64xf32>
    %8 = arith.truncf %7 : vector<64x64xf32> to vector<64x64xbf16>
    %c0_6 = arith.constant 0 : index
    %c0_7 = arith.constant 0 : index
    %9 = vector.load %arg4[%c0_6, %c0_7] : memref<64x64xbf16, #tpu.memory_space<vmem>>, vector<64x64xbf16>
    tpu.vector_store %arg4[%c0_6, %c0_7], %8 {strides = array<i32>} : memref<64x64xbf16, #tpu.memory_space<vmem>>, vector<64x64xbf16>,
    return
  }
  func.func @transform_0(%arg0: i32) -> (i32, i32) {
    %c0_i32 = arith.constant 0 : i32
    %c0_i32_0 = arith.constant 0 : i32
    return %arg0, %c0_i32 : i32, i32
  }
  func.func @transform_1(%arg0: i32) -> (i32, i32) {
    %c0_i32 = arith.constant 0 : i32
    %c0_i32_0 = arith.constant 0 : i32
    %c0_i32_1 = arith.constant 0 : i32
    return %c0_i32, %c0_i32_0 : i32, i32
  }
  func.func @transform_2(%arg0: i32) -> (i32, i32) {
    %c0_i32 = arith.constant 0 : i32
    %c0_i32_0 = arith.constant 0 : i32
    %c0_i32_1 = arith.constant 0 : i32
    return %c0_i32, %c0_i32_0 : i32, i32
  }
  func.func @transform_3(%arg0: i32) -> (i32, i32) {
    %c0_i32 = arith.constant 0 : i32
    %c0_i32_0 = arith.constant 0 : i32
    return %arg0, %c0_i32 : i32, i32
  }
}

module attributes {stable_mosaic.version = 11 : i64} {
  func.func @_fc_fused_kernel(%arg0: i32, %arg1: memref<16x3136xbf16, #tpu.memory_space<vmem>>, %arg2: memref<3136x512xbf16, #tpu.memory_space<vmem>>, %arg3: memref<1x512xf32, #tpu.memory_space<vmem>>, %arg4: memref<512x18xbf16, #tpu.memory_space<vmem>>, %arg5: memref<1x18xf32, #tpu.memory_space<vmem>>, %arg6: memref<16x18xf32, #tpu.memory_space<vmem>>) attributes {dimension_semantics = [#tpu.dimension_semantics<parallel>], iteration_bounds = array<i64: 1>, scalar_prefetch = 0 : i64, scratch_operands = 0 : i64, tpu.core_type = #tpu.core_type<tc>, window_params = [{transform_indices = @transform_0, window_bounds = array<i64: 16, 3136>}, {pipeline_mode = #tpu.pipeline_mode<synchronous>, transform_indices = @transform_1, window_bounds = array<i64: 3136, 512>}, {pipeline_mode = #tpu.pipeline_mode<synchronous>, transform_indices = @transform_2, window_bounds = array<i64: 1, 512>}, {pipeline_mode = #tpu.pipeline_mode<synchronous>, transform_indices = @transform_3, window_bounds = array<i64: 512, 18>}, {pipeline_mode = #tpu.pipeline_mode<synchronous>, transform_indices = @transform_4, window_bounds = array<i64: 1, 18>}, {transform_indices = @transform_5, window_bounds = array<i64: 16, 18>}]} {
    %c0 = arith.constant 0 : index
    %c0_0 = arith.constant 0 : index
    %0 = vector.load %arg1[%c0, %c0_0] : memref<16x3136xbf16, #tpu.memory_space<vmem>>, vector<16x3136xbf16>
    %c0_1 = arith.constant 0 : index
    %c0_2 = arith.constant 0 : index
    %1 = vector.load %arg2[%c0_1, %c0_2] : memref<3136x512xbf16, #tpu.memory_space<vmem>>, vector<3136x512xbf16>
    %cst = arith.constant dense<0.000000e+00> : vector<16x512xf32>
    %2 = tpu.matmul %0, %1, %cst {dimension_numbers = #tpu.dot_dimension_numbers<[1], [0], [0], [1], [0, 0, 1, 1], [], []>} : vector<16x3136xbf16>, vector<3136x512xbf16>, vector<16x512xf32> -> vector<16x512xf32>
    %c0_3 = arith.constant 0 : index
    %c0_4 = arith.constant 0 : index
    %3 = vector.load %arg3[%c0_3, %c0_4] : memref<1x512xf32, #tpu.memory_space<vmem>>, vector<1x512xf32>
    %4 = vector.broadcast %3 : vector<1x512xf32> to vector<16x512xf32>
    %5 = arith.addf %2, %4 : vector<16x512xf32>
    %cst_5 = arith.constant 0.000000e+00 : f32
    %6 = vector.broadcast %cst_5 : f32 to vector<16x512xf32>
    %7 = arith.maximumf %5, %6 : vector<16x512xf32>
    %8 = arith.truncf %7 : vector<16x512xf32> to vector<16x512xbf16>
    %c0_6 = arith.constant 0 : index
    %c0_7 = arith.constant 0 : index
    %9 = vector.load %arg4[%c0_6, %c0_7] : memref<512x18xbf16, #tpu.memory_space<vmem>>, vector<512x18xbf16>
    %cst_8 = arith.constant dense<0.000000e+00> : vector<16x18xf32>
    %10 = tpu.matmul %8, %9, %cst_8 {dimension_numbers = #tpu.dot_dimension_numbers<[1], [0], [0], [1], [0, 0, 1, 1], [], []>} : vector<16x512xbf16>, vector<512x18xbf16>, vector<16x18xf32> -> vector<16x18xf32>
    %c0_9 = arith.constant 0 : index
    %c0_10 = arith.constant 0 : index
    %11 = vector.load %arg5[%c0_9, %c0_10] : memref<1x18xf32, #tpu.memory_space<vmem>>, vector<1x18xf32>
    %12 = vector.broadcast %11 : vector<1x18xf32> to vector<16x18xf32>
    %13 = arith.addf %10, %12 : vector<16x18xf32>
    %c0_11 = arith.constant 0 : index
    %c0_12 = arith.constant 0 : index
    %14 = vector.load %arg6[%c0_11, %c0_12] : memref<16x18xf32, #tpu.memory_space<vmem>>, vector<16x18xf32>
    tpu.vector_store %arg6[%c0_11, %c0_12], %13 {strides = array<i32>} : memref<16x18xf32, #tpu.memory_space<vmem>>, vector<16x18xf32>,
    return
  }
  func.func @transform_0(%arg0: i32) -> (i32, i32) {
    %c0_i32 = arith.constant 0 : i32
    %c0_i32_0 = arith.constant 0 : i32
    return %arg0, %c0_i32 : i32, i32
  }
  func.func @transform_1(%arg0: i32) -> (i32, i32) {
    %c0_i32 = arith.constant 0 : i32
    %c0_i32_0 = arith.constant 0 : i32
    %c0_i32_1 = arith.constant 0 : i32
    return %c0_i32, %c0_i32_0 : i32, i32
  }
  func.func @transform_2(%arg0: i32) -> (i32, i32) {
    %c0_i32 = arith.constant 0 : i32
    %c0_i32_0 = arith.constant 0 : i32
    %c0_i32_1 = arith.constant 0 : i32
    return %c0_i32, %c0_i32_0 : i32, i32
  }
  func.func @transform_3(%arg0: i32) -> (i32, i32) {
    %c0_i32 = arith.constant 0 : i32
    %c0_i32_0 = arith.constant 0 : i32
    %c0_i32_1 = arith.constant 0 : i32
    return %c0_i32, %c0_i32_0 : i32, i32
  }
  func.func @transform_4(%arg0: i32) -> (i32, i32) {
    %c0_i32 = arith.constant 0 : i32
    %c0_i32_0 = arith.constant 0 : i32
    %c0_i32_1 = arith.constant 0 : i32
    return %c0_i32, %c0_i32_0 : i32, i32
  }
  func.func @transform_5(%arg0: i32) -> (i32, i32) {
    %c0_i32 = arith.constant 0 : i32
    %c0_i32_0 = arith.constant 0 : i32
    return %arg0, %c0_i32 : i32, i32
  }
}

</mosaic_0001>

<bundles_post_ra>
// kernel: dqn_forward.4
= control target key start
LH: loop header
LB: loop body
LE: loop exit
PB: predicated region body
PF: predicated region fallthrough
CT: control target
= control target key end

     0   :  { %s1542_s12 = smov 0   ;;  %s1852_s0 = inlined_call_operand.vmem [shape: bf16[800,256], index: 0, kind: input, shape index: {}]   ;;  %s1853_s1 = inlined_call_operand.vmem [shape: bf16[256,32], index: 1, kind: input, shape index: {}]   ;;  %s1854_s2 = inlined_call_operand.vmem [shape: f32[1,32], index: 2, kind: input, shape index: {}]   ;;  %s1855_s3 = inlined_call_operand.vmem [shape: bf16[800,32], index: 3, kind: output, shape index: {}]  }
   0x1 LB: > { %s1203_s13 = sadd.s32 4294967295, %s1519_s12   ;;  %p1207_p0 = scmp.ge.s32.totalorder %s1519_s12, 1  ;;  %s1519_s12 = sphi %s1542_s12, %s13_s12  }
   0x2   : > { %p139_p1 = scmp.lt.s32.totalorder %s1519_s12, 3 }
   0x4   : > { %p140_p2 = pnand %p1207_p0, %p139_p1 }
   0x5   : > { %s164_s16 = smul.u32 (!%p140_p2), 50, %s1203_s13 }
   0x6   : > { %143 = sbr.rel (%p140_p2) target bundleno = 376 (0x178), region = 32 }
   0x7   : > { %p165_p3 = scmp.lt.s32.totalorder (!%p140_p2), %s164_s16, 99 }
   0xb   : > { %v1422_v0 = vld [vmem:[%s1853_s1 + $0x38] sm:$0xff]   ;;  %v1521_v1 = vmov 0   ;;  %v1423_v2 = vld [vmem:[%s1853_s1 + $0x30] sm:$0xff]   ;;  %v1424_v3 = vld [vmem:[%s1853_s1 + $0x28] sm:$0xff]   ;;  %s1857_s16 = smov (!%p165_p3, %s164_s16), 99  ;;  %vm1096_vm0 = vcmask 257024  }
   0xc   : > { %613 = vmatprep.subr.bf16.mxu0 %v1521_v1  ;;  %1381 = vmatprep.subr.bf16.mxu1 %v1521_v1  ;;  %v1425_v4 = vld [vmem:[%s1853_s1 + $0x20] sm:$0xff]   ;;  %s1330_s23 = sshll.u32 %s1857_s16, 3  ;;  %v1426_v5 = vld [vmem:[%s1853_s1 + $0x18] sm:$0xff]   ;;  %v1427_v7 = vld [vmem:[%s1853_s1 + $0x10] sm:$0xff]   ;;  %s1210_s29 = sshll.u32 %s1857_s16, 2 }
   0xd   : > { %614 = vmatpush1.bf16.msra.mxu0 %v1422_v0  ;;  %1397 = vmatpush1.bf16.msra.mxu1 %v1422_v0  ;;  %s1579_s28 = scalar_lea.vmem %s1852_s0, %s1330_s23  ;;  %v1428_v9 = vld [vmem:[%s1853_s1 + $0x8] sm:$0xff]   ;;  %v1429_v10 = vld [vmem:[%s1853_s1] sm:$0xff]   ;;  %v1430_v11 = vld [vmem:[%s1853_s1 + $0x78] sm:$0xff]  }
   0xe   : > { %615 = vmatprep.subr.bf16.mxu0 %v1521_v1  ;;  %1382 = vmatprep.subr.bf16.mxu1 %v1521_v1  ;;  %v1440_v6 = vld [vmem:[%s1579_s28 + $0x4] ss:$8 sps:$4 sm:$0xff]   ;;  %v1443_v8 = vld [vmem:[%s1579_s28 + $0xd4] ss:$8 sps:$4 sm:$0xff]   ;;  %v1438_v19 = vld [vmem:[%s1579_s28] ss:$8 sps:$4 sm:$0xff]  }
   0xf   : > { %645 = vmatprep.mubr.bf16.mxu0 %v1440_v6  ;;  %749 = vmatprep.mubr.bf16.mxu1 %v1443_v8  ;;  %v1431_v12 = vld [vmem:[%s1853_s1 + $0x70] sm:$0xff]   ;;  %v1432_v13 = vld [vmem:[%s1853_s1 + $0x68] sm:$0xff]   ;;  %v1433_v14 = vld [vmem:[%s1853_s1 + $0x60] sm:$0xff]  }
  0x10   : > { %v1434_v15 = vld [vmem:[%s1853_s1 + $0x58] sm:$0xff]   ;;  %v1435_v16 = vld [vmem:[%s1853_s1 + $0x50] sm:$0xff]   ;;  %v1436_v17 = vld [vmem:[%s1853_s1 + $0x48] sm:$0xff]  }
  0x11   : > { %616 = vmatpush1.bf16.msra.mxu0 %v1423_v2  ;;  %1398 = vmatpush1.bf16.msra.mxu1 %v1423_v2  ;;  %v1437_v18 = vld [vmem:[%s1853_s1 + $0x40] sm:$0xff]   ;;  %v1441_v20 = vld [vmem:[%s1579_s28 + $0xd0] ss:$8 sps:$4 sm:$0xff]   ;;  %v1444_v21 = vld [vmem:[%s1579_s28 + $0x14] ss:$8 sps:$4 sm:$0xff]  }
  0x12   : > { %617 = vmatprep.subr.bf16.mxu0 %v1521_v1  ;;  %1383 = vmatprep.subr.bf16.mxu1 %v1521_v1  ;;  %v1447_v22 = vld [vmem:[%s1579_s28 + $0xe4] ss:$8 sps:$4 sm:$0xff]   ;;  %v1446_v23 = vld [vmem:[%s1579_s28 + $0x10] ss:$8 sps:$4 sm:$0xff]   ;;  %v1449_v24 = vld [vmem:[%s1579_s28 + $0xe0] ss:$8 sps:$4 sm:$0xff]  }
  0x13   : > { %v1450_v25 = vld [vmem:[%s1579_s28 + $0x24] ss:$8 sps:$4 sm:$0xff]   ;;  %v1453_v26 = vld [vmem:[%s1579_s28 + $0xf4] ss:$8 sps:$4 sm:$0xff]   ;;  %v1452_v27 = vld [vmem:[%s1579_s28 + $0x20] ss:$8 sps:$4 sm:$0xff]  }
  0x14   : > { %v1455_v28 = vld [vmem:[%s1579_s28 + $0xf0] ss:$8 sps:$4 sm:$0xff]   ;;  %v1456_v29 = vld [vmem:[%s1579_s28 + $0x34] ss:$8 sps:$4 sm:$0xff]   ;;  %v1459_v30 = vld [vmem:[%s1579_s28 + $0x104] ss:$8 sps:$4 sm:$0xff]  }
  0x15   : > { %618 = vmatpush1.bf16.msra.mxu0 %v1424_v3  ;;  %1399 = vmatpush1.bf16.msra.mxu1 %v1424_v3  ;;  %v1458_v31 = vld [vmem:[%s1579_s28 + $0x30] ss:$8 sps:$4 sm:$0xff]   ;;  %v1461_v32 = vld [vmem:[%s1579_s28 + $0x100] ss:$8 sps:$4 sm:$0xff]   ;;  %v1462_v33 = vld [vmem:[%s1579_s28 + $0x44] ss:$8 sps:$4 sm:$0xff]  }
  0x16   : > { %619 = vmatprep.subr.bf16.mxu0 %v1521_v1  ;;  %1384 = vmatprep.subr.bf16.mxu1 %v1521_v1  ;;  %v1465_v34 = vld [vmem:[%s1579_s28 + $0x114] ss:$8 sps:$4 sm:$0xff]   ;;  %v1464_v35 = vld [vmem:[%s1579_s28 + $0x40] ss:$8 sps:$4 sm:$0xff]   ;;  %v1467_v36 = vld [vmem:[%s1579_s28 + $0x110] ss:$8 sps:$4 sm:$0xff]  }
  0x17   : > { %v1468_v37 = vld [vmem:[%s1579_s28 + $0x54] ss:$8 sps:$4 sm:$0xff]   ;;  %v1471_v38 = vld [vmem:[%s1579_s28 + $0x124] ss:$8 sps:$4 sm:$0xff]   ;;  %v1470_v39 = vld [vmem:[%s1579_s28 + $0x50] ss:$8 sps:$4 sm:$0xff]  }
  0x18   : > { %v1473_v40 = vld [vmem:[%s1579_s28 + $0x120] ss:$8 sps:$4 sm:$0xff]   ;;  %v1474_v41 = vld [vmem:[%s1579_s28 + $0x64] ss:$8 sps:$4 sm:$0xff]   ;;  %v1477_v42 = vld [vmem:[%s1579_s28 + $0x134] ss:$8 sps:$4 sm:$0xff]  }
  0x19   : > { %620 = vmatpush1.bf16.msra.mxu0 %v1425_v4  ;;  %1400 = vmatpush1.bf16.msra.mxu1 %v1425_v4  ;;  %v1476_v43 = vld [vmem:[%s1579_s28 + $0x60] ss:$8 sps:$4 sm:$0xff]   ;;  %v1479_v44 = vld [vmem:[%s1579_s28 + $0x130] ss:$8 sps:$4 sm:$0xff]   ;;  %v1480_v45 = vld [vmem:[%s1579_s28 + $0x74] ss:$8 sps:$4 sm:$0xff]  }
  0x1a   : > { %621 = vmatprep.subr.bf16.mxu0 %v1521_v1  ;;  %1385 = vmatprep.subr.bf16.mxu1 %v1521_v1  ;;  %v1483_v46 = vld [vmem:[%s1579_s28 + $0x144] ss:$8 sps:$4 sm:$0xff]   ;;  %v1482_v47 = vld [vmem:[%s1579_s28 + $0x70] ss:$8 sps:$4 sm:$0xff]   ;;  %v1485_v48 = vld [vmem:[%s1579_s28 + $0x140] ss:$8 sps:$4 sm:$0xff]  }
  0x1b   : > { %v1486_v49 = vld [vmem:[%s1579_s28 + $0x84] ss:$8 sps:$4 sm:$0xff]   ;;  %v1489_v50 = vld [vmem:[%s1579_s28 + $0x154] ss:$8 sps:$4 sm:$0xff]   ;;  %v1488_v51 = vld [vmem:[%s1579_s28 + $0x80] ss:$8 sps:$4 sm:$0xff]  }
  0x1c   : > { %v1491_v52 = vld [vmem:[%s1579_s28 + $0x150] ss:$8 sps:$4 sm:$0xff]   ;;  %v1492_v53 = vld [vmem:[%s1579_s28 + $0x94] ss:$8 sps:$4 sm:$0xff]   ;;  %v1495_v54 = vld [vmem:[%s1579_s28 + $0x164] ss:$8 sps:$4 sm:$0xff]  }
  0x1d   : > { %622 = vmatpush1.bf16.msra.mxu0 %v1426_v5  ;;  %1401 = vmatpush1.bf16.msra.mxu1 %v1426_v5  ;;  %v1494_v55 = vld [vmem:[%s1579_s28 + $0x90] ss:$8 sps:$4 sm:$0xff]   ;;  %v1497_v56 = vld [vmem:[%s1579_s28 + $0x160] ss:$8 sps:$4 sm:$0xff]   ;;  %v1498_v57 = vld [vmem:[%s1579_s28 + $0xa4] ss:$8 sps:$4 sm:$0xff]  }
  0x1e   : > { %623 = vmatprep.subr.bf16.mxu0 %v1521_v1  ;;  %1386 = vmatprep.subr.bf16.mxu1 %v1521_v1  ;;  %v1501_v58 = vld [vmem:[%s1579_s28 + $0x174] ss:$8 sps:$4 sm:$0xff]   ;;  %v1500_v59 = vld [vmem:[%s1579_s28 + $0xa0] ss:$8 sps:$4 sm:$0xff]   ;;  %v1503_v60 = vld [vmem:[%s1579_s28 + $0x170] ss:$8 sps:$4 sm:$0xff]  }
  0x1f   : > { %v1504_v61 = vld [vmem:[%s1579_s28 + $0xb4] ss:$8 sps:$4 sm:$0xff]   ;;  %v1507_v62 = vld [vmem:[%s1579_s28 + $0x184] ss:$8 sps:$4 sm:$0xff]   ;;  %v1506_v63 = vld [vmem:[%s1579_s28 + $0xb0] ss:$8 sps:$4 sm:$0xff]  }
  0x20   : > { %v1509_v0 = vld [vmem:[%s1579_s28 + $0x180] ss:$8 sps:$4 sm:$0xff]  }
  0x21   : > { %624 = vmatpush1.bf16.msra.mxu0 %v1427_v7  ;;  %1402 = vmatpush1.bf16.msra.mxu1 %v1427_v7  ;;  %v1512_v2 = vld [vmem:[%s1579_s28 + $0xc0] ss:$8 sps:$4 sm:$0xff]  }
  0x22   : > { %625 = vmatprep.subr.bf16.mxu0 %v1521_v1  ;;  %1387 = vmatprep.subr.bf16.mxu1 %v1521_v1  ;;  %v1691_v3 = vld [vmem:[%s1854_s2] ss:$0 sm:$0xff] }
  0x25   : > { %626 = vmatpush1.bf16.msra.mxu0 %v1428_v9  ;;  %1403 = vmatpush1.bf16.msra.mxu1 %v1428_v9 }
  0x26   : > { %627 = vmatprep.subr.bf16.mxu0 %v1521_v1  ;;  %1388 = vmatprep.subr.bf16.mxu1 %v1521_v1 }
  0x29   : > { %628 = vmatpush1.bf16.msra.mxu0 %v1429_v10  ;;  %1404 = vmatpush1.bf16.msra.mxu1 %v1429_v10 }
  0x2a   : > { %629 = vmatprep.subr.bf16.mxu0 %v1521_v1  ;;  %1389 = vmatprep.subr.bf16.mxu1 %v1521_v1 }
  0x2d   : > { %630 = vmatpush2.bf16.msra.mxu0 %v1430_v11  ;;  %1405 = vmatpush2.bf16.msra.mxu1 %v1430_v11 }
  0x2e   : > { %631 = vmatprep.subr.bf16.mxu0 %v1521_v1  ;;  %1390 = vmatprep.subr.bf16.mxu1 %v1521_v1 }
  0x31   : > { %632 = vmatpush2.bf16.msra.mxu0 %v1431_v12  ;;  %1406 = vmatpush2.bf16.msra.mxu1 %v1431_v12 }
  0x32   : > { %633 = vmatprep.subr.bf16.mxu0 %v1521_v1  ;;  %1391 = vmatprep.subr.bf16.mxu1 %v1521_v1 }
  0x35   : > { %634 = vmatpush2.bf16.msra.mxu0 %v1432_v13  ;;  %1407 = vmatpush2.bf16.msra.mxu1 %v1432_v13 }
  0x36   : > { %635 = vmatprep.subr.bf16.mxu0 %v1521_v1  ;;  %1392 = vmatprep.subr.bf16.mxu1 %v1521_v1 }
  0x39   : > { %636 = vmatpush2.bf16.msra.mxu0 %v1433_v14  ;;  %1408 = vmatpush2.bf16.msra.mxu1 %v1433_v14 }
  0x3a   : > { %637 = vmatprep.subr.bf16.mxu0 %v1521_v1  ;;  %1393 = vmatprep.subr.bf16.mxu1 %v1521_v1 }
  0x3d   : > { %638 = vmatpush2.bf16.msra.mxu0 %v1434_v15  ;;  %1409 = vmatpush2.bf16.msra.mxu1 %v1434_v15 }
  0x3e   : > { %639 = vmatprep.subr.bf16.mxu0 %v1521_v1  ;;  %1394 = vmatprep.subr.bf16.mxu1 %v1521_v1 }
  0x41   : > { %640 = vmatpush2.bf16.msra.mxu0 %v1435_v16  ;;  %1410 = vmatpush2.bf16.msra.mxu1 %v1435_v16 }
  0x42   : > { %641 = vmatprep.subr.bf16.mxu0 %v1521_v1  ;;  %1395 = vmatprep.subr.bf16.mxu1 %v1521_v1 }
  0x45   : > { %642 = vmatpush2.bf16.msra.mxu0 %v1436_v17  ;;  %1411 = vmatpush2.bf16.msra.mxu1 %v1436_v17 }
  0x46   : > { %643 = vmatprep.subr.bf16.mxu0 %v1521_v1  ;;  %1396 = vmatprep.subr.bf16.mxu1 %v1521_v1  ;;  %v1510_v1 = vld [vmem:[%s1579_s28 + $0xc4] ss:$8 sps:$4 sm:$0xff]   ;;  %s1699_s28 = scalar_lea.vmem %s1855_s3, %s1210_s29 }
  0x49   : > { %644 = vmatpush2.bf16.msra.mxu0 %v1437_v18  ;;  %1412 = vmatpush2.bf16.msra.mxu1 %v1437_v18 }
  0x4c   : > { %646 = vmatmul.mubr.bf16.vlgmr.msra.gmra.mxu0 %v1438_v19  ;;  %750 = vmatmul.mubr.bf16.vlgmr.msra.gmra.mxu1 %v1441_v20 }
  0x4d   : > { %653 = vmatprep.mubr.bf16.mxu0 %v1444_v21  ;;  %757 = vmatprep.mubr.bf16.mxu1 %v1447_v22 }
  0x54   : > { %654 = vmatmul.mubr.bf16.gmra.mxu0 %v1446_v23  ;;  %758 = vmatmul.mubr.bf16.gmra.mxu1 %v1449_v24 }
  0x55   : > { %661 = vmatprep.mubr.bf16.mxu0 %v1450_v25  ;;  %765 = vmatprep.mubr.bf16.mxu1 %v1453_v26 }
  0x5c   : > { %662 = vmatmul.mubr.bf16.gmra.mxu0 %v1452_v27  ;;  %766 = vmatmul.mubr.bf16.gmra.mxu1 %v1455_v28 }
  0x5d   : > { %669 = vmatprep.mubr.bf16.mxu0 %v1456_v29  ;;  %773 = vmatprep.mubr.bf16.mxu1 %v1459_v30 }
  0x64   : > { %670 = vmatmul.mubr.bf16.gmra.mxu0 %v1458_v31  ;;  %774 = vmatmul.mubr.bf16.gmra.mxu1 %v1461_v32 }
  0x65   : > { %677 = vmatprep.mubr.bf16.mxu0 %v1462_v33  ;;  %781 = vmatprep.mubr.bf16.mxu1 %v1465_v34 }
  0x6c   : > { %678 = vmatmul.mubr.bf16.gmra.mxu0 %v1464_v35  ;;  %782 = vmatmul.mubr.bf16.gmra.mxu1 %v1467_v36 }
  0x6d   : > { %685 = vmatprep.mubr.bf16.mxu0 %v1468_v37  ;;  %789 = vmatprep.mubr.bf16.mxu1 %v1471_v38 }
  0x74   : > { %686 = vmatmul.mubr.bf16.gmra.mxu0 %v1470_v39  ;;  %790 = vmatmul.mubr.bf16.gmra.mxu1 %v1473_v40 }
  0x75   : > { %693 = vmatprep.mubr.bf16.mxu0 %v1474_v41  ;;  %797 = vmatprep.mubr.bf16.mxu1 %v1477_v42 }
  0x7c   : > { %694 = vmatmul.mubr.bf16.gmra.mxu0 %v1476_v43  ;;  %798 = vmatmul.mubr.bf16.gmra.mxu1 %v1479_v44 }
  0x7d   : > { %701 = vmatprep.mubr.bf16.mxu0 %v1480_v45  ;;  %805 = vmatprep.mubr.bf16.mxu1 %v1483_v46 }
  0x84   : > { %702 = vmatmul.mubr.bf16.gmra.mxu0 %v1482_v47  ;;  %806 = vmatmul.mubr.bf16.gmra.mxu1 %v1485_v48 }
  0x85   : > { %709 = vmatprep.mubr.bf16.mxu0 %v1486_v49  ;;  %813 = vmatprep.mubr.bf16.mxu1 %v1489_v50 }
  0x8c   : > { %710 = vmatmul.mubr.bf16.gmra.mxu0 %v1488_v51  ;;  %814 = vmatmul.mubr.bf16.gmra.mxu1 %v1491_v52 }
  0x8d   : > { %717 = vmatprep.mubr.bf16.mxu0 %v1492_v53  ;;  %821 = vmatprep.mubr.bf16.mxu1 %v1495_v54 }
  0x94   : > { %718 = vmatmul.mubr.bf16.gmra.mxu0 %v1494_v55  ;;  %822 = vmatmul.mubr.bf16.gmra.mxu1 %v1497_v56 }
  0x95   : > { %725 = vmatprep.mubr.bf16.mxu0 %v1498_v57  ;;  %829 = vmatprep.mubr.bf16.mxu1 %v1501_v58 }
  0x9c   : > { %726 = vmatmul.mubr.bf16.gmra.mxu0 %v1500_v59  ;;  %830 = vmatmul.mubr.bf16.gmra.mxu1 %v1503_v60 }
  0x9d   : > { %733 = vmatprep.mubr.bf16.mxu0 %v1504_v61  ;;  %837 = vmatprep.mubr.bf16.mxu1 %v1507_v62 }
  0xa4   : > { %734 = vmatmul.mubr.bf16.gmra.mxu0 %v1506_v63  ;;  %838 = vmatmul.mubr.bf16.gmra.mxu1 %v1509_v0 }
  0xa5   : > { %741 = vmatprep.mubr.bf16.mxu0 %v1510_v1 }
  0xac   : > { %742 = vmatmul.mubr.bf16.gmra.mxu0 %v1512_v2 }
 0x10c   : > { %v647_v4 = vpop.f32.mrf.mxu0  ;;  %v751_v5 = vpop.f32.mrf.mxu1 }
 0x10d   : > { %v648_v6 = vadd.f32 %v1691_v3, %v647_v4  ;;  %v752_v7 = vadd.f32 %v1691_v3, %v751_v5 }
 0x10e   : > { %v649_v8 = vpop.f32.mrf.mxu0  ;;  %v753_v9 = vpop.f32.mrf.mxu1 }
 0x10f   : > { %v846_v10 = vmax.f32 %v648_v6, 0.0  ;;  %v872_v11 = vmax.f32 %v752_v7, 0.0 }
 0x110   : > { %v650_v12 = vpop.f32.mrf.mxu0  ;;  %v754_v13 = vpop.f32.mrf.mxu1 }
 0x111   : > { %v1331_v14 = vpack.c.bf16 %v846_v10, %v846_v10  ;;  %v1357_v15 = vpack.c.bf16 %v872_v11, %v872_v11  ;;  %v651_v16 = vadd.f32 %v1691_v3, %v650_v12  ;;  %v755_v17 = vadd.f32 %v1691_v3, %v754_v13 }
 0x112   : > { %v652_v18 = vpop.f32.mrf.mxu0  ;;  %v756_v19 = vpop.f32.mrf.mxu1 }
 0x113   : > { %1097 = vst.msk [vmem:[%s1699_s28] sm:$0xf] %vm1096_vm0, %v1331_v14  ;;  %1123 = vst.msk [vmem:[%s1699_s28 + $0x68] sm:$0xf] %vm1096_vm0, %v1357_v15  ;;  %v847_v20 = vmax.f32 %v651_v16, 0.0  ;;  %v873_v21 = vmax.f32 %v755_v17, 0.0 }
 0x114   : > { %v655_v22 = vpop.f32.mrf.mxu0  ;;  %v759_v23 = vpop.f32.mrf.mxu1 }
 0x115   : > { %v1332_v24 = vpack.c.bf16 %v847_v20, %v847_v20  ;;  %v1358_v25 = vpack.c.bf16 %v873_v21, %v873_v21  ;;  %v656_v26 = vadd.f32 %v1691_v3, %v655_v22  ;;  %v760_v27 = vadd.f32 %v1691_v3, %v759_v23 }
 0x116   : > { %v657_v28 = vpop.f32.mrf.mxu0  ;;  %v761_v29 = vpop.f32.mrf.mxu1 }
 0x117   : > { %1098 = vst.msk [vmem:[%s1699_s28 + $0x4] sm:$0xf] %vm1096_vm0, %v1332_v24  ;;  %1124 = vst.msk [vmem:[%s1699_s28 + $0x6c] sm:$0xf] %vm1096_vm0, %v1358_v25  ;;  %v848_v30 = vmax.f32 %v656_v26, 0.0  ;;  %v874_v31 = vmax.f32 %v760_v27, 0.0 }
 0x118   : > { %v658_v32 = vpop.f32.mrf.mxu0  ;;  %v762_v33 = vpop.f32.mrf.mxu1 }
 0x119   : > { %v1333_v34 = vpack.c.bf16 %v848_v30, %v848_v30  ;;  %v1359_v35 = vpack.c.bf16 %v874_v31, %v874_v31  ;;  %v659_v36 = vadd.f32 %v1691_v3, %v658_v32  ;;  %v763_v37 = vadd.f32 %v1691_v3, %v762_v33 }
 0x11a   : > { %v660_v38 = vpop.f32.mrf.mxu0  ;;  %v764_v39 = vpop.f32.mrf.mxu1 }
 0x11b   : > { %1099 = vst.msk [vmem:[%s1699_s28 + $0x8] sm:$0xf] %vm1096_vm0, %v1333_v34  ;;  %1125 = vst.msk [vmem:[%s1699_s28 + $0x70] sm:$0xf] %vm1096_vm0, %v1359_v35  ;;  %v849_v40 = vmax.f32 %v659_v36, 0.0  ;;  %v875_v41 = vmax.f32 %v763_v37, 0.0 }
 0x11c   : > { %v663_v42 = vpop.f32.mrf.mxu0  ;;  %v767_v43 = vpop.f32.mrf.mxu1 }
 0x11d   : > { %v1334_v44 = vpack.c.bf16 %v849_v40, %v849_v40  ;;  %v1360_v45 = vpack.c.bf16 %v875_v41, %v875_v41  ;;  %v664_v46 = vadd.f32 %v1691_v3, %v663_v42  ;;  %v768_v47 = vadd.f32 %v1691_v3, %v767_v43 }
 0x11e   : > { %v665_v48 = vpop.f32.mrf.mxu0  ;;  %v769_v49 = vpop.f32.mrf.mxu1 }
 0x11f   : > { %1100 = vst.msk [vmem:[%s1699_s28 + $0xc] sm:$0xf] %vm1096_vm0, %v1334_v44  ;;  %1126 = vst.msk [vmem:[%s1699_s28 + $0x74] sm:$0xf] %vm1096_vm0, %v1360_v45  ;;  %v850_v50 = vmax.f32 %v664_v46, 0.0  ;;  %v876_v51 = vmax.f32 %v768_v47, 0.0 }
 0x120   : > { %v666_v52 = vpop.f32.mrf.mxu0  ;;  %v770_v53 = vpop.f32.mrf.mxu1 }
 0x121   : > { %v1335_v54 = vpack.c.bf16 %v850_v50, %v850_v50  ;;  %v1361_v55 = vpack.c.bf16 %v876_v51, %v876_v51  ;;  %v667_v56 = vadd.f32 %v1691_v3, %v666_v52  ;;  %v771_v57 = vadd.f32 %v1691_v3, %v770_v53 }
 0x122   : > { %v668_v58 = vpop.f32.mrf.mxu0  ;;  %v772_v59 = vpop.f32.mrf.mxu1 }
 0x123   : > { %1101 = vst.msk [vmem:[%s1699_s28 + $0x10] sm:$0xf] %vm1096_vm0, %v1335_v54  ;;  %1127 = vst.msk [vmem:[%s1699_s28 + $0x78] sm:$0xf] %vm1096_vm0, %v1361_v55  ;;  %v851_v60 = vmax.f32 %v667_v56, 0.0  ;;  %v877_v61 = vmax.f32 %v771_v57, 0.0 }
 0x124   : > { %v671_v62 = vpop.f32.mrf.mxu0  ;;  %v775_v63 = vpop.f32.mrf.mxu1 }
 0x125   : > { %v1336_v0 = vpack.c.bf16 %v851_v60, %v851_v60  ;;  %v1362_v1 = vpack.c.bf16 %v877_v61, %v877_v61  ;;  %v672_v2 = vadd.f32 %v1691_v3, %v671_v62  ;;  %v776_v4 = vadd.f32 %v1691_v3, %v775_v63 }
 0x126   : > { %v673_v5 = vpop.f32.mrf.mxu0  ;;  %v777_v6 = vpop.f32.mrf.mxu1 }
 0x127   : > { %1102 = vst.msk [vmem:[%s1699_s28 + $0x14] sm:$0xf] %vm1096_vm0, %v1336_v0  ;;  %1128 = vst.msk [vmem:[%s1699_s28 + $0x7c] sm:$0xf] %vm1096_vm0, %v1362_v1  ;;  %v852_v7 = vmax.f32 %v672_v2, 0.0  ;;  %v878_v8 = vmax.f32 %v776_v4, 0.0 }
 0x128   : > { %v674_v9 = vpop.f32.mrf.mxu0  ;;  %v778_v10 = vpop.f32.mrf.mxu1 }
 0x129   : > { %v1337_v11 = vpack.c.bf16 %v852_v7, %v852_v7  ;;  %v1363_v12 = vpack.c.bf16 %v878_v8, %v878_v8  ;;  %v675_v13 = vadd.f32 %v1691_v3, %v674_v9  ;;  %v779_v14 = vadd.f32 %v1691_v3, %v778_v10 }
 0x12a   : > { %v676_v15 = vpop.f32.mrf.mxu0  ;;  %v780_v16 = vpop.f32.mrf.mxu1 }
 0x12b   : > { %1103 = vst.msk [vmem:[%s1699_s28 + $0x18] sm:$0xf] %vm1096_vm0, %v1337_v11  ;;  %1129 = vst.msk [vmem:[%s1699_s28 + $0x80] sm:$0xf] %vm1096_vm0, %v1363_v12  ;;  %v853_v17 = vmax.f32 %v675_v13, 0.0  ;;  %v879_v18 = vmax.f32 %v779_v14, 0.0 }
 0x12c   : > { %v679_v19 = vpop.f32.mrf.mxu0  ;;  %v783_v20 = vpop.f32.mrf.mxu1 }
 0x12d   : > { %v1338_v21 = vpack.c.bf16 %v853_v17, %v853_v17  ;;  %v1364_v22 = vpack.c.bf16 %v879_v18, %v879_v18  ;;  %v680_v23 = vadd.f32 %v1691_v3, %v679_v19  ;;  %v784_v24 = vadd.f32 %v1691_v3, %v783_v20 }
 0x12e   : > { %v681_v25 = vpop.f32.mrf.mxu0  ;;  %v785_v26 = vpop.f32.mrf.mxu1 }
 0x12f   : > { %1104 = vst.msk [vmem:[%s1699_s28 + $0x1c] sm:$0xf] %vm1096_vm0, %v1338_v21  ;;  %1130 = vst.msk [vmem:[%s1699_s28 + $0x84] sm:$0xf] %vm1096_vm0, %v1364_v22  ;;  %v854_v27 = vmax.f32 %v680_v23, 0.0  ;;  %v880_v28 = vmax.f32 %v784_v24, 0.0 }
 0x130   : > { %v682_v29 = vpop.f32.mrf.mxu0  ;;  %v786_v30 = vpop.f32.mrf.mxu1 }
 0x131   : > { %v1339_v31 = vpack.c.bf16 %v854_v27, %v854_v27  ;;  %v1365_v32 = vpack.c.bf16 %v880_v28, %v880_v28  ;;  %v683_v33 = vadd.f32 %v1691_v3, %v682_v29  ;;  %v787_v34 = vadd.f32 %v1691_v3, %v786_v30 }
 0x132   : > { %v684_v35 = vpop.f32.mrf.mxu0  ;;  %v788_v36 = vpop.f32.mrf.mxu1 }
 0x133   : > { %1105 = vst.msk [vmem:[%s1699_s28 + $0x20] sm:$0xf] %vm1096_vm0, %v1339_v31  ;;  %1131 = vst.msk [vmem:[%s1699_s28 + $0x88] sm:$0xf] %vm1096_vm0, %v1365_v32  ;;  %v855_v37 = vmax.f32 %v683_v33, 0.0  ;;  %v881_v38 = vmax.f32 %v787_v34, 0.0 }
 0x134   : > { %v687_v39 = vpop.f32.mrf.mxu0  ;;  %v791_v40 = vpop.f32.mrf.mxu1 }
 0x135   : > { %v1340_v41 = vpack.c.bf16 %v855_v37, %v855_v37  ;;  %v1366_v42 = vpack.c.bf16 %v881_v38, %v881_v38  ;;  %v688_v43 = vadd.f32 %v1691_v3, %v687_v39  ;;  %v792_v44 = vadd.f32 %v1691_v3, %v791_v40 }
 0x136   : > { %v689_v45 = vpop.f32.mrf.mxu0  ;;  %v793_v46 = vpop.f32.mrf.mxu1 }
 0x137   : > { %1106 = vst.msk [vmem:[%s1699_s28 + $0x24] sm:$0xf] %vm1096_vm0, %v1340_v41  ;;  %1132 = vst.msk [vmem:[%s1699_s28 + $0x8c] sm:$0xf] %vm1096_vm0, %v1366_v42  ;;  %v856_v47 = vmax.f32 %v688_v43, 0.0  ;;  %v882_v48 = vmax.f32 %v792_v44, 0.0 }
 0x138   : > { %v690_v49 = vpop.f32.mrf.mxu0  ;;  %v794_v50 = vpop.f32.mrf.mxu1 }
 0x139   : > { %v1341_v51 = vpack.c.bf16 %v856_v47, %v856_v47  ;;  %v1367_v52 = vpack.c.bf16 %v882_v48, %v882_v48  ;;  %v691_v53 = vadd.f32 %v1691_v3, %v690_v49  ;;  %v795_v54 = vadd.f32 %v1691_v3, %v794_v50 }
 0x13a   : > { %v692_v55 = vpop.f32.mrf.mxu0  ;;  %v796_v56 = vpop.f32.mrf.mxu1 }
 0x13b   : > { %1107 = vst.msk [vmem:[%s1699_s28 + $0x28] sm:$0xf] %vm1096_vm0, %v1341_v51  ;;  %1133 = vst.msk [vmem:[%s1699_s28 + $0x90] sm:$0xf] %vm1096_vm0, %v1367_v52  ;;  %v857_v57 = vmax.f32 %v691_v53, 0.0  ;;  %v883_v58 = vmax.f32 %v795_v54, 0.0 }
 0x13c   : > { %v695_v59 = vpop.f32.mrf.mxu0  ;;  %v799_v60 = vpop.f32.mrf.mxu1 }
 0x13d   : > { %v1342_v61 = vpack.c.bf16 %v857_v57, %v857_v57  ;;  %v1368_v62 = vpack.c.bf16 %v883_v58, %v883_v58  ;;  %v696_v63 = vadd.f32 %v1691_v3, %v695_v59  ;;  %v800_v0 = vadd.f32 %v1691_v3, %v799_v60 }
 0x13e   : > { %v697_v1 = vpop.f32.mrf.mxu0  ;;  %v801_v2 = vpop.f32.mrf.mxu1 }
 0x13f   : > { %1108 = vst.msk [vmem:[%s1699_s28 + $0x2c] sm:$0xf] %vm1096_vm0, %v1342_v61  ;;  %1134 = vst.msk [vmem:[%s1699_s28 + $0x94] sm:$0xf] %vm1096_vm0, %v1368_v62  ;;  %v858_v4 = vmax.f32 %v696_v63, 0.0  ;;  %v884_v5 = vmax.f32 %v800_v0, 0.0 }
 0x140   : > { %v698_v6 = vpop.f32.mrf.mxu0  ;;  %v802_v7 = vpop.f32.mrf.mxu1 }
 0x141   : > { %v1343_v8 = vpack.c.bf16 %v858_v4, %v858_v4  ;;  %v1369_v9 = vpack.c.bf16 %v884_v5, %v884_v5  ;;  %v699_v10 = vadd.f32 %v1691_v3, %v698_v6  ;;  %v803_v11 = vadd.f32 %v1691_v3, %v802_v7 }
 0x142   : > { %v700_v12 = vpop.f32.mrf.mxu0  ;;  %v804_v13 = vpop.f32.mrf.mxu1 }
 0x143   : > { %1109 = vst.msk [vmem:[%s1699_s28 + $0x30] sm:$0xf] %vm1096_vm0, %v1343_v8  ;;  %1135 = vst.msk [vmem:[%s1699_s28 + $0x98] sm:$0xf] %vm1096_vm0, %v1369_v9  ;;  %v859_v14 = vmax.f32 %v699_v10, 0.0  ;;  %v885_v15 = vmax.f32 %v803_v11, 0.0 }
 0x144   : > { %v703_v16 = vpop.f32.mrf.mxu0  ;;  %v807_v17 = vpop.f32.mrf.mxu1 }
 0x145   : > { %v1344_v18 = vpack.c.bf16 %v859_v14, %v859_v14  ;;  %v1370_v19 = vpack.c.bf16 %v885_v15, %v885_v15  ;;  %v704_v20 = vadd.f32 %v1691_v3, %v703_v16  ;;  %v808_v21 = vadd.f32 %v1691_v3, %v807_v17 }
 0x146   : > { %v705_v22 = vpop.f32.mrf.mxu0  ;;  %v809_v23 = vpop.f32.mrf.mxu1 }
 0x147   : > { %1110 = vst.msk [vmem:[%s1699_s28 + $0x34] sm:$0xf] %vm1096_vm0, %v1344_v18  ;;  %1136 = vst.msk [vmem:[%s1699_s28 + $0x9c] sm:$0xf] %vm1096_vm0, %v1370_v19  ;;  %v860_v24 = vmax.f32 %v704_v20, 0.0  ;;  %v886_v25 = vmax.f32 %v808_v21, 0.0 }
 0x148   : > { %v706_v26 = vpop.f32.mrf.mxu0  ;;  %v810_v27 = vpop.f32.mrf.mxu1 }
 0x149   : > { %v1345_v28 = vpack.c.bf16 %v860_v24, %v860_v24  ;;  %v1371_v29 = vpack.c.bf16 %v886_v25, %v886_v25  ;;  %v707_v30 = vadd.f32 %v1691_v3, %v706_v26  ;;  %v811_v31 = vadd.f32 %v1691_v3, %v810_v27 }
 0x14a   : > { %v708_v32 = vpop.f32.mrf.mxu0  ;;  %v812_v33 = vpop.f32.mrf.mxu1 }
 0x14b   : > { %1111 = vst.msk [vmem:[%s1699_s28 + $0x38] sm:$0xf] %vm1096_vm0, %v1345_v28  ;;  %1137 = vst.msk [vmem:[%s1699_s28 + $0xa0] sm:$0xf] %vm1096_vm0, %v1371_v29  ;;  %v861_v34 = vmax.f32 %v707_v30, 0.0  ;;  %v887_v35 = vmax.f32 %v811_v31, 0.0 }
 0x14c   : > { %v711_v36 = vpop.f32.mrf.mxu0  ;;  %v815_v37 = vpop.f32.mrf.mxu1 }
 0x14d   : > { %v1346_v38 = vpack.c.bf16 %v861_v34, %v861_v34  ;;  %v1372_v39 = vpack.c.bf16 %v887_v35, %v887_v35  ;;  %v712_v40 = vadd.f32 %v1691_v3, %v711_v36  ;;  %v816_v41 = vadd.f32 %v1691_v3, %v815_v37 }
 0x14e   : > { %v713_v42 = vpop.f32.mrf.mxu0  ;;  %v817_v43 = vpop.f32.mrf.mxu1 }
 0x14f   : > { %1112 = vst.msk [vmem:[%s1699_s28 + $0x3c] sm:$0xf] %vm1096_vm0, %v1346_v38  ;;  %1138 = vst.msk [vmem:[%s1699_s28 + $0xa4] sm:$0xf] %vm1096_vm0, %v1372_v39  ;;  %v862_v44 = vmax.f32 %v712_v40, 0.0  ;;  %v888_v45 = vmax.f32 %v816_v41, 0.0 }
 0x150   : > { %v714_v46 = vpop.f32.mrf.mxu0  ;;  %v818_v47 = vpop.f32.mrf.mxu1 }
 0x151   : > { %v1347_v48 = vpack.c.bf16 %v862_v44, %v862_v44  ;;  %v1373_v49 = vpack.c.bf16 %v888_v45, %v888_v45  ;;  %v715_v50 = vadd.f32 %v1691_v3, %v714_v46  ;;  %v819_v51 = vadd.f32 %v1691_v3, %v818_v47 }
 0x152   : > { %v716_v52 = vpop.f32.mrf.mxu0  ;;  %v820_v53 = vpop.f32.mrf.mxu1 }
 0x153   : > { %1113 = vst.msk [vmem:[%s1699_s28 + $0x40] sm:$0xf] %vm1096_vm0, %v1347_v48  ;;  %1139 = vst.msk [vmem:[%s1699_s28 + $0xa8] sm:$0xf] %vm1096_vm0, %v1373_v49  ;;  %v863_v54 = vmax.f32 %v715_v50, 0.0  ;;  %v889_v55 = vmax.f32 %v819_v51, 0.0 }
 0x154   : > { %v719_v56 = vpop.f32.mrf.mxu0  ;;  %v823_v57 = vpop.f32.mrf.mxu1 }
 0x155   : > { %v1348_v58 = vpack.c.bf16 %v863_v54, %v863_v54  ;;  %v1374_v59 = vpack.c.bf16 %v889_v55, %v889_v55  ;;  %v720_v60 = vadd.f32 %v1691_v3, %v719_v56  ;;  %v824_v61 = vadd.f32 %v1691_v3, %v823_v57 }
 0x156   : > { %v721_v62 = vpop.f32.mrf.mxu0  ;;  %v825_v63 = vpop.f32.mrf.mxu1 }
 0x157   : > { %1114 = vst.msk [vmem:[%s1699_s28 + $0x44] sm:$0xf] %vm1096_vm0, %v1348_v58  ;;  %1140 = vst.msk [vmem:[%s1699_s28 + $0xac] sm:$0xf] %vm1096_vm0, %v1374_v59  ;;  %v864_v0 = vmax.f32 %v720_v60, 0.0  ;;  %v890_v1 = vmax.f32 %v824_v61, 0.0 }
 0x158   : > { %v722_v2 = vpop.f32.mrf.mxu0  ;;  %v826_v4 = vpop.f32.mrf.mxu1 }
 0x159   : > { %v1349_v5 = vpack.c.bf16 %v864_v0, %v864_v0  ;;  %v1375_v6 = vpack.c.bf16 %v890_v1, %v890_v1  ;;  %v723_v7 = vadd.f32 %v1691_v3, %v722_v2  ;;  %v827_v8 = vadd.f32 %v1691_v3, %v826_v4 }
 0x15a   : > { %v724_v9 = vpop.f32.mrf.mxu0  ;;  %v828_v10 = vpop.f32.mrf.mxu1 }
 0x15b   : > { %1115 = vst.msk [vmem:[%s1699_s28 + $0x48] sm:$0xf] %vm1096_vm0, %v1349_v5  ;;  %1141 = vst.msk [vmem:[%s1699_s28 + $0xb0] sm:$0xf] %vm1096_vm0, %v1375_v6  ;;  %v865_v11 = vmax.f32 %v723_v7, 0.0  ;;  %v891_v12 = vmax.f32 %v827_v8, 0.0 }
 0x15c   : > { %v727_v13 = vpop.f32.mrf.mxu0  ;;  %v831_v14 = vpop.f32.mrf.mxu1 }
 0x15d   : > { %v1350_v15 = vpack.c.bf16 %v865_v11, %v865_v11  ;;  %v1376_v16 = vpack.c.bf16 %v891_v12, %v891_v12  ;;  %v728_v17 = vadd.f32 %v1691_v3, %v727_v13  ;;  %v832_v18 = vadd.f32 %v1691_v3, %v831_v14 }
 0x15e   : > { %v729_v19 = vpop.f32.mrf.mxu0  ;;  %v833_v20 = vpop.f32.mrf.mxu1 }
 0x15f   : > { %1116 = vst.msk [vmem:[%s1699_s28 + $0x4c] sm:$0xf] %vm1096_vm0, %v1350_v15  ;;  %1142 = vst.msk [vmem:[%s1699_s28 + $0xb4] sm:$0xf] %vm1096_vm0, %v1376_v16  ;;  %v866_v21 = vmax.f32 %v728_v17, 0.0  ;;  %v892_v22 = vmax.f32 %v832_v18, 0.0 }
 0x160   : > { %v730_v23 = vpop.f32.mrf.mxu0  ;;  %v834_v24 = vpop.f32.mrf.mxu1 }
 0x161   : > { %v1351_v25 = vpack.c.bf16 %v866_v21, %v866_v21  ;;  %v1377_v26 = vpack.c.bf16 %v892_v22, %v892_v22  ;;  %v731_v27 = vadd.f32 %v1691_v3, %v730_v23  ;;  %v835_v28 = vadd.f32 %v1691_v3, %v834_v24 }
 0x162   : > { %v732_v29 = vpop.f32.mrf.mxu0  ;;  %v836_v30 = vpop.f32.mrf.mxu1 }
 0x163   : > { %1117 = vst.msk [vmem:[%s1699_s28 + $0x50] sm:$0xf] %vm1096_vm0, %v1351_v25  ;;  %1143 = vst.msk [vmem:[%s1699_s28 + $0xb8] sm:$0xf] %vm1096_vm0, %v1377_v26  ;;  %v867_v31 = vmax.f32 %v731_v27, 0.0  ;;  %v893_v32 = vmax.f32 %v835_v28, 0.0 }
 0x164   : > { %v735_v33 = vpop.f32.mrf.mxu0  ;;  %v839_v34 = vpop.f32.mrf.mxu1 }
 0x165   : > { %v1352_v35 = vpack.c.bf16 %v867_v31, %v867_v31  ;;  %v1378_v36 = vpack.c.bf16 %v893_v32, %v893_v32  ;;  %v736_v37 = vadd.f32 %v1691_v3, %v735_v33  ;;  %v840_v38 = vadd.f32 %v1691_v3, %v839_v34 }
 0x166   : > { %v737_v39 = vpop.f32.mrf.mxu0  ;;  %v841_v40 = vpop.f32.mrf.mxu1 }
 0x167   : > { %1118 = vst.msk [vmem:[%s1699_s28 + $0x54] sm:$0xf] %vm1096_vm0, %v1352_v35  ;;  %1144 = vst.msk [vmem:[%s1699_s28 + $0xbc] sm:$0xf] %vm1096_vm0, %v1378_v36  ;;  %v868_v41 = vmax.f32 %v736_v37, 0.0  ;;  %v894_v42 = vmax.f32 %v840_v38, 0.0 }
 0x168   : > { %v738_v43 = vpop.f32.mrf.mxu0  ;;  %v842_v44 = vpop.f32.mrf.mxu1 }
 0x169   : > { %v1353_v45 = vpack.c.bf16 %v868_v41, %v868_v41  ;;  %v1379_v46 = vpack.c.bf16 %v894_v42, %v894_v42  ;;  %v739_v47 = vadd.f32 %v1691_v3, %v738_v43  ;;  %v843_v48 = vadd.f32 %v1691_v3, %v842_v44 }
 0x16a   : > { %v740_v49 = vpop.f32.mrf.mxu0  ;;  %v844_v50 = vpop.f32.mrf.mxu1 }
 0x16b   : > { %1119 = vst.msk [vmem:[%s1699_s28 + $0x58] sm:$0xf] %vm1096_vm0, %v1353_v45  ;;  %1145 = vst.msk [vmem:[%s1699_s28 + $0xc0] sm:$0xf] %vm1096_vm0, %v1379_v46  ;;  %v869_v51 = vmax.f32 %v739_v47, 0.0  ;;  %v895_v52 = vmax.f32 %v843_v48, 0.0 }
 0x16c   : > { %v743_v53 = vpop.f32.mrf.mxu0 }
 0x16d   : > { %v1354_v54 = vpack.c.bf16 %v869_v51, %v869_v51  ;;  %v1380_v55 = vpack.c.bf16 %v895_v52, %v895_v52  ;;  %v744_v56 = vadd.f32 %v1691_v3, %v743_v53 }
 0x16e   : > { %v745_v57 = vpop.f32.mrf.mxu0 }
 0x16f   : > { %1120 = vst.msk [vmem:[%s1699_s28 + $0x5c] sm:$0xf] %vm1096_vm0, %v1354_v54  ;;  %1146 = vst.msk [vmem:[%s1699_s28 + $0xc4] sm:$0xf] %vm1096_vm0, %v1380_v55  ;;  %v870_v58 = vmax.f32 %v744_v56, 0.0 }
 0x170   : > { %v746_v59 = vpop.f32.mrf.mxu0 }
 0x171   : > { %v1355_v60 = vpack.c.bf16 %v870_v58, %v870_v58  ;;  %v747_v61 = vadd.f32 %v1691_v3, %v746_v59 }
 0x172   : > { %v748_v62 = vpop.f32.mrf.mxu0 }
 0x173   : > { %1121 = vst.msk [vmem:[%s1699_s28 + $0x60] sm:$0xf] %vm1096_vm0, %v1355_v60  ;;  %v871_v63 = vmax.f32 %v747_v61, 0.0 }
 0x175   : > { %v1356_v0 = vpack.c.bf16 %v871_v63, %v871_v63 }
 0x177   : > { %1122 = vst.msk [vmem:[%s1699_s28 + $0x64] sm:$0xf] %vm1096_vm0, %v1356_v0 }
 0x178 PF: > { %s13_s12 = sadd.s32 1, %s1519_s12  }
 0x179   : > { %p10_p4 = scmp.ge.s32.totalorder %s13_s12, 4  }
 0x17b   :  { %12 = sbr.rel (!%p10_p4) target bundleno = 1 (0x1), region = 62 }

// kernel: dqn_forward.5
= control target key start
LH: loop header
LB: loop body
LE: loop exit
PB: predicated region body
PF: predicated region fallthrough
CT: control target
= control target key end

     0   :  { %s1176_s12 = smov 0   ;;  %s1364_s0 = inlined_call_operand.vmem [shape: bf16[192,512], index: 0, kind: input, shape index: {}]   ;;  %s1365_s1 = inlined_call_operand.vmem [shape: bf16[512,64], index: 1, kind: input, shape index: {}]   ;;  %s1366_s2 = inlined_call_operand.vmem [shape: f32[1,64], index: 2, kind: input, shape index: {}]   ;;  %s1367_s3 = inlined_call_operand.vmem [shape: bf16[192,64], index: 3, kind: output, shape index: {}]  }
   0x1 LB: > { %s876_s13 = sadd.s32 4294967295, %s1154_s12   ;;  %p880_p0 = scmp.ge.s32.totalorder %s1154_s12, 1  ;;  %s1154_s12 = sphi %s1176_s12, %s13_s12  }
   0x2   : > { %p139_p1 = scmp.lt.s32.totalorder %s1154_s12, 3 }
   0x4   : > { %p140_p2 = pnand %p880_p0, %p139_p1 }
   0x5   : > { %s164_s19 = smul.u32 (!%p140_p2), 12, %s876_s13 }
   0x6   : > { %143 = sbr.rel (%p140_p2) target bundleno = 295 (0x127), region = 32 }
   0x7   : > { %p165_p3 = scmp.lt.s32.totalorder (!%p140_p2), %s164_s19, 23 }
   0xb   : > { %v1080_v0 = vld [vmem:[%s1365_s1 + $0x78] sm:$0xff]   ;;  %v1084_v4 = vld [vmem:[%s1365_s1 + $0x70] sm:$0xff]   ;;  %v1088_v8 = vld [vmem:[%s1365_s1 + $0x68] sm:$0xff]   ;;  %s1369_s19 = smov (!%p165_p3, %s164_s19), 23  ;;  %vm807_vm0 = vcmask 519168  }
   0xc   : > { %v1081_v1 = vld [vmem:[%s1365_s1 + $0xf8] sm:$0xff]   ;;  %968 = vmatprep.subr.bf16.mxu0 %v1080_v0  ;;  %v1085_v5 = vld [vmem:[%s1365_s1 + $0xf0] sm:$0xff]   ;;  %v1089_v9 = vld [vmem:[%s1365_s1 + $0xe8] sm:$0xff]   ;;  %s955_s18 = sshll.u32 %s1369_s19, 4  ;;  %s883_s7 = sshll.u32 %s1369_s19, 2 }
   0xd   : > { %v1082_v2 = vld [vmem:[%s1365_s1 + $0x38] sm:$0xff]   ;;  %1020 = vmatprep.subr.bf16.mxu1 %v1081_v1  ;;  %v1086_v6 = vld [vmem:[%s1365_s1 + $0x30] sm:$0xff]   ;;  %v1090_v10 = vld [vmem:[%s1365_s1 + $0x28] sm:$0xff]   ;;  %s1282_s13 = scalar_lea.vmem %s1364_s0, %s955_s18  ;;  %s1325_s10 = scalar_lea.vmem %s1367_s3, %s883_s7 }
   0xe   : > { %v1083_v3 = vld [vmem:[%s1365_s1 + $0xb8] sm:$0xff]   ;;  %969 = vmatpush3.bf16.msra.mxu0 %v1082_v2  ;;  %v1087_v7 = vld [vmem:[%s1365_s1 + $0xb0] sm:$0xff]   ;;  %v1091_v11 = vld [vmem:[%s1365_s1 + $0xa8] sm:$0xff]  }
   0xf   : > { %1021 = vmatpush3.bf16.msra.mxu1 %v1083_v3  ;;  %970 = vmatprep.subr.bf16.mxu0 %v1084_v4  ;;  %v1092_v12 = vld [vmem:[%s1365_s1 + $0x60] sm:$0xff]   ;;  %v1096_v16 = vld [vmem:[%s1365_s1 + $0x58] sm:$0xff]   ;;  %v1100_v20 = vld [vmem:[%s1365_s1 + $0x50] sm:$0xff]  }
  0x10   : > { %1022 = vmatprep.subr.bf16.mxu1 %v1085_v5  ;;  %v1093_v13 = vld [vmem:[%s1365_s1 + $0xe0] sm:$0xff]   ;;  %v1097_v17 = vld [vmem:[%s1365_s1 + $0xd8] sm:$0xff]   ;;  %v1101_v21 = vld [vmem:[%s1365_s1 + $0xd0] sm:$0xff]  }
  0x11   : > { %v1094_v14 = vld [vmem:[%s1365_s1 + $0x20] sm:$0xff]   ;;  %v1098_v18 = vld [vmem:[%s1365_s1 + $0x18] sm:$0xff]   ;;  %v1102_v22 = vld [vmem:[%s1365_s1 + $0x10] sm:$0xff]  }
  0x12   : > { %971 = vmatpush3.bf16.msra.mxu0 %v1086_v6  ;;  %v1095_v15 = vld [vmem:[%s1365_s1 + $0xa0] sm:$0xff]   ;;  %v1099_v19 = vld [vmem:[%s1365_s1 + $0x98] sm:$0xff]   ;;  %v1103_v23 = vld [vmem:[%s1365_s1 + $0x90] sm:$0xff]  }
  0x13   : > { %1023 = vmatpush3.bf16.msra.mxu1 %v1087_v7  ;;  %972 = vmatprep.subr.bf16.mxu0 %v1088_v8  ;;  %v1104_v24 = vld [vmem:[%s1365_s1 + $0x48] sm:$0xff]   ;;  %v1108_v28 = vld [vmem:[%s1365_s1 + $0x40] sm:$0xff]  }
  0x14   : > { %1024 = vmatprep.subr.bf16.mxu1 %v1089_v9  ;;  %v1105_v25 = vld [vmem:[%s1365_s1 + $0xc8] sm:$0xff]   ;;  %v1109_v29 = vld [vmem:[%s1365_s1 + $0xc0] sm:$0xff]  }
  0x15   : > { %v1106_v26 = vld [vmem:[%s1365_s1 + $0x8] sm:$0xff]   ;;  %v1110_v30 = vld [vmem:[%s1365_s1] sm:$0xff]  }
  0x16   : > { %973 = vmatpush3.bf16.msra.mxu0 %v1090_v10  ;;  %v1107_v27 = vld [vmem:[%s1365_s1 + $0x88] sm:$0xff]   ;;  %v1111_v31 = vld [vmem:[%s1365_s1 + $0x80] sm:$0xff]  }
  0x17   : > { %1025 = vmatpush3.bf16.msra.mxu1 %v1091_v11  ;;  %974 = vmatprep.subr.bf16.mxu0 %v1092_v12  ;;  %v1112_v32 = vld [vmem:[%s1282_s13] ss:$16 sps:$4 sm:$0xff]   ;;  %v1114_v33 = vld [vmem:[%s1282_s13 + $0x4] ss:$16 sps:$4 sm:$0xff]   ;;  %v1115_v34 = vld [vmem:[%s1282_s13 + $0x8] ss:$16 sps:$4 sm:$0xff]  }
  0x18   : > { %1026 = vmatprep.subr.bf16.mxu1 %v1093_v13  ;;  %v1117_v35 = vld [vmem:[%s1282_s13 + $0xc] ss:$16 sps:$4 sm:$0xff]   ;;  %617 = vmatprep.mubr.bf16.mxu0 %v1114_v33  ;;  %v1118_v36 = vld [vmem:[%s1282_s13 + $0x24] ss:$16 sps:$4 sm:$0xff]   ;;  %v1122_v38 = vld [vmem:[%s1282_s13 + $0x20] ss:$16 sps:$4 sm:$0xff]  }
  0x19   : > { %698 = vmatprep.mubr.bf16.mxu1 %v1117_v35  ;;  %v1120_v37 = vld [vmem:[%s1282_s13 + $0x2c] ss:$16 sps:$4 sm:$0xff]   ;;  %v1123_v39 = vld [vmem:[%s1282_s13 + $0x28] ss:$16 sps:$4 sm:$0xff]   ;;  %v1124_v40 = vld [vmem:[%s1282_s13 + $0x44] ss:$16 sps:$4 sm:$0xff]  }
  0x1a   : > { %975 = vmatpush3.bf16.msra.mxu0 %v1094_v14  ;;  %v1126_v41 = vld [vmem:[%s1282_s13 + $0x4c] ss:$16 sps:$4 sm:$0xff]   ;;  %v1128_v42 = vld [vmem:[%s1282_s13 + $0x40] ss:$16 sps:$4 sm:$0xff]   ;;  %v1129_v43 = vld [vmem:[%s1282_s13 + $0x48] ss:$16 sps:$4 sm:$0xff]  }
  0x1b   : > { %1027 = vmatpush3.bf16.msra.mxu1 %v1095_v15  ;;  %976 = vmatprep.subr.bf16.mxu0 %v1096_v16  ;;  %v1130_v44 = vld [vmem:[%s1282_s13 + $0x64] ss:$16 sps:$4 sm:$0xff]   ;;  %v1132_v45 = vld [vmem:[%s1282_s13 + $0x6c] ss:$16 sps:$4 sm:$0xff]   ;;  %v1134_v46 = vld [vmem:[%s1282_s13 + $0x60] ss:$16 sps:$4 sm:$0xff]  }
  0x1c   : > { %1028 = vmatprep.subr.bf16.mxu1 %v1097_v17  ;;  %v1135_v47 = vld [vmem:[%s1282_s13 + $0x68] ss:$16 sps:$4 sm:$0xff]   ;;  %v1136_v48 = vld [vmem:[%s1282_s13 + $0x84] ss:$16 sps:$4 sm:$0xff]   ;;  %v1138_v49 = vld [vmem:[%s1282_s13 + $0x8c] ss:$16 sps:$4 sm:$0xff]  }
  0x1d   : > { %v1140_v50 = vld [vmem:[%s1282_s13 + $0x80] ss:$16 sps:$4 sm:$0xff]   ;;  %v1141_v51 = vld [vmem:[%s1282_s13 + $0x88] ss:$16 sps:$4 sm:$0xff]   ;;  %v1142_v52 = vld [vmem:[%s1282_s13 + $0xa4] ss:$16 sps:$4 sm:$0xff]  }
  0x1e   : > { %977 = vmatpush3.bf16.msra.mxu0 %v1098_v18  ;;  %v1144_v53 = vld [vmem:[%s1282_s13 + $0xac] ss:$16 sps:$4 sm:$0xff]   ;;  %v1146_v54 = vld [vmem:[%s1282_s13 + $0xa0] ss:$16 sps:$4 sm:$0xff]   ;;  %v1147_v55 = vld [vmem:[%s1282_s13 + $0xa8] ss:$16 sps:$4 sm:$0xff]  }
  0x1f   : > { %1029 = vmatpush3.bf16.msra.mxu1 %v1099_v19  ;;  %978 = vmatprep.subr.bf16.mxu0 %v1100_v20  ;;  %v1317_v58 = vld [vmem:[%s1366_s2] ss:$0 sm:$0xff] }
  0x20   : > { %1030 = vmatprep.subr.bf16.mxu1 %v1101_v21 }
  0x22   : > { %979 = vmatpush3.bf16.msra.mxu0 %v1102_v22 }
  0x23   : > { %1031 = vmatpush3.bf16.msra.mxu1 %v1103_v23  ;;  %980 = vmatprep.subr.bf16.mxu0 %v1104_v24 }
  0x24   : > { %1032 = vmatprep.subr.bf16.mxu1 %v1105_v25 }
  0x26   : > { %981 = vmatpush3.bf16.msra.mxu0 %v1106_v26 }
  0x27   : > { %1033 = vmatpush3.bf16.msra.mxu1 %v1107_v27  ;;  %982 = vmatprep.subr.bf16.mxu0 %v1108_v28 }
  0x28   : > { %1034 = vmatprep.subr.bf16.mxu1 %v1109_v29 }
  0x2a   : > { %983 = vmatpush3.bf16.msra.mxu0 %v1110_v30 }
  0x2b   : > { %1035 = vmatpush3.bf16.msra.mxu1 %v1111_v31 }
  0x2d   : > { %618 = vmatmul.mubr.bf16.vlgmr.msra.gmra.mxu0 %v1112_v32 }
  0x2e   : > { %699 = vmatmul.mubr.bf16.vlgmr.msra.gmra.mxu1 %v1115_v34  ;;  %625 = vmatprep.mubr.bf16.mxu0 %v1118_v36 }
  0x2f   : > { %706 = vmatprep.mubr.bf16.mxu1 %v1120_v37 }
  0x35   : > { %626 = vmatmul.mubr.bf16.gmra.mxu0 %v1122_v38 }
  0x36   : > { %707 = vmatmul.mubr.bf16.gmra.mxu1 %v1123_v39  ;;  %633 = vmatprep.mubr.bf16.mxu0 %v1124_v40 }
  0x37   : > { %714 = vmatprep.mubr.bf16.mxu1 %v1126_v41 }
  0x3d   : > { %634 = vmatmul.mubr.bf16.gmra.mxu0 %v1128_v42 }
  0x3e   : > { %715 = vmatmul.mubr.bf16.gmra.mxu1 %v1129_v43  ;;  %641 = vmatprep.mubr.bf16.mxu0 %v1130_v44 }
  0x3f   : > { %722 = vmatprep.mubr.bf16.mxu1 %v1132_v45 }
  0x45   : > { %642 = vmatmul.mubr.bf16.gmra.mxu0 %v1134_v46 }
  0x46   : > { %723 = vmatmul.mubr.bf16.gmra.mxu1 %v1135_v47  ;;  %649 = vmatprep.mubr.bf16.mxu0 %v1136_v48 }
  0x47   : > { %730 = vmatprep.mubr.bf16.mxu1 %v1138_v49 }
  0x4d   : > { %650 = vmatmul.mubr.bf16.gmra.mxu0 %v1140_v50 }
  0x4e   : > { %731 = vmatmul.mubr.bf16.gmra.mxu1 %v1141_v51  ;;  %657 = vmatprep.mubr.bf16.mxu0 %v1142_v52 }
  0x4f   : > { %738 = vmatprep.mubr.bf16.mxu1 %v1144_v53 }
  0x55   : > { %658 = vmatmul.mubr.bf16.gmra.mxu0 %v1146_v54 }
  0x56   : > { %739 = vmatmul.mubr.bf16.gmra.mxu1 %v1147_v55 }
  0xed   : > { %v984_v56 = vpop.f32.mrf.mxu0 }
  0xee   : > { %v1036_v57 = vpop.f32.mrf.mxu1 }
  0xef   : > { %v985_v59 = vpop.f32.mrf.mxu0 }
  0xf0   : > { %v986_v60 = vadd.f32 %v985_v59, %v984_v56  ;;  %v1037_v61 = vpop.f32.mrf.mxu1 }
  0xf1   : > { %v987_v62 = vpop.f32.mrf.mxu0  ;;  %v1038_v0 = vadd.f32 %v1037_v61, %v1036_v57 }
  0xf2   : > { %v620_v63 = vadd.f32 %v986_v60, %v1317_v58  ;;  %v1039_v1 = vpop.f32.mrf.mxu1 }
  0xf3   : > { %v988_v2 = vpop.f32.mrf.mxu0 }
  0xf4   : > { %v701_v3 = vadd.f32 %v1038_v0, %v620_v63  ;;  %v989_v4 = vadd.f32 %v988_v2, %v987_v62  ;;  %v1040_v5 = vpop.f32.mrf.mxu1 }
  0xf5   : > { %v990_v6 = vpop.f32.mrf.mxu0  ;;  %v1041_v9 = vadd.f32 %v1040_v5, %v1039_v1 }
  0xf6   : > { %v747_v7 = vmax.f32 %v701_v3, 0.0  ;;  %v623_v8 = vadd.f32 %v989_v4, %v1317_v58  ;;  %v1042_v10 = vpop.f32.mrf.mxu1 }
  0xf7   : > { %v991_v11 = vpop.f32.mrf.mxu0 }
  0xf8   : > { %v956_v12 = vpack.c.bf16 %v747_v7, %v747_v7  ;;  %v704_v13 = vadd.f32 %v1041_v9, %v623_v8  ;;  %v992_v14 = vadd.f32 %v991_v11, %v990_v6  ;;  %v1043_v15 = vpop.f32.mrf.mxu1 }
  0xf9   : > { %v993_v16 = vpop.f32.mrf.mxu0  ;;  %v1044_v19 = vadd.f32 %v1043_v15, %v1042_v10 }
  0xfa   : > { %808 = vst.msk [vmem:[%s1325_s10] sm:$0xf] %vm807_vm0, %v956_v12  ;;  %v748_v17 = vmax.f32 %v704_v13, 0.0  ;;  %v628_v18 = vadd.f32 %v992_v14, %v1317_v58  ;;  %v1045_v20 = vpop.f32.mrf.mxu1 }
  0xfb   : > { %v994_v21 = vpop.f32.mrf.mxu0 }
  0xfc   : > { %v957_v22 = vpack.c.bf16 %v748_v17, %v748_v17  ;;  %v709_v23 = vadd.f32 %v1044_v19, %v628_v18  ;;  %v995_v24 = vadd.f32 %v994_v21, %v993_v16  ;;  %v1046_v25 = vpop.f32.mrf.mxu1 }
  0xfd   : > { %v996_v26 = vpop.f32.mrf.mxu0  ;;  %v1047_v29 = vadd.f32 %v1046_v25, %v1045_v20 }
  0xfe   : > { %809 = vst.msk [vmem:[%s1325_s10 + $0x4] sm:$0xf] %vm807_vm0, %v957_v22  ;;  %v749_v27 = vmax.f32 %v709_v23, 0.0  ;;  %v631_v28 = vadd.f32 %v995_v24, %v1317_v58  ;;  %v1048_v30 = vpop.f32.mrf.mxu1 }
  0xff   : > { %v997_v31 = vpop.f32.mrf.mxu0 }
 0x100   : > { %v958_v32 = vpack.c.bf16 %v749_v27, %v749_v27  ;;  %v712_v33 = vadd.f32 %v1047_v29, %v631_v28  ;;  %v998_v34 = vadd.f32 %v997_v31, %v996_v26  ;;  %v1049_v35 = vpop.f32.mrf.mxu1 }
 0x101   : > { %v999_v36 = vpop.f32.mrf.mxu0  ;;  %v1050_v39 = vadd.f32 %v1049_v35, %v1048_v30 }
 0x102   : > { %810 = vst.msk [vmem:[%s1325_s10 + $0x8] sm:$0xf] %vm807_vm0, %v958_v32  ;;  %v750_v37 = vmax.f32 %v712_v33, 0.0  ;;  %v636_v38 = vadd.f32 %v998_v34, %v1317_v58  ;;  %v1051_v40 = vpop.f32.mrf.mxu1 }
 0x103   : > { %v1000_v41 = vpop.f32.mrf.mxu0 }
 0x104   : > { %v959_v42 = vpack.c.bf16 %v750_v37, %v750_v37  ;;  %v717_v43 = vadd.f32 %v1050_v39, %v636_v38  ;;  %v1001_v44 = vadd.f32 %v1000_v41, %v999_v36  ;;  %v1052_v45 = vpop.f32.mrf.mxu1 }
 0x105   : > { %v1002_v46 = vpop.f32.mrf.mxu0  ;;  %v1053_v49 = vadd.f32 %v1052_v45, %v1051_v40 }
 0x106   : > { %811 = vst.msk [vmem:[%s1325_s10 + $0xc] sm:$0xf] %vm807_vm0, %v959_v42  ;;  %v751_v47 = vmax.f32 %v717_v43, 0.0  ;;  %v639_v48 = vadd.f32 %v1001_v44, %v1317_v58  ;;  %v1054_v50 = vpop.f32.mrf.mxu1 }
 0x107   : > { %v1003_v51 = vpop.f32.mrf.mxu0 }
 0x108   : > { %v960_v52 = vpack.c.bf16 %v751_v47, %v751_v47  ;;  %v720_v53 = vadd.f32 %v1053_v49, %v639_v48  ;;  %v1004_v54 = vadd.f32 %v1003_v51, %v1002_v46  ;;  %v1055_v55 = vpop.f32.mrf.mxu1 }
 0x109   : > { %v1005_v56 = vpop.f32.mrf.mxu0  ;;  %v1056_v60 = vadd.f32 %v1055_v55, %v1054_v50 }
 0x10a   : > { %812 = vst.msk [vmem:[%s1325_s10 + $0x10] sm:$0xf] %vm807_vm0, %v960_v52  ;;  %v752_v57 = vmax.f32 %v720_v53, 0.0  ;;  %v644_v59 = vadd.f32 %v1004_v54, %v1317_v58  ;;  %v1057_v61 = vpop.f32.mrf.mxu1 }
 0x10b   : > { %v1006_v62 = vpop.f32.mrf.mxu0 }
 0x10c   : > { %v961_v63 = vpack.c.bf16 %v752_v57, %v752_v57  ;;  %v725_v0 = vadd.f32 %v1056_v60, %v644_v59  ;;  %v1007_v1 = vadd.f32 %v1006_v62, %v1005_v56  ;;  %v1058_v2 = vpop.f32.mrf.mxu1 }
 0x10d   : > { %v1008_v3 = vpop.f32.mrf.mxu0  ;;  %v1059_v6 = vadd.f32 %v1058_v2, %v1057_v61 }
 0x10e   : > { %813 = vst.msk [vmem:[%s1325_s10 + $0x14] sm:$0xf] %vm807_vm0, %v961_v63  ;;  %v753_v4 = vmax.f32 %v725_v0, 0.0  ;;  %v647_v5 = vadd.f32 %v1007_v1, %v1317_v58  ;;  %v1060_v7 = vpop.f32.mrf.mxu1 }
 0x10f   : > { %v1009_v8 = vpop.f32.mrf.mxu0 }
 0x110   : > { %v962_v9 = vpack.c.bf16 %v753_v4, %v753_v4  ;;  %v728_v10 = vadd.f32 %v1059_v6, %v647_v5  ;;  %v1010_v11 = vadd.f32 %v1009_v8, %v1008_v3  ;;  %v1061_v12 = vpop.f32.mrf.mxu1 }
 0x111   : > { %v1011_v13 = vpop.f32.mrf.mxu0  ;;  %v1062_v16 = vadd.f32 %v1061_v12, %v1060_v7 }
 0x112   : > { %814 = vst.msk [vmem:[%s1325_s10 + $0x18] sm:$0xf] %vm807_vm0, %v962_v9  ;;  %v754_v14 = vmax.f32 %v728_v10, 0.0  ;;  %v652_v15 = vadd.f32 %v1010_v11, %v1317_v58  ;;  %v1063_v17 = vpop.f32.mrf.mxu1 }
 0x113   : > { %v1012_v18 = vpop.f32.mrf.mxu0 }
 0x114   : > { %v963_v19 = vpack.c.bf16 %v754_v14, %v754_v14  ;;  %v733_v20 = vadd.f32 %v1062_v16, %v652_v15  ;;  %v1013_v21 = vadd.f32 %v1012_v18, %v1011_v13  ;;  %v1064_v22 = vpop.f32.mrf.mxu1 }
 0x115   : > { %v1014_v23 = vpop.f32.mrf.mxu0  ;;  %v1065_v26 = vadd.f32 %v1064_v22, %v1063_v17 }
 0x116   : > { %815 = vst.msk [vmem:[%s1325_s10 + $0x1c] sm:$0xf] %vm807_vm0, %v963_v19  ;;  %v755_v24 = vmax.f32 %v733_v20, 0.0  ;;  %v655_v25 = vadd.f32 %v1013_v21, %v1317_v58  ;;  %v1066_v27 = vpop.f32.mrf.mxu1 }
 0x117   : > { %v1015_v28 = vpop.f32.mrf.mxu0 }
 0x118   : > { %v964_v29 = vpack.c.bf16 %v755_v24, %v755_v24  ;;  %v736_v30 = vadd.f32 %v1065_v26, %v655_v25  ;;  %v1016_v31 = vadd.f32 %v1015_v28, %v1014_v23  ;;  %v1067_v32 = vpop.f32.mrf.mxu1 }
 0x119   : > { %v1017_v33 = vpop.f32.mrf.mxu0  ;;  %v1068_v36 = vadd.f32 %v1067_v32, %v1066_v27 }
 0x11a   : > { %816 = vst.msk [vmem:[%s1325_s10 + $0x20] sm:$0xf] %vm807_vm0, %v964_v29  ;;  %v756_v34 = vmax.f32 %v736_v30, 0.0  ;;  %v660_v35 = vadd.f32 %v1016_v31, %v1317_v58  ;;  %v1069_v37 = vpop.f32.mrf.mxu1 }
 0x11b   : > { %v1018_v38 = vpop.f32.mrf.mxu0 }
 0x11c   : > { %v965_v39 = vpack.c.bf16 %v756_v34, %v756_v34  ;;  %v741_v40 = vadd.f32 %v1068_v36, %v660_v35  ;;  %v1019_v41 = vadd.f32 %v1018_v38, %v1017_v33  ;;  %v1070_v42 = vpop.f32.mrf.mxu1 }
 0x11d   : > { %v1071_v45 = vadd.f32 %v1070_v42, %v1069_v37 }
 0x11e   : > { %817 = vst.msk [vmem:[%s1325_s10 + $0x24] sm:$0xf] %vm807_vm0, %v965_v39  ;;  %v757_v43 = vmax.f32 %v741_v40, 0.0  ;;  %v663_v44 = vadd.f32 %v1019_v41, %v1317_v58 }
 0x120   : > { %v966_v46 = vpack.c.bf16 %v757_v43, %v757_v43  ;;  %v744_v47 = vadd.f32 %v1071_v45, %v663_v44 }
 0x122   : > { %818 = vst.msk [vmem:[%s1325_s10 + $0x28] sm:$0xf] %vm807_vm0, %v966_v46  ;;  %v758_v48 = vmax.f32 %v744_v47, 0.0 }
 0x124   : > { %v967_v49 = vpack.c.bf16 %v758_v48, %v758_v48 }
 0x126   : > { %819 = vst.msk [vmem:[%s1325_s10 + $0x2c] sm:$0xf] %vm807_vm0, %v967_v49 }
 0x127 PF: > { %s13_s12 = sadd.s32 1, %s1154_s12  }
 0x128   : > { %p10_p4 = scmp.ge.s32.totalorder %s13_s12, 4  }
 0x12a   :  { %12 = sbr.rel (!%p10_p4) target bundleno = 1 (0x1), region = 62 }

// kernel: dqn_forward.6
= control target key start
LH: loop header
LB: loop body
LE: loop exit
PB: predicated region body
PF: predicated region fallthrough
CT: control target
= control target key end

     0   :  { %s1211_s12 = smov 0   ;;  %s1385_s0 = inlined_call_operand.vmem [shape: bf16[128,576], index: 0, kind: input, shape index: {}]   ;;  %s1386_s1 = inlined_call_operand.vmem [shape: bf16[576,64], index: 1, kind: input, shape index: {}]   ;;  %s1387_s2 = inlined_call_operand.vmem [shape: f32[1,64], index: 2, kind: input, shape index: {}]   ;;  %s1388_s3 = inlined_call_operand.vmem [shape: bf16[128,64], index: 3, kind: output, shape index: {}]  }
   0x1 LB: > { %s910_s13 = sadd.s32 4294967295, %s1189_s12   ;;  %p914_p0 = scmp.ge.s32.totalorder %s1189_s12, 1  ;;  %s1189_s12 = sphi %s1211_s12, %s13_s12  }
   0x2   : > { %p139_p1 = scmp.lt.s32.totalorder %s1189_s12, 3 }
   0x4   : > { %p140_p2 = pnand %p914_p0, %p139_p1 }
   0x5   : > { %s915_s19 = sshll.u32 (!%p140_p2), %s910_s13, 3 }
   0x6   : > { %143 = sbr.rel (%p140_p2) target bundleno = 284 (0x11c), region = 32  ;;  %p165_p3 = scmp.lt.s32.totalorder (!%p140_p2), %s915_s19, 15 }
   0xb   : > { %v1119_v0 = vld [vmem:[%s1386_s1 + $0x78] sm:$0xff]   ;;  %v1123_v4 = vld [vmem:[%s1386_s1 + $0x70] sm:$0xff]   ;;  %v1127_v8 = vld [vmem:[%s1386_s1 + $0x68] sm:$0xff]   ;;  %s1390_s19 = smov (!%p165_p3, %s915_s19), 15  ;;  %vm597_vm0 = vcmask 523264   ;;  %vm845_vm1 = vcmask 519168  }
   0xc   : > { %v1120_v1 = vld [vmem:[%s1386_s1 + $0xf8] sm:$0xff]   ;;  %998 = vmatprep.subr.bf16.mxu0 %v1119_v0  ;;  %v1124_v5 = vld [vmem:[%s1386_s1 + $0xf0] sm:$0xff]   ;;  %v1128_v9 = vld [vmem:[%s1386_s1 + $0xe8] sm:$0xff]   ;;  %s1110_s16 = smul.u32 20, %s1390_s19  ;;  %s918_s17 = sshll.u32 %s1390_s19, 2 }
   0xd   : > { %v1121_v2 = vld [vmem:[%s1386_s1 + $0x38] sm:$0xff]   ;;  %1038 = vmatprep.subr.bf16.mxu1 %v1120_v1  ;;  %v1125_v6 = vld [vmem:[%s1386_s1 + $0x30] sm:$0xff]   ;;  %v1129_v10 = vld [vmem:[%s1386_s1 + $0x28] sm:$0xff]   ;;  %s1364_s21 = scalar_lea.vmem %s1388_s3, %s918_s17 }
   0xe   : > { %v1122_v3 = vld [vmem:[%s1386_s1 + $0xb8] sm:$0xff]   ;;  %999 = vmatpush3.bf16.msra.mxu0 %v1121_v2  ;;  %v1126_v7 = vld [vmem:[%s1386_s1 + $0xb0] sm:$0xff]   ;;  %v1130_v11 = vld [vmem:[%s1386_s1 + $0xa8] sm:$0xff]   ;;  %s1317_s13 = scalar_lea.vmem %s1385_s0, %s1110_s16 }
   0xf   : > { %1039 = vmatpush3.bf16.msra.mxu1 %v1122_v3  ;;  %1000 = vmatprep.subr.bf16.mxu0 %v1123_v4  ;;  %v1131_v12 = vld [vmem:[%s1386_s1 + $0x60] sm:$0xff]   ;;  %v1135_v16 = vld [vmem:[%s1386_s1 + $0x58] sm:$0xff]   ;;  %v1139_v20 = vld [vmem:[%s1386_s1 + $0x50] sm:$0xff]  }
  0x10   : > { %1040 = vmatprep.subr.bf16.mxu1 %v1124_v5  ;;  %v1132_v13 = vld [vmem:[%s1386_s1 + $0xe0] sm:$0xff]   ;;  %v1136_v17 = vld [vmem:[%s1386_s1 + $0xd8] sm:$0xff]   ;;  %v1140_v21 = vld [vmem:[%s1386_s1 + $0xd0] sm:$0xff]  }
  0x11   : > { %v1133_v14 = vld [vmem:[%s1386_s1 + $0x20] sm:$0xff]   ;;  %v1137_v18 = vld [vmem:[%s1386_s1 + $0x18] sm:$0xff]   ;;  %v1141_v22 = vld [vmem:[%s1386_s1 + $0x10] sm:$0xff]  }
  0x12   : > { %1001 = vmatpush3.bf16.msra.mxu0 %v1125_v6  ;;  %v1134_v15 = vld [vmem:[%s1386_s1 + $0xa0] sm:$0xff]   ;;  %v1138_v19 = vld [vmem:[%s1386_s1 + $0x98] sm:$0xff]   ;;  %v1142_v23 = vld [vmem:[%s1386_s1 + $0x90] sm:$0xff]  }
  0x13   : > { %1041 = vmatpush3.bf16.msra.mxu1 %v1126_v7  ;;  %1002 = vmatprep.subr.bf16.mxu0 %v1127_v8  ;;  %v1143_v24 = vld [vmem:[%s1386_s1 + $0x48] sm:$0xff]   ;;  %v1147_v28 = vld [vmem:[%s1386_s1 + $0x40] sm:$0xff]   ;;  %v1157_v36 = vld [vmem:[%s1386_s1 + $0x118] sm:$0xff]  }
  0x14   : > { %1042 = vmatprep.subr.bf16.mxu1 %v1128_v9  ;;  %v1144_v25 = vld [vmem:[%s1386_s1 + $0xc8] sm:$0xff]   ;;  %v1148_v29 = vld [vmem:[%s1386_s1 + $0xc0] sm:$0xff]   ;;  %v1164_v39 = vld [vmem:[%s1386_s1 + $0x110] sm:$0xff]  }
  0x15   : > { %v1145_v26 = vld [vmem:[%s1386_s1 + $0x8] sm:$0xff]   ;;  %v1149_v30 = vld [vmem:[%s1386_s1] sm:$0xff]   ;;  %v1167_v43 = vld [vmem:[%s1317_s13 + $0x5c] ss:$20 sps:$4 sm:$0xff]  }
  0x16   : > { %1003 = vmatpush3.bf16.msra.mxu0 %v1129_v10  ;;  %v1146_v27 = vld [vmem:[%s1386_s1 + $0x88] sm:$0xff]   ;;  %v1150_v31 = vld [vmem:[%s1386_s1 + $0x80] sm:$0xff]   ;;  %v1172_v48 = vld [vmem:[%s1317_s13 + $0x7c] ss:$20 sps:$4 sm:$0xff]  }
  0x17   : > { %1043 = vmatpush3.bf16.msra.mxu1 %v1130_v11  ;;  %1004 = vmatprep.subr.bf16.mxu0 %v1131_v12  ;;  %v1151_v32 = vld [vmem:[%s1317_s13] ss:$20 sps:$4 sm:$0xff]   ;;  %v1153_v33 = vld [vmem:[%s1317_s13 + $0x4] ss:$20 sps:$4 sm:$0xff]   ;;  %v1154_v34 = vld [vmem:[%s1317_s13 + $0x8] ss:$20 sps:$4 sm:$0xff]  }
  0x18   : > { %1044 = vmatprep.subr.bf16.mxu1 %v1132_v13  ;;  %v1156_v35 = vld [vmem:[%s1317_s13 + $0xc] ss:$20 sps:$4 sm:$0xff]   ;;  %642 = vmatprep.mubr.bf16.mxu0 %v1153_v33  ;;  %v1160_v38 = vld [vmem:[%s1317_s13 + $0x34] ss:$20 sps:$4 sm:$0xff]   ;;  %v1163_v41 = vld [vmem:[%s1317_s13 + $0x30] ss:$20 sps:$4 sm:$0xff]  }
  0x19   : > { %707 = vmatprep.mubr.bf16.mxu1 %v1156_v35  ;;  %v1158_v37 = vld [vmem:[%s1317_s13 + $0x2c] ss:$20 sps:$4 sm:$0xff]   ;;  %v1162_v40 = vld [vmem:[%s1317_s13 + $0x28] ss:$20 sps:$4 sm:$0xff]   ;;  %v1169_v46 = vld [vmem:[%s1317_s13 + $0x50] ss:$20 sps:$4 sm:$0xff]  }
  0x1a   : > { %1005 = vmatpush3.bf16.msra.mxu0 %v1133_v14  ;;  %v1165_v42 = vld [vmem:[%s1317_s13 + $0x54] ss:$20 sps:$4 sm:$0xff]   ;;  %v1178_v45 = vld [vmem:[%s1386_s1 + $0x100] sm:$0xff]   ;;  %v1170_v47 = vld [vmem:[%s1317_s13 + $0x58] ss:$20 sps:$4 sm:$0xff]  }
  0x1b   : > { %1045 = vmatpush3.bf16.msra.mxu1 %v1134_v15  ;;  %1006 = vmatprep.subr.bf16.mxu0 %v1135_v16  ;;  %v1171_v44 = vld [vmem:[%s1386_s1 + $0x108] sm:$0xff]   ;;  %v1174_v49 = vld [vmem:[%s1317_s13 + $0x84] ss:$20 sps:$4 sm:$0xff]   ;;  %v1177_v51 = vld [vmem:[%s1317_s13 + $0x80] ss:$20 sps:$4 sm:$0xff]  }
  0x1c   : > { %1046 = vmatprep.subr.bf16.mxu1 %v1136_v17  ;;  %v1176_v50 = vld [vmem:[%s1317_s13 + $0x78] ss:$20 sps:$4 sm:$0xff]   ;;  %v1179_v52 = vld [vmem:[%s1317_s13 + $0x10] ss:$20 sps:$4 sm:$0xff]   ;;  %v1180_v53 = vld [vmem:[%s1317_s13 + $0x60] ss:$20 sps:$4 sm:$0xff]  }
  0x1d   : > { %v1181_v54 = vld [vmem:[%s1317_s13 + $0x38] ss:$20 sps:$4 sm:$0xff]   ;;  %v1182_v55 = vld [vmem:[%s1317_s13 + $0x88] ss:$20 sps:$4 sm:$0xff]  }
  0x1e   : > { %1007 = vmatpush3.bf16.msra.mxu0 %v1137_v18 }
  0x1f   : > { %1047 = vmatpush3.bf16.msra.mxu1 %v1138_v19  ;;  %1008 = vmatprep.subr.bf16.mxu0 %v1139_v20  ;;  %v919_v19 = vld [vmem:[%s1387_s2] ss:$0 sm:$0xff] }
  0x20   : > { %1048 = vmatprep.subr.bf16.mxu1 %v1140_v21 }
  0x22   : > { %1009 = vmatpush3.bf16.msra.mxu0 %v1141_v22 }
  0x23   : > { %1049 = vmatpush3.bf16.msra.mxu1 %v1142_v23  ;;  %1010 = vmatprep.subr.bf16.mxu0 %v1143_v24 }
  0x24   : > { %1050 = vmatprep.subr.bf16.mxu1 %v1144_v25 }
  0x26   : > { %1011 = vmatpush3.bf16.msra.mxu0 %v1145_v26 }
  0x27   : > { %1051 = vmatpush3.bf16.msra.mxu1 %v1146_v27  ;;  %1012 = vmatprep.subr.bf16.mxu0 %v1147_v28 }
  0x28   : > { %1052 = vmatprep.subr.bf16.mxu1 %v1148_v29 }
  0x2a   : > { %1013 = vmatpush3.bf16.msra.mxu0 %v1149_v30 }
  0x2b   : > { %1053 = vmatpush3.bf16.msra.mxu1 %v1150_v31  ;;  %1086 = vmatprep.subr.bf16.mxu0 %v1157_v36 }
  0x2c   : > { %1102 = vmatprep.subr.bf16.mxu1 %v1157_v36 }
  0x2d   : > { %643 = vmatmul.mubr.bf16.vlgmr.msra.gmra.mxu0 %v1151_v32 }
  0x2e   : > { %708 = vmatmul.mubr.bf16.vlgmr.msra.gmra.mxu1 %v1154_v34  ;;  %1087 = vmatpush3.bf16.msra.mxu0 %v1157_v36 }
  0x2f   : > { %1106 = vmatpush3.bf16.msra.mxu1 %v1157_v36  ;;  %650 = vmatprep.mubr.bf16.mxu0 %v1158_v37 }
  0x30   : > { %715 = vmatprep.mubr.bf16.mxu1 %v1160_v38  ;;  %1088 = vmatprep.subr.bf16.mxu0 %v1164_v39 }
  0x31   : > { %1103 = vmatprep.subr.bf16.mxu1 %v1164_v39 }
  0x32   : > { %1089 = vmatpush3.bf16.msra.mxu0 %v1164_v39 }
  0x33   : > { %1107 = vmatpush3.bf16.msra.mxu1 %v1164_v39  ;;  %1090 = vmatprep.subr.bf16.mxu0 %v1171_v44 }
  0x34   : > { %1104 = vmatprep.subr.bf16.mxu1 %v1171_v44 }
  0x35   : > { %651 = vmatmul.mubr.bf16.gmra.mxu0 %v1162_v40 }
  0x36   : > { %716 = vmatmul.mubr.bf16.gmra.mxu1 %v1163_v41  ;;  %658 = vmatprep.mubr.bf16.mxu0 %v1165_v42 }
  0x37   : > { %723 = vmatprep.mubr.bf16.mxu1 %v1167_v43  ;;  %1091 = vmatpush3.bf16.msra.mxu0 %v1171_v44 }
  0x38   : > { %1108 = vmatpush3.bf16.msra.mxu1 %v1171_v44  ;;  %1092 = vmatprep.subr.bf16.mxu0 %v1178_v45 }
  0x39   : > { %1105 = vmatprep.subr.bf16.mxu1 %v1178_v45 }
  0x3b   : > { %1093 = vmatpush3.bf16.msra.mxu0 %v1178_v45 }
  0x3c   : > { %1109 = vmatpush3.bf16.msra.mxu1 %v1178_v45 }
  0x3d   : > { %659 = vmatmul.mubr.bf16.gmra.mxu0 %v1169_v46 }
  0x3e   : > { %724 = vmatmul.mubr.bf16.gmra.mxu1 %v1170_v47  ;;  %666 = vmatprep.mubr.bf16.mxu0 %v1172_v48 }
  0x3f   : > { %731 = vmatprep.mubr.bf16.mxu1 %v1174_v49 }
  0x45   : > { %667 = vmatmul.mubr.bf16.gmra.mxu0 %v1176_v50 }
  0x46   : > { %732 = vmatmul.mubr.bf16.gmra.mxu1 %v1177_v51  ;;  %1094 = vmatprep.mubr.msk.bf16.mxu0 %vm597_vm0, %v1179_v52 }
  0x47   : > { %1098 = vmatprep.mubr.msk.bf16.mxu1 %vm597_vm0, %v1180_v53 }
  0x4d   : > { %1095 = vmatmul.mubr.msk.bf16.vlgmr.msra.gmra.mxu0 %vm597_vm0, %v1181_v54 }
  0x4e   : > { %1099 = vmatmul.mubr.msk.bf16.vlgmr.msra.gmra.mxu1 %vm597_vm0, %v1182_v55 }
  0xed   : > { %v1014_v56 = vpop.f32.mrf.mxu0 }
  0xee   : > { %v1054_v57 = vpop.f32.mrf.mxu1 }
  0xef   : > { %v1015_v58 = vpop.f32.mrf.mxu0 }
  0xf0   : > { %v1055_v59 = vpop.f32.mrf.mxu1  ;;  %v1016_v17 = vadd.f32 %v1015_v58, %v1014_v56 }
  0xf1   : > { %v1017_v60 = vpop.f32.mrf.mxu0  ;;  %v1056_v34 = vadd.f32 %v1055_v59, %v1054_v57 }
  0xf2   : > { %v1057_v61 = vpop.f32.mrf.mxu1  ;;  %v645_v27 = vadd.f32 %v1016_v17, %v919_v19 }
  0xf3   : > { %v1018_v62 = vpop.f32.mrf.mxu0 }
  0xf4   : > { %v1058_v63 = vpop.f32.mrf.mxu1  ;;  %v1019_v28 = vadd.f32 %v1018_v62, %v1017_v60  ;;  %v710_v46 = vadd.f32 %v1056_v34, %v645_v27 }
  0xf5   : > { %v1020_v0 = vpop.f32.mrf.mxu0  ;;  %v1059_v52 = vadd.f32 %v1058_v63, %v1057_v61 }
  0xf6   : > { %v1060_v1 = vpop.f32.mrf.mxu1  ;;  %v648_v43 = vadd.f32 %v1019_v28, %v919_v19 }
  0xf7   : > { %v1021_v2 = vpop.f32.mrf.mxu0 }
  0xf8   : > { %v1061_v3 = vpop.f32.mrf.mxu1  ;;  %v1022_v15 = vadd.f32 %v1021_v2, %v1020_v0 }
  0xf9   : > { %v1023_v4 = vpop.f32.mrf.mxu0  ;;  %v1062_v30 = vadd.f32 %v1061_v3, %v1060_v1 }
  0xfa   : > { %v1063_v5 = vpop.f32.mrf.mxu1  ;;  %v653_v23 = vadd.f32 %v1022_v15, %v919_v19 }
  0xfb   : > { %v1024_v6 = vpop.f32.mrf.mxu0 }
  0xfc   : > { %v1064_v7 = vpop.f32.mrf.mxu1  ;;  %v1025_v24 = vadd.f32 %v1024_v6, %v1023_v4  ;;  %v718_v41 = vadd.f32 %v1062_v30, %v653_v23  ;;  %v713_v6 = vadd.f32 %v1059_v52, %v648_v43 }
  0xfd   : > { %v1026_v8 = vpop.f32.mrf.mxu0  ;;  %v1065_v47 = vadd.f32 %v1064_v7, %v1063_v5 }
  0xfe   : > { %v1066_v9 = vpop.f32.mrf.mxu1  ;;  %v656_v38 = vadd.f32 %v1025_v24, %v919_v19 }
  0xff   : > { %v1027_v10 = vpop.f32.mrf.mxu0 }
 0x100   : > { %v1067_v11 = vpop.f32.mrf.mxu1  ;;  %v1028_v21 = vadd.f32 %v1027_v10, %v1026_v8  ;;  %v721_v60 = vadd.f32 %v1065_v47, %v656_v38 }
 0x101   : > { %v1029_v12 = vpop.f32.mrf.mxu0  ;;  %v1068_v44 = vadd.f32 %v1067_v11, %v1066_v9 }
 0x102   : > { %v1069_v13 = vpop.f32.mrf.mxu1  ;;  %v661_v35 = vadd.f32 %v1028_v21, %v919_v19 }
 0x103   : > { %v1030_v14 = vpop.f32.mrf.mxu0 }
 0x104   : > { %v1070_v16 = vpop.f32.mrf.mxu1  ;;  %v1031_v36 = vadd.f32 %v1030_v14, %v1029_v12  ;;  %v726_v56 = vadd.f32 %v1068_v44, %v661_v35 }
 0x105   : > { %v1032_v18 = vpop.f32.mrf.mxu0  ;;  %v1071_v0 = vadd.f32 %v1070_v16, %v1069_v13 }
 0x106   : > { %v1072_v20 = vpop.f32.mrf.mxu1  ;;  %v664_v53 = vadd.f32 %v1031_v36, %v919_v19 }
 0x107   : > { %v1033_v22 = vpop.f32.mrf.mxu0 }
 0x108   : > { %v1034_v25 = vadd.f32 %v1033_v22, %v1032_v18  ;;  %v1073_v26 = vpop.f32.mrf.mxu1  ;;  %v729_v11 = vadd.f32 %v1071_v0, %v664_v53 }
 0x109   : > { %v1035_v29 = vpop.f32.mrf.mxu0  ;;  %v1074_v32 = vadd.f32 %v1073_v26, %v1072_v20 }
 0x10a   : > { %v669_v31 = vadd.f32 %v1034_v25, %v919_v19  ;;  %v1075_v33 = vpop.f32.mrf.mxu1 }
 0x10b   : > { %v1036_v37 = vpop.f32.mrf.mxu0 }
 0x10c   : > { %v1037_v39 = vadd.f32 %v1036_v37, %v1035_v29  ;;  %v1076_v40 = vpop.f32.mrf.mxu1  ;;  %v734_v42 = vadd.f32 %v1074_v32, %v669_v31 }
 0x10d   : > { %v1096_v45 = vpop.f32.mrf.mxu0  ;;  %v1077_v49 = vadd.f32 %v1076_v40, %v1075_v33 }
 0x10e   : > { %v672_v48 = vadd.f32 %v1037_v39, %v919_v19  ;;  %v783_v50 = vadd.f32 %v1096_v45, %v718_v41  ;;  %v1100_v51 = vpop.f32.mrf.mxu1 }
 0x10f   : > { %v799_v54 = vadd.f32 %v1100_v51, %v734_v42  ;;  %v774_v55 = vpop.f32.mrf.mxu0 }
 0x110   : > { %v807_v57 = vmax.f32 %v783_v50, 0.0  ;;  %v775_v58 = vadd.f32 %v774_v55, %v710_v46  ;;  %v790_v59 = vpop.f32.mrf.mxu1  ;;  %v737_v62 = vadd.f32 %v1077_v49, %v672_v48 }
 0x111   : > { %v811_v1 = vmax.f32 %v799_v54, 0.0  ;;  %v791_v2 = vadd.f32 %v790_v59, %v726_v56  ;;  %v1097_v61 = vpop.f32.mrf.mxu0 }
 0x112   : > { %v992_v63 = vpack.c.bf16 %v807_v57, %v807_v57  ;;  %v805_v3 = vmax.f32 %v775_v58, 0.0  ;;  %v786_v4 = vadd.f32 %v1097_v61, %v721_v60  ;;  %v1101_v5 = vpop.f32.mrf.mxu1 }
 0x113   : > { %v996_v7 = vpack.c.bf16 %v811_v1, %v811_v1  ;;  %v809_v8 = vmax.f32 %v791_v2, 0.0  ;;  %v802_v9 = vadd.f32 %v1101_v5, %v737_v62  ;;  %v777_v10 = vpop.f32.mrf.mxu0 }
 0x114   : > { %848 = vst.msk [vmem:[%s1364_s21 + $0x8] sm:$0xf] %vm845_vm1, %v992_v63  ;;  %v990_v12 = vpack.c.bf16 %v805_v3, %v805_v3  ;;  %v808_v13 = vmax.f32 %v786_v4, 0.0  ;;  %v778_v14 = vadd.f32 %v777_v10, %v713_v6  ;;  %v793_v15 = vpop.f32.mrf.mxu1 }
 0x115   : > { %852 = vst.msk [vmem:[%s1364_s21 + $0x18] sm:$0xf] %vm845_vm1, %v996_v7  ;;  %v994_v16 = vpack.c.bf16 %v809_v8, %v809_v8  ;;  %v812_v17 = vmax.f32 %v802_v9, 0.0  ;;  %v794_v18 = vadd.f32 %v793_v15, %v729_v11 }
 0x116   : > { %846 = vst.msk [vmem:[%s1364_s21] sm:$0xf] %vm845_vm1, %v990_v12  ;;  %v993_v19 = vpack.c.bf16 %v808_v13, %v808_v13  ;;  %v806_v20 = vmax.f32 %v778_v14, 0.0 }
 0x117   : > { %850 = vst.msk [vmem:[%s1364_s21 + $0x10] sm:$0xf] %vm845_vm1, %v994_v16  ;;  %v997_v21 = vpack.c.bf16 %v812_v17, %v812_v17  ;;  %v810_v22 = vmax.f32 %v794_v18, 0.0 }
 0x118   : > { %849 = vst.msk [vmem:[%s1364_s21 + $0xc] sm:$0xf] %vm845_vm1, %v993_v19  ;;  %v991_v23 = vpack.c.bf16 %v806_v20, %v806_v20 }
 0x119   : > { %853 = vst.msk [vmem:[%s1364_s21 + $0x1c] sm:$0xf] %vm845_vm1, %v997_v21  ;;  %v995_v24 = vpack.c.bf16 %v810_v22, %v810_v22 }
 0x11a   : > { %847 = vst.msk [vmem:[%s1364_s21 + $0x4] sm:$0xf] %vm845_vm1, %v991_v23 }
 0x11b   : > { %851 = vst.msk [vmem:[%s1364_s21 + $0x14] sm:$0xf] %vm845_vm1, %v995_v24 }
 0x11c PF: > { %s13_s12 = sadd.s32 1, %s1189_s12  }
 0x11d   : > { %p10_p4 = scmp.ge.s32.totalorder %s13_s12, 4  }
 0x11f   :  { %12 = sbr.rel (!%p10_p4) target bundleno = 1 (0x1), region = 62 }

// kernel: dqn_forward.7
= control target key start
LH: loop header
LB: loop body
LE: loop exit
PB: predicated region body
PF: predicated region fallthrough
CT: control target
= control target key end

     0   :  { %vm4898_vm0 = vcmask 523264   ;;  %vm6377_vm1 = vcmask 146432   ;;  %s11335_s1 = inlined_call_operand.vmem [shape: bf16[3136,512], index: 1, kind: input, shape index: {}]   ;;  %s11336_s0 = inlined_call_operand.vmem [shape: bf16[16,3136], index: 0, kind: input, shape index: {}]   ;;  %s11337_s3 = inlined_call_operand.vmem [shape: bf16[512,18], index: 3, kind: input, shape index: {}]   ;;  %s11338_s2 = inlined_call_operand.vmem [shape: f32[1,512], index: 2, kind: input, shape index: {}]   ;;  %s11339_s4 = inlined_call_operand.vmem [shape: f32[1,18], index: 4, kind: input, shape index: {}]   ;;  %s11340_s5 = inlined_call_operand.vmem [shape: f32[16,18], index: 5, kind: output, shape index: {}]  }
   0x1   :  { %v7273_v0 = vld [vmem:[%s11335_s1 + $0xe4] ss:$16 sps:$4 sm:$0xff]   ;;  %v7277_v2 = vld [vmem:[%s11335_s1 + $0xe0] ss:$16 sps:$4 sm:$0xff]  }
   0x2   :  { %v7275_v1 = vld [vmem:[%s11335_s1 + $0x2e4] ss:$16 sps:$4 sm:$0xff]   ;;  %4902 = vmatprep.subr.bf16.mxu0 %v7273_v0  ;;  %v7278_v3 = vld [vmem:[%s11335_s1 + $0x2e0] ss:$16 sps:$4 sm:$0xff]  }
   0x3   :  { %4945 = vmatprep.subr.bf16.mxu1 %v7275_v1  ;;  %v7279_v4 = vld [vmem:[%s11335_s1 + $0xc4] ss:$16 sps:$4 sm:$0xff]   ;;  %4903 = vmatpush1.bf16.msra.mxu0 %v7277_v2  ;;  %v7283_v6 = vld [vmem:[%s11335_s1 + $0xc0] ss:$16 sps:$4 sm:$0xff]  }
   0x4   :  { %4946 = vmatpush1.bf16.msra.mxu1 %v7278_v3  ;;  %v7281_v5 = vld [vmem:[%s11335_s1 + $0x2c4] ss:$16 sps:$4 sm:$0xff]   ;;  %4904 = vmatprep.subr.bf16.mxu0 %v7279_v4  ;;  %v7284_v7 = vld [vmem:[%s11335_s1 + $0x2c0] ss:$16 sps:$4 sm:$0xff]  }
   0x5   :  { %4947 = vmatprep.subr.bf16.mxu1 %v7281_v5  ;;  %v7285_v8 = vld [vmem:[%s11335_s1 + $0xa4] ss:$16 sps:$4 sm:$0xff]   ;;  %v7289_v10 = vld [vmem:[%s11335_s1 + $0xa0] ss:$16 sps:$4 sm:$0xff]   ;;  %v7372_v5 = vld [vmem:[%s11336_s0 + $0x8] ss:$100 sps:$4 sm:$0xff]  }
   0x6   :  { %v7287_v9 = vld [vmem:[%s11335_s1 + $0x2a4] ss:$16 sps:$4 sm:$0xff]   ;;  %v7290_v11 = vld [vmem:[%s11335_s1 + $0x2a0] ss:$16 sps:$4 sm:$0xff]  }
   0x7   :  { %4905 = vmatpush1.bf16.msra.mxu0 %v7283_v6  ;;  %v7291_v12 = vld [vmem:[%s11335_s1 + $0x84] ss:$16 sps:$4 sm:$0xff]   ;;  %v7295_v14 = vld [vmem:[%s11335_s1 + $0x80] ss:$16 sps:$4 sm:$0xff]  }
   0x8   :  { %4948 = vmatpush1.bf16.msra.mxu1 %v7284_v7  ;;  %4906 = vmatprep.subr.bf16.mxu0 %v7285_v8  ;;  %v7293_v13 = vld [vmem:[%s11335_s1 + $0x284] ss:$16 sps:$4 sm:$0xff]   ;;  %v7296_v15 = vld [vmem:[%s11335_s1 + $0x280] ss:$16 sps:$4 sm:$0xff]  }
   0x9   :  { %4949 = vmatprep.subr.bf16.mxu1 %v7287_v9  ;;  %v7297_v16 = vld [vmem:[%s11335_s1 + $0x64] ss:$16 sps:$4 sm:$0xff]   ;;  %v7301_v18 = vld [vmem:[%s11335_s1 + $0x60] ss:$16 sps:$4 sm:$0xff]  }
   0xa   :  { %v7299_v17 = vld [vmem:[%s11335_s1 + $0x264] ss:$16 sps:$4 sm:$0xff]   ;;  %v7302_v19 = vld [vmem:[%s11335_s1 + $0x260] ss:$16 sps:$4 sm:$0xff]  }
   0xb   :  { %4907 = vmatpush1.bf16.msra.mxu0 %v7289_v10  ;;  %v7303_v20 = vld [vmem:[%s11335_s1 + $0x44] ss:$16 sps:$4 sm:$0xff]   ;;  %v7307_v22 = vld [vmem:[%s11335_s1 + $0x40] ss:$16 sps:$4 sm:$0xff]  }
   0xc   :  { %4950 = vmatpush1.bf16.msra.mxu1 %v7290_v11  ;;  %4908 = vmatprep.subr.bf16.mxu0 %v7291_v12  ;;  %v7305_v21 = vld [vmem:[%s11335_s1 + $0x244] ss:$16 sps:$4 sm:$0xff]   ;;  %v7308_v23 = vld [vmem:[%s11335_s1 + $0x240] ss:$16 sps:$4 sm:$0xff]  }
   0xd   :  { %4951 = vmatprep.subr.bf16.mxu1 %v7293_v13  ;;  %v7309_v24 = vld [vmem:[%s11335_s1 + $0x24] ss:$16 sps:$4 sm:$0xff]   ;;  %v7313_v26 = vld [vmem:[%s11335_s1 + $0x20] ss:$16 sps:$4 sm:$0xff]  }
   0xe   :  { %v7311_v25 = vld [vmem:[%s11335_s1 + $0x224] ss:$16 sps:$4 sm:$0xff]   ;;  %v7314_v27 = vld [vmem:[%s11335_s1 + $0x220] ss:$16 sps:$4 sm:$0xff]  }
   0xf   :  { %4909 = vmatpush1.bf16.msra.mxu0 %v7295_v14  ;;  %v7315_v28 = vld [vmem:[%s11335_s1 + $0x4] ss:$16 sps:$4 sm:$0xff]   ;;  %v7319_v30 = vld [vmem:[%s11335_s1] ss:$16 sps:$4 sm:$0xff]  }
  0x10   :  { %4952 = vmatpush1.bf16.msra.mxu1 %v7296_v15  ;;  %4910 = vmatprep.subr.bf16.mxu0 %v7297_v16  ;;  %v7317_v29 = vld [vmem:[%s11335_s1 + $0x204] ss:$16 sps:$4 sm:$0xff]   ;;  %v7320_v31 = vld [vmem:[%s11335_s1 + $0x200] ss:$16 sps:$4 sm:$0xff]  }
  0x11   :  { %4953 = vmatprep.subr.bf16.mxu1 %v7299_v17  ;;  %v7321_v32 = vld [vmem:[%s11335_s1 + $0x1e4] ss:$16 sps:$4 sm:$0xff]   ;;  %v7325_v34 = vld [vmem:[%s11335_s1 + $0x1e0] ss:$16 sps:$4 sm:$0xff]  }
  0x12   :  { %v7323_v33 = vld [vmem:[%s11335_s1 + $0x3e4] ss:$16 sps:$4 sm:$0xff]   ;;  %v7326_v35 = vld [vmem:[%s11335_s1 + $0x3e0] ss:$16 sps:$4 sm:$0xff]  }
  0x13   :  { %4911 = vmatpush1.bf16.msra.mxu0 %v7301_v18  ;;  %v7327_v36 = vld [vmem:[%s11335_s1 + $0x1c4] ss:$16 sps:$4 sm:$0xff]   ;;  %v7331_v38 = vld [vmem:[%s11335_s1 + $0x1c0] ss:$16 sps:$4 sm:$0xff]  }
  0x14   :  { %4954 = vmatpush1.bf16.msra.mxu1 %v7302_v19  ;;  %4912 = vmatprep.subr.bf16.mxu0 %v7303_v20  ;;  %v7329_v37 = vld [vmem:[%s11335_s1 + $0x3c4] ss:$16 sps:$4 sm:$0xff]   ;;  %v7332_v39 = vld [vmem:[%s11335_s1 + $0x3c0] ss:$16 sps:$4 sm:$0xff]  }
  0x15   :  { %4955 = vmatprep.subr.bf16.mxu1 %v7305_v21  ;;  %v7333_v40 = vld [vmem:[%s11335_s1 + $0x1a4] ss:$16 sps:$4 sm:$0xff]   ;;  %v7337_v42 = vld [vmem:[%s11335_s1 + $0x1a0] ss:$16 sps:$4 sm:$0xff]  }
  0x16   :  { %v7335_v41 = vld [vmem:[%s11335_s1 + $0x3a4] ss:$16 sps:$4 sm:$0xff]   ;;  %v7338_v43 = vld [vmem:[%s11335_s1 + $0x3a0] ss:$16 sps:$4 sm:$0xff]  }
  0x17   :  { %4913 = vmatpush1.bf16.msra.mxu0 %v7307_v22  ;;  %v7339_v44 = vld [vmem:[%s11335_s1 + $0x184] ss:$16 sps:$4 sm:$0xff]   ;;  %v7343_v46 = vld [vmem:[%s11335_s1 + $0x180] ss:$16 sps:$4 sm:$0xff]  }
  0x18   :  { %4956 = vmatpush1.bf16.msra.mxu1 %v7308_v23  ;;  %4914 = vmatprep.subr.bf16.mxu0 %v7309_v24  ;;  %v7341_v45 = vld [vmem:[%s11335_s1 + $0x384] ss:$16 sps:$4 sm:$0xff]   ;;  %v7344_v47 = vld [vmem:[%s11335_s1 + $0x380] ss:$16 sps:$4 sm:$0xff]  }
  0x19   :  { %4957 = vmatprep.subr.bf16.mxu1 %v7311_v25  ;;  %v7345_v48 = vld [vmem:[%s11335_s1 + $0x164] ss:$16 sps:$4 sm:$0xff]   ;;  %v7374_v51 = vld [vmem:[%s11336_s0 + $0xc] ss:$100 sps:$4 sm:$0xff]  }
  0x1a   :  { %v7371_v49 = vld [vmem:[%s11336_s0 + $0x4] ss:$100 sps:$4 sm:$0xff]   ;;  %v7349_v52 = vld [vmem:[%s11335_s1 + $0x160] ss:$16 sps:$4 sm:$0xff]   ;;  %4977 = vmatprep.mubr.bf16.mxu1 %v7374_v51 }
  0x1b   :  { %4915 = vmatpush1.bf16.msra.mxu0 %v7313_v26  ;;  %v7347_v50 = vld [vmem:[%s11335_s1 + $0x364] ss:$16 sps:$4 sm:$0xff]   ;;  %4934 = vmatprep.mubr.bf16.mxu0 %v7371_v49  ;;  %v7350_v53 = vld [vmem:[%s11335_s1 + $0x360] ss:$16 sps:$4 sm:$0xff]  }
  0x1c   :  { %4958 = vmatpush1.bf16.msra.mxu1 %v7314_v27  ;;  %4916 = vmatprep.subr.bf16.mxu0 %v7315_v28  ;;  %v7351_v54 = vld [vmem:[%s11335_s1 + $0x144] ss:$16 sps:$4 sm:$0xff]   ;;  %v7355_v56 = vld [vmem:[%s11335_s1 + $0x140] ss:$16 sps:$4 sm:$0xff]  }
  0x1d   :  { %4959 = vmatprep.subr.bf16.mxu1 %v7317_v29  ;;  %v7353_v55 = vld [vmem:[%s11335_s1 + $0x344] ss:$16 sps:$4 sm:$0xff]   ;;  %v7356_v57 = vld [vmem:[%s11335_s1 + $0x340] ss:$16 sps:$4 sm:$0xff]  }
  0x1e   :  { %v7357_v58 = vld [vmem:[%s11335_s1 + $0x124] ss:$16 sps:$4 sm:$0xff]   ;;  %v7361_v60 = vld [vmem:[%s11335_s1 + $0x120] ss:$16 sps:$4 sm:$0xff]  }
  0x1f   :  { %4917 = vmatpush1.bf16.msra.mxu0 %v7319_v30  ;;  %v7359_v59 = vld [vmem:[%s11335_s1 + $0x324] ss:$16 sps:$4 sm:$0xff]   ;;  %v7362_v61 = vld [vmem:[%s11335_s1 + $0x320] ss:$16 sps:$4 sm:$0xff]  }
  0x20   :  { %4960 = vmatpush1.bf16.msra.mxu1 %v7320_v31  ;;  %4918 = vmatprep.subr.bf16.mxu0 %v7321_v32  ;;  %v7363_v62 = vld [vmem:[%s11335_s1 + $0x104] ss:$16 sps:$4 sm:$0xff]   ;;  %v7367_v0 = vld [vmem:[%s11335_s1 + $0x100] ss:$16 sps:$4 sm:$0xff]  }
  0x21   :  { %4961 = vmatprep.subr.bf16.mxu1 %v7323_v33  ;;  %v7365_v63 = vld [vmem:[%s11335_s1 + $0x304] ss:$16 sps:$4 sm:$0xff]   ;;  %v7368_v1 = vld [vmem:[%s11335_s1 + $0x300] ss:$16 sps:$4 sm:$0xff]  }
  0x22   :  { %v7377_v2 = vld [vmem:[%s11335_s1 + $0x4e4] ss:$16 sps:$4 sm:$0xff]   ;;  %v7375_v6 = vld [vmem:[%s11335_s1 + $0x4e0] ss:$16 sps:$4 sm:$0xff]  }
  0x23   :  { %4919 = vmatpush2.bf16.msra.mxu0 %v7325_v34  ;;  %v7380_v3 = vld [vmem:[%s11335_s1 + $0x6e4] ss:$16 sps:$4 sm:$0xff]   ;;  %v7378_v7 = vld [vmem:[%s11335_s1 + $0x6e0] ss:$16 sps:$4 sm:$0xff]  }
  0x24   :  { %4962 = vmatpush2.bf16.msra.mxu1 %v7326_v35  ;;  %4920 = vmatprep.subr.bf16.mxu0 %v7327_v36  ;;  %v7369_v4 = vld [vmem:[%s11336_s0] ss:$100 sps:$4 sm:$0xff]   ;;  %v7473_v34 = vld [vmem:[%s11336_s0 + $0x14] ss:$100 sps:$4 sm:$0xff]  }
  0x25   :  { %4963 = vmatprep.subr.bf16.mxu1 %v7329_v37  ;;  %v7383_v8 = vld [vmem:[%s11335_s1 + $0x4c4] ss:$16 sps:$4 sm:$0xff]   ;;  %v7381_v10 = vld [vmem:[%s11335_s1 + $0x4c0] ss:$16 sps:$4 sm:$0xff]  }
  0x26   :  { %v7386_v9 = vld [vmem:[%s11335_s1 + $0x6c4] ss:$16 sps:$4 sm:$0xff]   ;;  %v7384_v11 = vld [vmem:[%s11335_s1 + $0x6c0] ss:$16 sps:$4 sm:$0xff]  }
  0x27   :  { %4921 = vmatpush2.bf16.msra.mxu0 %v7331_v38  ;;  %v7389_v12 = vld [vmem:[%s11335_s1 + $0x4a4] ss:$16 sps:$4 sm:$0xff]   ;;  %v7387_v14 = vld [vmem:[%s11335_s1 + $0x4a0] ss:$16 sps:$4 sm:$0xff]  }
  0x28   :  { %4964 = vmatpush2.bf16.msra.mxu1 %v7332_v39  ;;  %4922 = vmatprep.subr.bf16.mxu0 %v7333_v40  ;;  %v7392_v13 = vld [vmem:[%s11335_s1 + $0x6a4] ss:$16 sps:$4 sm:$0xff]   ;;  %v7390_v15 = vld [vmem:[%s11335_s1 + $0x6a0] ss:$16 sps:$4 sm:$0xff]  }
  0x29   :  { %4965 = vmatprep.subr.bf16.mxu1 %v7335_v41  ;;  %v7395_v16 = vld [vmem:[%s11335_s1 + $0x484] ss:$16 sps:$4 sm:$0xff]   ;;  %v7393_v18 = vld [vmem:[%s11335_s1 + $0x480] ss:$16 sps:$4 sm:$0xff]  }
  0x2a   :  { %v7398_v17 = vld [vmem:[%s11335_s1 + $0x684] ss:$16 sps:$4 sm:$0xff]   ;;  %v7396_v19 = vld [vmem:[%s11335_s1 + $0x680] ss:$16 sps:$4 sm:$0xff]  }
  0x2b   :  { %4923 = vmatpush2.bf16.msra.mxu0 %v7337_v42  ;;  %v7401_v20 = vld [vmem:[%s11335_s1 + $0x464] ss:$16 sps:$4 sm:$0xff]   ;;  %v7399_v22 = vld [vmem:[%s11335_s1 + $0x460] ss:$16 sps:$4 sm:$0xff]  }
  0x2c   :  { %4966 = vmatpush2.bf16.msra.mxu1 %v7338_v43  ;;  %4924 = vmatprep.subr.bf16.mxu0 %v7339_v44  ;;  %v7404_v21 = vld [vmem:[%s11335_s1 + $0x664] ss:$16 sps:$4 sm:$0xff]   ;;  %v7402_v23 = vld [vmem:[%s11335_s1 + $0x660] ss:$16 sps:$4 sm:$0xff]  }
  0x2d   :  { %4967 = vmatprep.subr.bf16.mxu1 %v7341_v45  ;;  %v7407_v24 = vld [vmem:[%s11335_s1 + $0x444] ss:$16 sps:$4 sm:$0xff]   ;;  %v7405_v26 = vld [vmem:[%s11335_s1 + $0x440] ss:$16 sps:$4 sm:$0xff]  }
  0x2e   :  { %v7410_v25 = vld [vmem:[%s11335_s1 + $0x644] ss:$16 sps:$4 sm:$0xff]   ;;  %v7408_v27 = vld [vmem:[%s11335_s1 + $0x640] ss:$16 sps:$4 sm:$0xff]  }
  0x2f   :  { %4925 = vmatpush2.bf16.msra.mxu0 %v7343_v46  ;;  %v7413_v28 = vld [vmem:[%s11335_s1 + $0x424] ss:$16 sps:$4 sm:$0xff]   ;;  %v7411_v30 = vld [vmem:[%s11335_s1 + $0x420] ss:$16 sps:$4 sm:$0xff]  }
  0x30   :  { %4968 = vmatpush2.bf16.msra.mxu1 %v7344_v47  ;;  %4926 = vmatprep.subr.bf16.mxu0 %v7345_v48  ;;  %v7416_v29 = vld [vmem:[%s11335_s1 + $0x624] ss:$16 sps:$4 sm:$0xff]   ;;  %v7414_v31 = vld [vmem:[%s11335_s1 + $0x620] ss:$16 sps:$4 sm:$0xff]  }
  0x31   :  { %4969 = vmatprep.subr.bf16.mxu1 %v7347_v50  ;;  %v7419_v32 = vld [vmem:[%s11335_s1 + $0x404] ss:$16 sps:$4 sm:$0xff]   ;;  %v7476_v35 = vld [vmem:[%s11336_s0 + $0x1c] ss:$100 sps:$4 sm:$0xff]  }
  0x32   :  { %v7422_v33 = vld [vmem:[%s11335_s1 + $0x604] ss:$16 sps:$4 sm:$0xff]   ;;  %v7417_v36 = vld [vmem:[%s11335_s1 + $0x400] ss:$16 sps:$4 sm:$0xff]  }
  0x33   :  { %4927 = vmatpush2.bf16.msra.mxu0 %v7349_v52  ;;  %v7420_v37 = vld [vmem:[%s11335_s1 + $0x600] ss:$16 sps:$4 sm:$0xff]   ;;  %v7425_v38 = vld [vmem:[%s11335_s1 + $0x5e4] ss:$16 sps:$4 sm:$0xff]  }
  0x34   :  { %4970 = vmatpush2.bf16.msra.mxu1 %v7350_v53  ;;  %4928 = vmatprep.subr.bf16.mxu0 %v7351_v54  ;;  %v7428_v39 = vld [vmem:[%s11335_s1 + $0x7e4] ss:$16 sps:$4 sm:$0xff]   ;;  %v7423_v40 = vld [vmem:[%s11335_s1 + $0x5e0] ss:$16 sps:$4 sm:$0xff]  }
  0x35   :  { %4971 = vmatprep.subr.bf16.mxu1 %v7353_v55  ;;  %v7426_v41 = vld [vmem:[%s11335_s1 + $0x7e0] ss:$16 sps:$4 sm:$0xff]   ;;  %v7431_v42 = vld [vmem:[%s11335_s1 + $0x5c4] ss:$16 sps:$4 sm:$0xff]  }
  0x36   :  { %v7434_v43 = vld [vmem:[%s11335_s1 + $0x7c4] ss:$16 sps:$4 sm:$0xff]   ;;  %v7429_v44 = vld [vmem:[%s11335_s1 + $0x5c0] ss:$16 sps:$4 sm:$0xff]  }
  0x37   :  { %4929 = vmatpush2.bf16.msra.mxu0 %v7355_v56  ;;  %v7432_v45 = vld [vmem:[%s11335_s1 + $0x7c0] ss:$16 sps:$4 sm:$0xff]   ;;  %v7437_v46 = vld [vmem:[%s11335_s1 + $0x5a4] ss:$16 sps:$4 sm:$0xff]  }
  0x38   :  { %4972 = vmatpush2.bf16.msra.mxu1 %v7356_v57  ;;  %4930 = vmatprep.subr.bf16.mxu0 %v7357_v58  ;;  %v7440_v47 = vld [vmem:[%s11335_s1 + $0x7a4] ss:$16 sps:$4 sm:$0xff]   ;;  %v7435_v48 = vld [vmem:[%s11335_s1 + $0x5a0] ss:$16 sps:$4 sm:$0xff]  }
  0x39   :  { %4973 = vmatprep.subr.bf16.mxu1 %v7359_v59  ;;  %v7438_v49 = vld [vmem:[%s11335_s1 + $0x7a0] ss:$16 sps:$4 sm:$0xff]   ;;  %v7443_v50 = vld [vmem:[%s11335_s1 + $0x584] ss:$16 sps:$4 sm:$0xff]  }
  0x3a   :  { %v7446_v51 = vld [vmem:[%s11335_s1 + $0x784] ss:$16 sps:$4 sm:$0xff]   ;;  %v7441_v52 = vld [vmem:[%s11335_s1 + $0x580] ss:$16 sps:$4 sm:$0xff]  }
  0x3b   :  { %4931 = vmatpush2.bf16.msra.mxu0 %v7361_v60  ;;  %v7444_v53 = vld [vmem:[%s11335_s1 + $0x780] ss:$16 sps:$4 sm:$0xff]   ;;  %v7449_v54 = vld [vmem:[%s11335_s1 + $0x564] ss:$16 sps:$4 sm:$0xff]  }
  0x3c   :  { %4974 = vmatpush2.bf16.msra.mxu1 %v7362_v61  ;;  %4932 = vmatprep.subr.bf16.mxu0 %v7363_v62  ;;  %v7452_v55 = vld [vmem:[%s11335_s1 + $0x764] ss:$16 sps:$4 sm:$0xff]   ;;  %v7447_v56 = vld [vmem:[%s11335_s1 + $0x560] ss:$16 sps:$4 sm:$0xff]  }
  0x3d   :  { %4975 = vmatprep.subr.bf16.mxu1 %v7365_v63  ;;  %v7450_v57 = vld [vmem:[%s11335_s1 + $0x760] ss:$16 sps:$4 sm:$0xff]   ;;  %v7455_v58 = vld [vmem:[%s11335_s1 + $0x544] ss:$16 sps:$4 sm:$0xff]  }
  0x3e   :  { %v7458_v59 = vld [vmem:[%s11335_s1 + $0x744] ss:$16 sps:$4 sm:$0xff]   ;;  %v7453_v60 = vld [vmem:[%s11335_s1 + $0x540] ss:$16 sps:$4 sm:$0xff]  }
  0x3f   :  { %4933 = vmatpush2.bf16.msra.mxu0 %v7367_v0  ;;  %v7456_v61 = vld [vmem:[%s11335_s1 + $0x740] ss:$16 sps:$4 sm:$0xff]   ;;  %v7461_v62 = vld [vmem:[%s11335_s1 + $0x524] ss:$16 sps:$4 sm:$0xff]  }
  0x40   :  { %4976 = vmatpush2.bf16.msra.mxu1 %v7368_v1  ;;  %4988 = vmatprep.subr.bf16.mxu0 %v7377_v2  ;;  %v7464_v63 = vld [vmem:[%s11335_s1 + $0x724] ss:$16 sps:$4 sm:$0xff]   ;;  %v7459_v0 = vld [vmem:[%s11335_s1 + $0x520] ss:$16 sps:$4 sm:$0xff]  }
  0x41   :  { %5031 = vmatprep.subr.bf16.mxu1 %v7380_v3  ;;  %v7462_v1 = vld [vmem:[%s11335_s1 + $0x720] ss:$16 sps:$4 sm:$0xff]   ;;  %v7467_v2 = vld [vmem:[%s11335_s1 + $0x504] ss:$16 sps:$4 sm:$0xff]  }
  0x42   :  { %4935 = vmatmul.mubr.bf16.vlgmr.msra.gmra.mxu0 %v7369_v4  ;;  %v7470_v3 = vld [vmem:[%s11335_s1 + $0x704] ss:$16 sps:$4 sm:$0xff]   ;;  %v7465_v4 = vld [vmem:[%s11335_s1 + $0x500] ss:$16 sps:$4 sm:$0xff]  }
  0x43   :  { %4978 = vmatmul.mubr.bf16.vlgmr.msra.gmra.mxu1 %v7372_v5  ;;  %4989 = vmatpush1.bf16.msra.mxu0 %v7375_v6  ;;  %v7468_v5 = vld [vmem:[%s11335_s1 + $0x700] ss:$16 sps:$4 sm:$0xff]   ;;  %v7479_v6 = vld [vmem:[%s11335_s1 + $0x8e4] ss:$16 sps:$4 sm:$0xff]  }
  0x44   :  { %5032 = vmatpush1.bf16.msra.mxu1 %v7378_v7  ;;  %4990 = vmatprep.subr.bf16.mxu0 %v7383_v8  ;;  %v7482_v7 = vld [vmem:[%s11335_s1 + $0xae4] ss:$16 sps:$4 sm:$0xff]  }
  0x45   :  { %5033 = vmatprep.subr.bf16.mxu1 %v7386_v9  ;;  %5020 = vmatprep.mubr.bf16.mxu0 %v7473_v34  ;;  %v7471_v8 = vld [vmem:[%s11336_s0 + $0x10] ss:$100 sps:$4 sm:$0xff]   ;;  %v7474_v9 = vld [vmem:[%s11336_s0 + $0x18] ss:$100 sps:$4 sm:$0xff]  }
  0x46   :  { %5063 = vmatprep.mubr.bf16.mxu1 %v7476_v35  ;;  %v7515_v34 = vld [vmem:[%s11335_s1 + $0x824] ss:$16 sps:$4 sm:$0xff]  }
  0x47   :  { %4991 = vmatpush1.bf16.msra.mxu0 %v7381_v10  ;;  %v7477_v10 = vld [vmem:[%s11335_s1 + $0x8e0] ss:$16 sps:$4 sm:$0xff]   ;;  %v7518_v35 = vld [vmem:[%s11335_s1 + $0xa24] ss:$16 sps:$4 sm:$0xff]  }
  0x48   :  { %5034 = vmatpush1.bf16.msra.mxu1 %v7384_v11  ;;  %4992 = vmatprep.subr.bf16.mxu0 %v7389_v12  ;;  %v7480_v11 = vld [vmem:[%s11335_s1 + $0xae0] ss:$16 sps:$4 sm:$0xff]   ;;  %v7485_v12 = vld [vmem:[%s11335_s1 + $0x8c4] ss:$16 sps:$4 sm:$0xff]  }
  0x49   :  { %5035 = vmatprep.subr.bf16.mxu1 %v7392_v13  ;;  %v7488_v13 = vld [vmem:[%s11335_s1 + $0xac4] ss:$16 sps:$4 sm:$0xff]  }
  0x4b   :  { %4993 = vmatpush1.bf16.msra.mxu0 %v7387_v14  ;;  %v7483_v14 = vld [vmem:[%s11335_s1 + $0x8c0] ss:$16 sps:$4 sm:$0xff]  }
  0x4c   :  { %5036 = vmatpush1.bf16.msra.mxu1 %v7390_v15  ;;  %4994 = vmatprep.subr.bf16.mxu0 %v7395_v16  ;;  %v7486_v15 = vld [vmem:[%s11335_s1 + $0xac0] ss:$16 sps:$4 sm:$0xff]   ;;  %v7491_v16 = vld [vmem:[%s11335_s1 + $0x8a4] ss:$16 sps:$4 sm:$0xff]  }
  0x4d   :  { %5037 = vmatprep.subr.bf16.mxu1 %v7398_v17  ;;  %v7494_v17 = vld [vmem:[%s11335_s1 + $0xaa4] ss:$16 sps:$4 sm:$0xff]  }
  0x4f   :  { %4995 = vmatpush1.bf16.msra.mxu0 %v7393_v18  ;;  %v7489_v18 = vld [vmem:[%s11335_s1 + $0x8a0] ss:$16 sps:$4 sm:$0xff]  }
  0x50   :  { %5038 = vmatpush1.bf16.msra.mxu1 %v7396_v19  ;;  %4996 = vmatprep.subr.bf16.mxu0 %v7401_v20  ;;  %v7575_v19 = vld [vmem:[%s11336_s0 + $0x24] ss:$100 sps:$4 sm:$0xff]   ;;  %v7492_v20 = vld [vmem:[%s11335_s1 + $0xaa0] ss:$16 sps:$4 sm:$0xff]  }
  0x51   :  { %5039 = vmatprep.subr.bf16.mxu1 %v7404_v21  ;;  %v7578_v21 = vld [vmem:[%s11336_s0 + $0x2c] ss:$100 sps:$4 sm:$0xff]  }
  0x53   :  { %4997 = vmatpush1.bf16.msra.mxu0 %v7399_v22  ;;  %v7497_v22 = vld [vmem:[%s11335_s1 + $0x884] ss:$16 sps:$4 sm:$0xff]  }
  0x54   :  { %5040 = vmatpush1.bf16.msra.mxu1 %v7402_v23  ;;  %4998 = vmatprep.subr.bf16.mxu0 %v7407_v24  ;;  %v7500_v23 = vld [vmem:[%s11335_s1 + $0xa84] ss:$16 sps:$4 sm:$0xff]   ;;  %v7495_v24 = vld [vmem:[%s11335_s1 + $0x880] ss:$16 sps:$4 sm:$0xff]  }
  0x55   :  { %5041 = vmatprep.subr.bf16.mxu1 %v7410_v25  ;;  %v7498_v25 = vld [vmem:[%s11335_s1 + $0xa80] ss:$16 sps:$4 sm:$0xff]  }
  0x57   :  { %4999 = vmatpush1.bf16.msra.mxu0 %v7405_v26  ;;  %v7503_v26 = vld [vmem:[%s11335_s1 + $0x864] ss:$16 sps:$4 sm:$0xff]  }
  0x58   :  { %5042 = vmatpush1.bf16.msra.mxu1 %v7408_v27  ;;  %5000 = vmatprep.subr.bf16.mxu0 %v7413_v28  ;;  %v7506_v27 = vld [vmem:[%s11335_s1 + $0xa64] ss:$16 sps:$4 sm:$0xff]   ;;  %v7501_v28 = vld [vmem:[%s11335_s1 + $0x860] ss:$16 sps:$4 sm:$0xff]  }
  0x59   :  { %5043 = vmatprep.subr.bf16.mxu1 %v7416_v29  ;;  %v7504_v29 = vld [vmem:[%s11335_s1 + $0xa60] ss:$16 sps:$4 sm:$0xff]  }
  0x5b   :  { %5001 = vmatpush1.bf16.msra.mxu0 %v7411_v30  ;;  %v7509_v30 = vld [vmem:[%s11335_s1 + $0x844] ss:$16 sps:$4 sm:$0xff]  }
  0x5c   :  { %5044 = vmatpush1.bf16.msra.mxu1 %v7414_v31  ;;  %5002 = vmatprep.subr.bf16.mxu0 %v7419_v32  ;;  %v7512_v31 = vld [vmem:[%s11335_s1 + $0xa44] ss:$16 sps:$4 sm:$0xff]   ;;  %v7507_v32 = vld [vmem:[%s11335_s1 + $0x840] ss:$16 sps:$4 sm:$0xff]  }
  0x5d   :  { %5045 = vmatprep.subr.bf16.mxu1 %v7422_v33  ;;  %v7510_v33 = vld [vmem:[%s11335_s1 + $0xa40] ss:$16 sps:$4 sm:$0xff]  }
  0x5f   :  { %5003 = vmatpush1.bf16.msra.mxu0 %v7417_v36  ;;  %v7513_v36 = vld [vmem:[%s11335_s1 + $0x820] ss:$16 sps:$4 sm:$0xff]  }
  0x60   :  { %5046 = vmatpush1.bf16.msra.mxu1 %v7420_v37  ;;  %5004 = vmatprep.subr.bf16.mxu0 %v7425_v38  ;;  %v7516_v37 = vld [vmem:[%s11335_s1 + $0xa20] ss:$16 sps:$4 sm:$0xff]   ;;  %v7521_v38 = vld [vmem:[%s11335_s1 + $0x804] ss:$16 sps:$4 sm:$0xff]  }
  0x61   :  { %5047 = vmatprep.subr.bf16.mxu1 %v7428_v39  ;;  %v7524_v39 = vld [vmem:[%s11335_s1 + $0xa04] ss:$16 sps:$4 sm:$0xff]  }
  0x63   :  { %5005 = vmatpush2.bf16.msra.mxu0 %v7423_v40  ;;  %v7519_v40 = vld [vmem:[%s11335_s1 + $0x800] ss:$16 sps:$4 sm:$0xff]  }
  0x64   :  { %5048 = vmatpush2.bf16.msra.mxu1 %v7426_v41  ;;  %5006 = vmatprep.subr.bf16.mxu0 %v7431_v42  ;;  %v7522_v41 = vld [vmem:[%s11335_s1 + $0xa00] ss:$16 sps:$4 sm:$0xff]   ;;  %v7527_v42 = vld [vmem:[%s11335_s1 + $0x9e4] ss:$16 sps:$4 sm:$0xff]  }
  0x65   :  { %5049 = vmatprep.subr.bf16.mxu1 %v7434_v43  ;;  %v7530_v43 = vld [vmem:[%s11335_s1 + $0xbe4] ss:$16 sps:$4 sm:$0xff]  }
  0x67   :  { %5007 = vmatpush2.bf16.msra.mxu0 %v7429_v44  ;;  %v7525_v44 = vld [vmem:[%s11335_s1 + $0x9e0] ss:$16 sps:$4 sm:$0xff]  }
  0x68   :  { %5050 = vmatpush2.bf16.msra.mxu1 %v7432_v45  ;;  %5008 = vmatprep.subr.bf16.mxu0 %v7437_v46  ;;  %v7528_v45 = vld [vmem:[%s11335_s1 + $0xbe0] ss:$16 sps:$4 sm:$0xff]   ;;  %v7533_v46 = vld [vmem:[%s11335_s1 + $0x9c4] ss:$16 sps:$4 sm:$0xff]  }
  0x69   :  { %5051 = vmatprep.subr.bf16.mxu1 %v7440_v47  ;;  %v7536_v47 = vld [vmem:[%s11335_s1 + $0xbc4] ss:$16 sps:$4 sm:$0xff]  }
  0x6b   :  { %5009 = vmatpush2.bf16.msra.mxu0 %v7435_v48  ;;  %v7531_v48 = vld [vmem:[%s11335_s1 + $0x9c0] ss:$16 sps:$4 sm:$0xff]  }
  0x6c   :  { %5052 = vmatpush2.bf16.msra.mxu1 %v7438_v49  ;;  %5010 = vmatprep.subr.bf16.mxu0 %v7443_v50  ;;  %v7534_v49 = vld [vmem:[%s11335_s1 + $0xbc0] ss:$16 sps:$4 sm:$0xff]   ;;  %v7539_v50 = vld [vmem:[%s11335_s1 + $0x9a4] ss:$16 sps:$4 sm:$0xff]  }
  0x6d   :  { %5053 = vmatprep.subr.bf16.mxu1 %v7446_v51  ;;  %v7542_v51 = vld [vmem:[%s11335_s1 + $0xba4] ss:$16 sps:$4 sm:$0xff]  }
  0x6f   :  { %5011 = vmatpush2.bf16.msra.mxu0 %v7441_v52  ;;  %v7537_v52 = vld [vmem:[%s11335_s1 + $0x9a0] ss:$16 sps:$4 sm:$0xff]  }
  0x70   :  { %5054 = vmatpush2.bf16.msra.mxu1 %v7444_v53  ;;  %5012 = vmatprep.subr.bf16.mxu0 %v7449_v54  ;;  %v7540_v53 = vld [vmem:[%s11335_s1 + $0xba0] ss:$16 sps:$4 sm:$0xff]   ;;  %v7545_v54 = vld [vmem:[%s11335_s1 + $0x984] ss:$16 sps:$4 sm:$0xff]  }
  0x71   :  { %5055 = vmatprep.subr.bf16.mxu1 %v7452_v55  ;;  %v7548_v55 = vld [vmem:[%s11335_s1 + $0xb84] ss:$16 sps:$4 sm:$0xff]  }
  0x73   :  { %5013 = vmatpush2.bf16.msra.mxu0 %v7447_v56  ;;  %v7543_v56 = vld [vmem:[%s11335_s1 + $0x980] ss:$16 sps:$4 sm:$0xff]  }
  0x74   :  { %5056 = vmatpush2.bf16.msra.mxu1 %v7450_v57  ;;  %5014 = vmatprep.subr.bf16.mxu0 %v7455_v58  ;;  %v7546_v57 = vld [vmem:[%s11335_s1 + $0xb80] ss:$16 sps:$4 sm:$0xff]   ;;  %v7551_v58 = vld [vmem:[%s11335_s1 + $0x964] ss:$16 sps:$4 sm:$0xff]  }
  0x75   :  { %5057 = vmatprep.subr.bf16.mxu1 %v7458_v59  ;;  %v7554_v59 = vld [vmem:[%s11335_s1 + $0xb64] ss:$16 sps:$4 sm:$0xff]  }
  0x77   :  { %5015 = vmatpush2.bf16.msra.mxu0 %v7453_v60  ;;  %v7549_v60 = vld [vmem:[%s11335_s1 + $0x960] ss:$16 sps:$4 sm:$0xff]  }
  0x78   :  { %5058 = vmatpush2.bf16.msra.mxu1 %v7456_v61  ;;  %5016 = vmatprep.subr.bf16.mxu0 %v7461_v62  ;;  %v7552_v61 = vld [vmem:[%s11335_s1 + $0xb60] ss:$16 sps:$4 sm:$0xff]   ;;  %v7557_v62 = vld [vmem:[%s11335_s1 + $0x944] ss:$16 sps:$4 sm:$0xff]  }
  0x79   :  { %5059 = vmatprep.subr.bf16.mxu1 %v7464_v63  ;;  %v7560_v63 = vld [vmem:[%s11335_s1 + $0xb44] ss:$16 sps:$4 sm:$0xff]  }
  0x7b   :  { %5017 = vmatpush2.bf16.msra.mxu0 %v7459_v0  ;;  %v7555_v0 = vld [vmem:[%s11335_s1 + $0x940] ss:$16 sps:$4 sm:$0xff]  }
  0x7c   :  { %5060 = vmatpush2.bf16.msra.mxu1 %v7462_v1  ;;  %5018 = vmatprep.subr.bf16.mxu0 %v7467_v2  ;;  %v7558_v1 = vld [vmem:[%s11335_s1 + $0xb40] ss:$16 sps:$4 sm:$0xff]   ;;  %v7563_v2 = vld [vmem:[%s11335_s1 + $0x924] ss:$16 sps:$4 sm:$0xff]  }
  0x7d   :  { %5061 = vmatprep.subr.bf16.mxu1 %v7470_v3  ;;  %v7566_v3 = vld [vmem:[%s11335_s1 + $0xb24] ss:$16 sps:$4 sm:$0xff]  }
  0x7f   :  { %5019 = vmatpush2.bf16.msra.mxu0 %v7465_v4  ;;  %v7561_v4 = vld [vmem:[%s11335_s1 + $0x920] ss:$16 sps:$4 sm:$0xff]  }
  0x80   :  { %5062 = vmatpush2.bf16.msra.mxu1 %v7468_v5  ;;  %5074 = vmatprep.subr.bf16.mxu0 %v7479_v6  ;;  %v7564_v5 = vld [vmem:[%s11335_s1 + $0xb20] ss:$16 sps:$4 sm:$0xff]   ;;  %v7569_v6 = vld [vmem:[%s11335_s1 + $0x904] ss:$16 sps:$4 sm:$0xff]  }
  0x81   :  { %5117 = vmatprep.subr.bf16.mxu1 %v7482_v7  ;;  %v7572_v7 = vld [vmem:[%s11335_s1 + $0xb04] ss:$16 sps:$4 sm:$0xff]  }
  0x82   :  { %5021 = vmatmul.mubr.bf16.vlgmr.msra.gmra.mxu0 %v7471_v8  ;;  %v7567_v8 = vld [vmem:[%s11335_s1 + $0x900] ss:$16 sps:$4 sm:$0xff]  }
  0x83   :  { %5064 = vmatmul.mubr.bf16.vlgmr.msra.gmra.mxu1 %v7474_v9  ;;  %5075 = vmatpush1.bf16.msra.mxu0 %v7477_v10  ;;  %v7570_v9 = vld [vmem:[%s11335_s1 + $0xb00] ss:$16 sps:$4 sm:$0xff]   ;;  %v7581_v10 = vld [vmem:[%s11335_s1 + $0xce4] ss:$16 sps:$4 sm:$0xff]  }
  0x84   :  { %5118 = vmatpush1.bf16.msra.mxu1 %v7480_v11  ;;  %5076 = vmatprep.subr.bf16.mxu0 %v7485_v12  ;;  %v7584_v11 = vld [vmem:[%s11335_s1 + $0xee4] ss:$16 sps:$4 sm:$0xff]  }
  0x85   :  { %5119 = vmatprep.subr.bf16.mxu1 %v7488_v13  ;;  %5106 = vmatprep.mubr.bf16.mxu0 %v7575_v19  ;;  %v7573_v12 = vld [vmem:[%s11336_s0 + $0x20] ss:$100 sps:$4 sm:$0xff]   ;;  %v7576_v13 = vld [vmem:[%s11336_s0 + $0x28] ss:$100 sps:$4 sm:$0xff]  }
  0x86   :  { %5149 = vmatprep.mubr.bf16.mxu1 %v7578_v21  ;;  %v7680_v19 = vld [vmem:[%s11336_s0 + $0x3c] ss:$100 sps:$4 sm:$0xff]  }
  0x87   :  { %5077 = vmatpush1.bf16.msra.mxu0 %v7483_v14  ;;  %v7579_v14 = vld [vmem:[%s11335_s1 + $0xce0] ss:$16 sps:$4 sm:$0xff]  }
  0x88   :  { %5120 = vmatpush1.bf16.msra.mxu1 %v7486_v15  ;;  %5078 = vmatprep.subr.bf16.mxu0 %v7491_v16  ;;  %v7582_v15 = vld [vmem:[%s11335_s1 + $0xee0] ss:$16 sps:$4 sm:$0xff]   ;;  %v7587_v16 = vld [vmem:[%s11335_s1 + $0xcc4] ss:$16 sps:$4 sm:$0xff]  }
  0x89   :  { %5121 = vmatprep.subr.bf16.mxu1 %v7494_v17  ;;  %v7590_v17 = vld [vmem:[%s11335_s1 + $0xec4] ss:$16 sps:$4 sm:$0xff]   ;;  %v7588_v21 = vld [vmem:[%s11335_s1 + $0xec0] ss:$16 sps:$4 sm:$0xff]  }
  0x8b   :  { %5079 = vmatpush1.bf16.msra.mxu0 %v7489_v18  ;;  %v7677_v18 = vld [vmem:[%s11336_s0 + $0x34] ss:$100 sps:$4 sm:$0xff]  }
  0x8c   :  { %5122 = vmatpush1.bf16.msra.mxu1 %v7492_v20  ;;  %5080 = vmatprep.subr.bf16.mxu0 %v7497_v22  ;;  %v7585_v20 = vld [vmem:[%s11335_s1 + $0xcc0] ss:$16 sps:$4 sm:$0xff]   ;;  %v7593_v22 = vld [vmem:[%s11335_s1 + $0xca4] ss:$16 sps:$4 sm:$0xff]  }
  0x8d   :  { %5123 = vmatprep.subr.bf16.mxu1 %v7500_v23  ;;  %v7596_v23 = vld [vmem:[%s11335_s1 + $0xea4] ss:$16 sps:$4 sm:$0xff]  }
  0x8f   :  { %5081 = vmatpush1.bf16.msra.mxu0 %v7495_v24  ;;  %v7591_v24 = vld [vmem:[%s11335_s1 + $0xca0] ss:$16 sps:$4 sm:$0xff]  }
  0x90   :  { %5124 = vmatpush1.bf16.msra.mxu1 %v7498_v25  ;;  %5082 = vmatprep.subr.bf16.mxu0 %v7503_v26  ;;  %v7594_v25 = vld [vmem:[%s11335_s1 + $0xea0] ss:$16 sps:$4 sm:$0xff]   ;;  %v7599_v26 = vld [vmem:[%s11335_s1 + $0xc84] ss:$16 sps:$4 sm:$0xff]  }
  0x91   :  { %5125 = vmatprep.subr.bf16.mxu1 %v7506_v27  ;;  %v7602_v27 = vld [vmem:[%s11335_s1 + $0xe84] ss:$16 sps:$4 sm:$0xff]  }
  0x93   :  { %5083 = vmatpush1.bf16.msra.mxu0 %v7501_v28  ;;  %v7597_v28 = vld [vmem:[%s11335_s1 + $0xc80] ss:$16 sps:$4 sm:$0xff]  }
  0x94   :  { %5126 = vmatpush1.bf16.msra.mxu1 %v7504_v29  ;;  %5084 = vmatprep.subr.bf16.mxu0 %v7509_v30  ;;  %v7600_v29 = vld [vmem:[%s11335_s1 + $0xe80] ss:$16 sps:$4 sm:$0xff]   ;;  %v7605_v30 = vld [vmem:[%s11335_s1 + $0xc64] ss:$16 sps:$4 sm:$0xff]  }
  0x95   :  { %5127 = vmatprep.subr.bf16.mxu1 %v7512_v31  ;;  %v7608_v31 = vld [vmem:[%s11335_s1 + $0xe64] ss:$16 sps:$4 sm:$0xff]  }
  0x97   :  { %5085 = vmatpush1.bf16.msra.mxu0 %v7507_v32  ;;  %v7603_v32 = vld [vmem:[%s11335_s1 + $0xc60] ss:$16 sps:$4 sm:$0xff]  }
  0x98   :  { %5128 = vmatpush1.bf16.msra.mxu1 %v7510_v33  ;;  %5086 = vmatprep.subr.bf16.mxu0 %v7515_v34  ;;  %v7606_v33 = vld [vmem:[%s11335_s1 + $0xe60] ss:$16 sps:$4 sm:$0xff]   ;;  %v7611_v34 = vld [vmem:[%s11335_s1 + $0xc44] ss:$16 sps:$4 sm:$0xff]  }
  0x99   :  { %5129 = vmatprep.subr.bf16.mxu1 %v7518_v35  ;;  %v7614_v35 = vld [vmem:[%s11335_s1 + $0xe44] ss:$16 sps:$4 sm:$0xff]  }
  0x9b   :  { %5087 = vmatpush1.bf16.msra.mxu0 %v7513_v36  ;;  %v7609_v36 = vld [vmem:[%s11335_s1 + $0xc40] ss:$16 sps:$4 sm:$0xff]  }
  0x9c   :  { %5130 = vmatpush1.bf16.msra.mxu1 %v7516_v37  ;;  %5088 = vmatprep.subr.bf16.mxu0 %v7521_v38  ;;  %v7612_v37 = vld [vmem:[%s11335_s1 + $0xe40] ss:$16 sps:$4 sm:$0xff]   ;;  %v7617_v38 = vld [vmem:[%s11335_s1 + $0xc24] ss:$16 sps:$4 sm:$0xff]  }
  0x9d   :  { %5131 = vmatprep.subr.bf16.mxu1 %v7524_v39  ;;  %v7620_v39 = vld [vmem:[%s11335_s1 + $0xe24] ss:$16 sps:$4 sm:$0xff]  }
  0x9f   :  { %5089 = vmatpush1.bf16.msra.mxu0 %v7519_v40  ;;  %v7615_v40 = vld [vmem:[%s11335_s1 + $0xc20] ss:$16 sps:$4 sm:$0xff]  }
  0xa0   :  { %5132 = vmatpush1.bf16.msra.mxu1 %v7522_v41  ;;  %5090 = vmatprep.subr.bf16.mxu0 %v7527_v42  ;;  %v7618_v41 = vld [vmem:[%s11335_s1 + $0xe20] ss:$16 sps:$4 sm:$0xff]   ;;  %v7623_v42 = vld [vmem:[%s11335_s1 + $0xc04] ss:$16 sps:$4 sm:$0xff]  }
  0xa1   :  { %5133 = vmatprep.subr.bf16.mxu1 %v7530_v43  ;;  %v7626_v43 = vld [vmem:[%s11335_s1 + $0xe04] ss:$16 sps:$4 sm:$0xff]  }
  0xa3   :  { %5091 = vmatpush2.bf16.msra.mxu0 %v7525_v44  ;;  %v7621_v44 = vld [vmem:[%s11335_s1 + $0xc00] ss:$16 sps:$4 sm:$0xff]  }
  0xa4   :  { %5134 = vmatpush2.bf16.msra.mxu1 %v7528_v45  ;;  %5092 = vmatprep.subr.bf16.mxu0 %v7533_v46  ;;  %v7624_v45 = vld [vmem:[%s11335_s1 + $0xe00] ss:$16 sps:$4 sm:$0xff]   ;;  %v7629_v46 = vld [vmem:[%s11335_s1 + $0xde4] ss:$16 sps:$4 sm:$0xff]  }
  0xa5   :  { %5135 = vmatprep.subr.bf16.mxu1 %v7536_v47  ;;  %v7632_v47 = vld [vmem:[%s11335_s1 + $0xfe4] ss:$16 sps:$4 sm:$0xff]  }
  0xa7   :  { %5093 = vmatpush2.bf16.msra.mxu0 %v7531_v48  ;;  %v7627_v48 = vld [vmem:[%s11335_s1 + $0xde0] ss:$16 sps:$4 sm:$0xff]  }
  0xa8   :  { %5136 = vmatpush2.bf16.msra.mxu1 %v7534_v49  ;;  %5094 = vmatprep.subr.bf16.mxu0 %v7539_v50  ;;  %v7630_v49 = vld [vmem:[%s11335_s1 + $0xfe0] ss:$16 sps:$4 sm:$0xff]   ;;  %v7635_v50 = vld [vmem:[%s11335_s1 + $0xdc4] ss:$16 sps:$4 sm:$0xff]  }
  0xa9   :  { %5137 = vmatprep.subr.bf16.mxu1 %v7542_v51  ;;  %v7638_v51 = vld [vmem:[%s11335_s1 + $0xfc4] ss:$16 sps:$4 sm:$0xff]  }
  0xab   :  { %5095 = vmatpush2.bf16.msra.mxu0 %v7537_v52  ;;  %v7633_v52 = vld [vmem:[%s11335_s1 + $0xdc0] ss:$16 sps:$4 sm:$0xff]  }
  0xac   :  { %5138 = vmatpush2.bf16.msra.mxu1 %v7540_v53  ;;  %5096 = vmatprep.subr.bf16.mxu0 %v7545_v54  ;;  %v7636_v53 = vld [vmem:[%s11335_s1 + $0xfc0] ss:$16 sps:$4 sm:$0xff]   ;;  %v7641_v54 = vld [vmem:[%s11335_s1 + $0xda4] ss:$16 sps:$4 sm:$0xff]  }
  0xad   :  { %5139 = vmatprep.subr.bf16.mxu1 %v7548_v55  ;;  %v7644_v55 = vld [vmem:[%s11335_s1 + $0xfa4] ss:$16 sps:$4 sm:$0xff]  }
  0xaf   :  { %5097 = vmatpush2.bf16.msra.mxu0 %v7543_v56  ;;  %v7639_v56 = vld [vmem:[%s11335_s1 + $0xda0] ss:$16 sps:$4 sm:$0xff]  }
  0xb0   :  { %5140 = vmatpush2.bf16.msra.mxu1 %v7546_v57  ;;  %5098 = vmatprep.subr.bf16.mxu0 %v7551_v58  ;;  %v7642_v57 = vld [vmem:[%s11335_s1 + $0xfa0] ss:$16 sps:$4 sm:$0xff]   ;;  %v7647_v58 = vld [vmem:[%s11335_s1 + $0xd84] ss:$16 sps:$4 sm:$0xff]  }
  0xb1   :  { %5141 = vmatprep.subr.bf16.mxu1 %v7554_v59  ;;  %v7650_v59 = vld [vmem:[%s11335_s1 + $0xf84] ss:$16 sps:$4 sm:$0xff]  }
  0xb3   :  { %5099 = vmatpush2.bf16.msra.mxu0 %v7549_v60  ;;  %v7645_v60 = vld [vmem:[%s11335_s1 + $0xd80] ss:$16 sps:$4 sm:$0xff]  }
  0xb4   :  { %5142 = vmatpush2.bf16.msra.mxu1 %v7552_v61  ;;  %5100 = vmatprep.subr.bf16.mxu0 %v7557_v62  ;;  %v7648_v61 = vld [vmem:[%s11335_s1 + $0xf80] ss:$16 sps:$4 sm:$0xff]   ;;  %v7653_v62 = vld [vmem:[%s11335_s1 + $0xd64] ss:$16 sps:$4 sm:$0xff]  }
  0xb5   :  { %5143 = vmatprep.subr.bf16.mxu1 %v7560_v63  ;;  %v7656_v63 = vld [vmem:[%s11335_s1 + $0xf64] ss:$16 sps:$4 sm:$0xff]  }
  0xb7   :  { %5101 = vmatpush2.bf16.msra.mxu0 %v7555_v0  ;;  %v7651_v0 = vld [vmem:[%s11335_s1 + $0xd60] ss:$16 sps:$4 sm:$0xff]  }
  0xb8   :  { %5144 = vmatpush2.bf16.msra.mxu1 %v7558_v1  ;;  %5102 = vmatprep.subr.bf16.mxu0 %v7563_v2  ;;  %v7654_v1 = vld [vmem:[%s11335_s1 + $0xf60] ss:$16 sps:$4 sm:$0xff]   ;;  %v7659_v2 = vld [vmem:[%s11335_s1 + $0xd44] ss:$16 sps:$4 sm:$0xff]  }
  0xb9   :  { %5145 = vmatprep.subr.bf16.mxu1 %v7566_v3  ;;  %v7662_v3 = vld [vmem:[%s11335_s1 + $0xf44] ss:$16 sps:$4 sm:$0xff]  }
  0xbb   :  { %5103 = vmatpush2.bf16.msra.mxu0 %v7561_v4  ;;  %v7657_v4 = vld [vmem:[%s11335_s1 + $0xd40] ss:$16 sps:$4 sm:$0xff]  }
  0xbc   :  { %5146 = vmatpush2.bf16.msra.mxu1 %v7564_v5  ;;  %5104 = vmatprep.subr.bf16.mxu0 %v7569_v6  ;;  %v7660_v5 = vld [vmem:[%s11335_s1 + $0xf40] ss:$16 sps:$4 sm:$0xff]   ;;  %v7665_v6 = vld [vmem:[%s11335_s1 + $0xd24] ss:$16 sps:$4 sm:$0xff]  }
  0xbd   :  { %5147 = vmatprep.subr.bf16.mxu1 %v7572_v7  ;;  %v7668_v7 = vld [vmem:[%s11335_s1 + $0xf24] ss:$16 sps:$4 sm:$0xff]  }
  0xbf   :  { %5105 = vmatpush2.bf16.msra.mxu0 %v7567_v8  ;;  %v7663_v8 = vld [vmem:[%s11335_s1 + $0xd20] ss:$16 sps:$4 sm:$0xff]  }
  0xc0   :  { %5148 = vmatpush2.bf16.msra.mxu1 %v7570_v9  ;;  %5160 = vmatprep.subr.bf16.mxu0 %v7581_v10  ;;  %v7666_v9 = vld [vmem:[%s11335_s1 + $0xf20] ss:$16 sps:$4 sm:$0xff]   ;;  %v7671_v10 = vld [vmem:[%s11335_s1 + $0xd04] ss:$16 sps:$4 sm:$0xff]  }
  0xc1   :  { %5203 = vmatprep.subr.bf16.mxu1 %v7584_v11  ;;  %v7674_v11 = vld [vmem:[%s11335_s1 + $0xf04] ss:$16 sps:$4 sm:$0xff]  }
  0xc2   :  { %5107 = vmatmul.mubr.bf16.vlgmr.msra.gmra.mxu0 %v7573_v12  ;;  %v7669_v12 = vld [vmem:[%s11335_s1 + $0xd00] ss:$16 sps:$4 sm:$0xff]  }
  0xc3   :  { %5150 = vmatmul.mubr.bf16.vlgmr.msra.gmra.mxu1 %v7576_v13  ;;  %5161 = vmatpush1.bf16.msra.mxu0 %v7579_v14  ;;  %v7672_v13 = vld [vmem:[%s11335_s1 + $0xf00] ss:$16 sps:$4 sm:$0xff]   ;;  %v7683_v14 = vld [vmem:[%s11335_s1 + $0x10e4] ss:$16 sps:$4 sm:$0xff]  }
  0xc4   :  { %5204 = vmatpush1.bf16.msra.mxu1 %v7582_v15  ;;  %5162 = vmatprep.subr.bf16.mxu0 %v7587_v16  ;;  %v7686_v15 = vld [vmem:[%s11335_s1 + $0x12e4] ss:$16 sps:$4 sm:$0xff]  }
  0xc5   :  { %5205 = vmatprep.subr.bf16.mxu1 %v7590_v17  ;;  %5192 = vmatprep.mubr.bf16.mxu0 %v7677_v18  ;;  %v7675_v16 = vld [vmem:[%s11336_s0 + $0x30] ss:$100 sps:$4 sm:$0xff]   ;;  %v7678_v17 = vld [vmem:[%s11336_s0 + $0x38] ss:$100 sps:$4 sm:$0xff]  }
  0xc6   :  { %5235 = vmatprep.mubr.bf16.mxu1 %v7680_v19  ;;  %v7681_v18 = vld [vmem:[%s11335_s1 + $0x10e0] ss:$16 sps:$4 sm:$0xff]  }
  0xc7   :  { %5163 = vmatpush1.bf16.msra.mxu0 %v7585_v20  ;;  %v7684_v19 = vld [vmem:[%s11335_s1 + $0x12e0] ss:$16 sps:$4 sm:$0xff]   ;;  %v7689_v20 = vld [vmem:[%s11335_s1 + $0x10c4] ss:$16 sps:$4 sm:$0xff]  }
  0xc8   :  { %5206 = vmatpush1.bf16.msra.mxu1 %v7588_v21  ;;  %5164 = vmatprep.subr.bf16.mxu0 %v7593_v22  ;;  %v7692_v21 = vld [vmem:[%s11335_s1 + $0x12c4] ss:$16 sps:$4 sm:$0xff]  }
  0xc9   :  { %5207 = vmatprep.subr.bf16.mxu1 %v7596_v23  ;;  %v7779_v22 = vld [vmem:[%s11336_s0 + $0x44] ss:$100 sps:$4 sm:$0xff]   ;;  %v7782_v23 = vld [vmem:[%s11336_s0 + $0x4c] ss:$100 sps:$4 sm:$0xff]  }
  0xcb   :  { %5165 = vmatpush1.bf16.msra.mxu0 %v7591_v24  ;;  %v7687_v24 = vld [vmem:[%s11335_s1 + $0x10c0] ss:$16 sps:$4 sm:$0xff]  }
  0xcc   :  { %5208 = vmatpush1.bf16.msra.mxu1 %v7594_v25  ;;  %5166 = vmatprep.subr.bf16.mxu0 %v7599_v26  ;;  %v7690_v25 = vld [vmem:[%s11335_s1 + $0x12c0] ss:$16 sps:$4 sm:$0xff]   ;;  %v7695_v26 = vld [vmem:[%s11335_s1 + $0x10a4] ss:$16 sps:$4 sm:$0xff]  }
  0xcd   :  { %5209 = vmatprep.subr.bf16.mxu1 %v7602_v27  ;;  %v7698_v27 = vld [vmem:[%s11335_s1 + $0x12a4] ss:$16 sps:$4 sm:$0xff]  }
  0xcf   :  { %5167 = vmatpush1.bf16.msra.mxu0 %v7597_v28  ;;  %v7693_v28 = vld [vmem:[%s11335_s1 + $0x10a0] ss:$16 sps:$4 sm:$0xff]  }
  0xd0   :  { %5210 = vmatpush1.bf16.msra.mxu1 %v7600_v29  ;;  %5168 = vmatprep.subr.bf16.mxu0 %v7605_v30  ;;  %v7696_v29 = vld [vmem:[%s11335_s1 + $0x12a0] ss:$16 sps:$4 sm:$0xff]   ;;  %v7701_v30 = vld [vmem:[%s11335_s1 + $0x1084] ss:$16 sps:$4 sm:$0xff]  }
  0xd1   :  { %5211 = vmatprep.subr.bf16.mxu1 %v7608_v31  ;;  %v7704_v31 = vld [vmem:[%s11335_s1 + $0x1284] ss:$16 sps:$4 sm:$0xff]  }
  0xd3   :  { %5169 = vmatpush1.bf16.msra.mxu0 %v7603_v32  ;;  %v7699_v32 = vld [vmem:[%s11335_s1 + $0x1080] ss:$16 sps:$4 sm:$0xff]  }
  0xd4   :  { %5212 = vmatpush1.bf16.msra.mxu1 %v7606_v33  ;;  %5170 = vmatprep.subr.bf16.mxu0 %v7611_v34  ;;  %v7702_v33 = vld [vmem:[%s11335_s1 + $0x1280] ss:$16 sps:$4 sm:$0xff]   ;;  %v7707_v34 = vld [vmem:[%s11335_s1 + $0x1064] ss:$16 sps:$4 sm:$0xff]  }
  0xd5   :  { %5213 = vmatprep.subr.bf16.mxu1 %v7614_v35  ;;  %v7710_v35 = vld [vmem:[%s11335_s1 + $0x1264] ss:$16 sps:$4 sm:$0xff]  }
  0xd7   :  { %5171 = vmatpush1.bf16.msra.mxu0 %v7609_v36  ;;  %v7705_v36 = vld [vmem:[%s11335_s1 + $0x1060] ss:$16 sps:$4 sm:$0xff]  }
  0xd8   :  { %5214 = vmatpush1.bf16.msra.mxu1 %v7612_v37  ;;  %5172 = vmatprep.subr.bf16.mxu0 %v7617_v38  ;;  %v7708_v37 = vld [vmem:[%s11335_s1 + $0x1260] ss:$16 sps:$4 sm:$0xff]   ;;  %v7713_v38 = vld [vmem:[%s11335_s1 + $0x1044] ss:$16 sps:$4 sm:$0xff]  }
  0xd9   :  { %5215 = vmatprep.subr.bf16.mxu1 %v7620_v39  ;;  %v7716_v39 = vld [vmem:[%s11335_s1 + $0x1244] ss:$16 sps:$4 sm:$0xff]  }
  0xdb   :  { %5173 = vmatpush1.bf16.msra.mxu0 %v7615_v40  ;;  %v7711_v40 = vld [vmem:[%s11335_s1 + $0x1040] ss:$16 sps:$4 sm:$0xff]  }
  0xdc   :  { %5216 = vmatpush1.bf16.msra.mxu1 %v7618_v41  ;;  %5174 = vmatprep.subr.bf16.mxu0 %v7623_v42  ;;  %v7714_v41 = vld [vmem:[%s11335_s1 + $0x1240] ss:$16 sps:$4 sm:$0xff]   ;;  %v7719_v42 = vld [vmem:[%s11335_s1 + $0x1024] ss:$16 sps:$4 sm:$0xff]  }
  0xdd   :  { %5217 = vmatprep.subr.bf16.mxu1 %v7626_v43  ;;  %v7722_v43 = vld [vmem:[%s11335_s1 + $0x1224] ss:$16 sps:$4 sm:$0xff]  }
  0xdf   :  { %5175 = vmatpush1.bf16.msra.mxu0 %v7621_v44  ;;  %v7717_v44 = vld [vmem:[%s11335_s1 + $0x1020] ss:$16 sps:$4 sm:$0xff]  }
  0xe0   :  { %5218 = vmatpush1.bf16.msra.mxu1 %v7624_v45  ;;  %5176 = vmatprep.subr.bf16.mxu0 %v7629_v46  ;;  %v7720_v45 = vld [vmem:[%s11335_s1 + $0x1220] ss:$16 sps:$4 sm:$0xff]   ;;  %v7725_v46 = vld [vmem:[%s11335_s1 + $0x1004] ss:$16 sps:$4 sm:$0xff]  }
  0xe1   :  { %5219 = vmatprep.subr.bf16.mxu1 %v7632_v47  ;;  %v7728_v47 = vld [vmem:[%s11335_s1 + $0x1204] ss:$16 sps:$4 sm:$0xff]  }
  0xe3   :  { %5177 = vmatpush2.bf16.msra.mxu0 %v7627_v48  ;;  %v7723_v48 = vld [vmem:[%s11335_s1 + $0x1000] ss:$16 sps:$4 sm:$0xff]  }
  0xe4   :  { %5220 = vmatpush2.bf16.msra.mxu1 %v7630_v49  ;;  %5178 = vmatprep.subr.bf16.mxu0 %v7635_v50  ;;  %v7726_v49 = vld [vmem:[%s11335_s1 + $0x1200] ss:$16 sps:$4 sm:$0xff]   ;;  %v7731_v50 = vld [vmem:[%s11335_s1 + $0x11e4] ss:$16 sps:$4 sm:$0xff]  }
  0xe5   :  { %5221 = vmatprep.subr.bf16.mxu1 %v7638_v51  ;;  %v7734_v51 = vld [vmem:[%s11335_s1 + $0x13e4] ss:$16 sps:$4 sm:$0xff]  }
  0xe7   :  { %5179 = vmatpush2.bf16.msra.mxu0 %v7633_v52  ;;  %v7729_v52 = vld [vmem:[%s11335_s1 + $0x11e0] ss:$16 sps:$4 sm:$0xff]  }
  0xe8   :  { %5222 = vmatpush2.bf16.msra.mxu1 %v7636_v53  ;;  %5180 = vmatprep.subr.bf16.mxu0 %v7641_v54  ;;  %v7732_v53 = vld [vmem:[%s11335_s1 + $0x13e0] ss:$16 sps:$4 sm:$0xff]   ;;  %v7737_v54 = vld [vmem:[%s11335_s1 + $0x11c4] ss:$16 sps:$4 sm:$0xff]  }
  0xe9   :  { %5223 = vmatprep.subr.bf16.mxu1 %v7644_v55  ;;  %v7740_v55 = vld [vmem:[%s11335_s1 + $0x13c4] ss:$16 sps:$4 sm:$0xff]  }
  0xeb   :  { %5181 = vmatpush2.bf16.msra.mxu0 %v7639_v56  ;;  %v7735_v56 = vld [vmem:[%s11335_s1 + $0x11c0] ss:$16 sps:$4 sm:$0xff]  }
  0xec   :  { %5224 = vmatpush2.bf16.msra.mxu1 %v7642_v57  ;;  %5182 = vmatprep.subr.bf16.mxu0 %v7647_v58  ;;  %v7738_v57 = vld [vmem:[%s11335_s1 + $0x13c0] ss:$16 sps:$4 sm:$0xff]   ;;  %v7743_v58 = vld [vmem:[%s11335_s1 + $0x11a4] ss:$16 sps:$4 sm:$0xff]  }
  0xed   :  { %5225 = vmatprep.subr.bf16.mxu1 %v7650_v59  ;;  %v7746_v59 = vld [vmem:[%s11335_s1 + $0x13a4] ss:$16 sps:$4 sm:$0xff]  }
  0xef   :  { %5183 = vmatpush2.bf16.msra.mxu0 %v7645_v60  ;;  %v7741_v60 = vld [vmem:[%s11335_s1 + $0x11a0] ss:$16 sps:$4 sm:$0xff]  }
  0xf0   :  { %5226 = vmatpush2.bf16.msra.mxu1 %v7648_v61  ;;  %5184 = vmatprep.subr.bf16.mxu0 %v7653_v62  ;;  %v7744_v61 = vld [vmem:[%s11335_s1 + $0x13a0] ss:$16 sps:$4 sm:$0xff]   ;;  %v7749_v62 = vld [vmem:[%s11335_s1 + $0x1184] ss:$16 sps:$4 sm:$0xff]  }
  0xf1   :  { %5227 = vmatprep.subr.bf16.mxu1 %v7656_v63  ;;  %v7752_v63 = vld [vmem:[%s11335_s1 + $0x1384] ss:$16 sps:$4 sm:$0xff]  }
  0xf3   :  { %5185 = vmatpush2.bf16.msra.mxu0 %v7651_v0  ;;  %v7747_v0 = vld [vmem:[%s11335_s1 + $0x1180] ss:$16 sps:$4 sm:$0xff]  }
  0xf4   :  { %5228 = vmatpush2.bf16.msra.mxu1 %v7654_v1  ;;  %5186 = vmatprep.subr.bf16.mxu0 %v7659_v2  ;;  %v7750_v1 = vld [vmem:[%s11335_s1 + $0x1380] ss:$16 sps:$4 sm:$0xff]   ;;  %v7755_v2 = vld [vmem:[%s11335_s1 + $0x1164] ss:$16 sps:$4 sm:$0xff]  }
  0xf5   :  { %5229 = vmatprep.subr.bf16.mxu1 %v7662_v3  ;;  %v7758_v3 = vld [vmem:[%s11335_s1 + $0x1364] ss:$16 sps:$4 sm:$0xff]  }
  0xf7   :  { %5187 = vmatpush2.bf16.msra.mxu0 %v7657_v4  ;;  %v7753_v4 = vld [vmem:[%s11335_s1 + $0x1160] ss:$16 sps:$4 sm:$0xff]  }
  0xf8   :  { %5230 = vmatpush2.bf16.msra.mxu1 %v7660_v5  ;;  %5188 = vmatprep.subr.bf16.mxu0 %v7665_v6  ;;  %v7756_v5 = vld [vmem:[%s11335_s1 + $0x1360] ss:$16 sps:$4 sm:$0xff]   ;;  %v7761_v6 = vld [vmem:[%s11335_s1 + $0x1144] ss:$16 sps:$4 sm:$0xff]  }
  0xf9   :  { %5231 = vmatprep.subr.bf16.mxu1 %v7668_v7  ;;  %v7764_v7 = vld [vmem:[%s11335_s1 + $0x1344] ss:$16 sps:$4 sm:$0xff]  }
  0xfb   :  { %5189 = vmatpush2.bf16.msra.mxu0 %v7663_v8  ;;  %v7759_v8 = vld [vmem:[%s11335_s1 + $0x1140] ss:$16 sps:$4 sm:$0xff]  }
  0xfc   :  { %5232 = vmatpush2.bf16.msra.mxu1 %v7666_v9  ;;  %5190 = vmatprep.subr.bf16.mxu0 %v7671_v10  ;;  %v7762_v9 = vld [vmem:[%s11335_s1 + $0x1340] ss:$16 sps:$4 sm:$0xff]   ;;  %v7767_v10 = vld [vmem:[%s11335_s1 + $0x1124] ss:$16 sps:$4 sm:$0xff]  }
  0xfd   :  { %5233 = vmatprep.subr.bf16.mxu1 %v7674_v11  ;;  %v7770_v11 = vld [vmem:[%s11335_s1 + $0x1324] ss:$16 sps:$4 sm:$0xff]  }
  0xff   :  { %5191 = vmatpush2.bf16.msra.mxu0 %v7669_v12  ;;  %v7765_v12 = vld [vmem:[%s11335_s1 + $0x1120] ss:$16 sps:$4 sm:$0xff]  }
 0x100   :  { %5234 = vmatpush2.bf16.msra.mxu1 %v7672_v13  ;;  %5246 = vmatprep.subr.bf16.mxu0 %v7683_v14  ;;  %v7768_v13 = vld [vmem:[%s11335_s1 + $0x1320] ss:$16 sps:$4 sm:$0xff]   ;;  %v7773_v14 = vld [vmem:[%s11335_s1 + $0x1104] ss:$16 sps:$4 sm:$0xff]  }
 0x101   :  { %5289 = vmatprep.subr.bf16.mxu1 %v7686_v15  ;;  %v7776_v15 = vld [vmem:[%s11335_s1 + $0x1304] ss:$16 sps:$4 sm:$0xff]  }
 0x102   :  { %5193 = vmatmul.mubr.bf16.vlgmr.msra.gmra.mxu0 %v7675_v16  ;;  %v7771_v16 = vld [vmem:[%s11335_s1 + $0x1100] ss:$16 sps:$4 sm:$0xff]  }
 0x103   :  { %5236 = vmatmul.mubr.bf16.vlgmr.msra.gmra.mxu1 %v7678_v17  ;;  %5247 = vmatpush1.bf16.msra.mxu0 %v7681_v18  ;;  %v7774_v17 = vld [vmem:[%s11335_s1 + $0x1300] ss:$16 sps:$4 sm:$0xff]  }
 0x104   :  { %5290 = vmatpush1.bf16.msra.mxu1 %v7684_v19  ;;  %5248 = vmatprep.subr.bf16.mxu0 %v7689_v20  ;;  %v7777_v18 = vld [vmem:[%s11336_s0 + $0x40] ss:$100 sps:$4 sm:$0xff]   ;;  %v7780_v19 = vld [vmem:[%s11336_s0 + $0x48] ss:$100 sps:$4 sm:$0xff]  }
 0x105   :  { %5291 = vmatprep.subr.bf16.mxu1 %v7692_v21  ;;  %5278 = vmatprep.mubr.bf16.mxu0 %v7779_v22  ;;  %v7785_v20 = vld [vmem:[%s11335_s1 + $0x14e4] ss:$16 sps:$4 sm:$0xff]   ;;  %v7783_v22 = vld [vmem:[%s11335_s1 + $0x14e0] ss:$16 sps:$4 sm:$0xff]  }
 0x106   :  { %5321 = vmatprep.mubr.bf16.mxu1 %v7782_v23  ;;  %v7788_v21 = vld [vmem:[%s11335_s1 + $0x16e4] ss:$16 sps:$4 sm:$0xff]   ;;  %v7786_v23 = vld [vmem:[%s11335_s1 + $0x16e0] ss:$16 sps:$4 sm:$0xff]  }
 0x107   :  { %5249 = vmatpush1.bf16.msra.mxu0 %v7687_v24  ;;  %v7791_v24 = vld [vmem:[%s11335_s1 + $0x14c4] ss:$16 sps:$4 sm:$0xff]  }
 0x108   :  { %5292 = vmatpush1.bf16.msra.mxu1 %v7690_v25  ;;  %5250 = vmatprep.subr.bf16.mxu0 %v7695_v26  ;;  %v7794_v25 = vld [vmem:[%s11335_s1 + $0x16c4] ss:$16 sps:$4 sm:$0xff]   ;;  %v7789_v26 = vld [vmem:[%s11335_s1 + $0x14c0] ss:$16 sps:$4 sm:$0xff]  }
 0x109   :  { %5293 = vmatprep.subr.bf16.mxu1 %v7698_v27  ;;  %v7792_v27 = vld [vmem:[%s11335_s1 + $0x16c0] ss:$16 sps:$4 sm:$0xff]  }
 0x10b   :  { %5251 = vmatpush1.bf16.msra.mxu0 %v7693_v28  ;;  %v7881_v28 = vld [vmem:[%s11336_s0 + $0x54] ss:$100 sps:$4 sm:$0xff]  }
 0x10c   :  { %5294 = vmatpush1.bf16.msra.mxu1 %v7696_v29  ;;  %5252 = vmatprep.subr.bf16.mxu0 %v7701_v30  ;;  %v7884_v29 = vld [vmem:[%s11336_s0 + $0x5c] ss:$100 sps:$4 sm:$0xff]   ;;  %v7797_v30 = vld [vmem:[%s11335_s1 + $0x14a4] ss:$16 sps:$4 sm:$0xff]  }
 0x10d   :  { %5295 = vmatprep.subr.bf16.mxu1 %v7704_v31  ;;  %v7800_v31 = vld [vmem:[%s11335_s1 + $0x16a4] ss:$16 sps:$4 sm:$0xff]  }
 0x10f   :  { %5253 = vmatpush1.bf16.msra.mxu0 %v7699_v32  ;;  %v7795_v32 = vld [vmem:[%s11335_s1 + $0x14a0] ss:$16 sps:$4 sm:$0xff]  }
 0x110   :  { %5296 = vmatpush1.bf16.msra.mxu1 %v7702_v33  ;;  %5254 = vmatprep.subr.bf16.mxu0 %v7707_v34  ;;  %v7798_v33 = vld [vmem:[%s11335_s1 + $0x16a0] ss:$16 sps:$4 sm:$0xff]   ;;  %v7803_v34 = vld [vmem:[%s11335_s1 + $0x1484] ss:$16 sps:$4 sm:$0xff]  }
 0x111   :  { %5297 = vmatprep.subr.bf16.mxu1 %v7710_v35  ;;  %v7806_v35 = vld [vmem:[%s11335_s1 + $0x1684] ss:$16 sps:$4 sm:$0xff]  }
 0x113   :  { %5255 = vmatpush1.bf16.msra.mxu0 %v7705_v36  ;;  %v7801_v36 = vld [vmem:[%s11335_s1 + $0x1480] ss:$16 sps:$4 sm:$0xff]  }
 0x114   :  { %5298 = vmatpush1.bf16.msra.mxu1 %v7708_v37  ;;  %5256 = vmatprep.subr.bf16.mxu0 %v7713_v38  ;;  %v7804_v37 = vld [vmem:[%s11335_s1 + $0x1680] ss:$16 sps:$4 sm:$0xff]   ;;  %v7809_v38 = vld [vmem:[%s11335_s1 + $0x1464] ss:$16 sps:$4 sm:$0xff]  }
 0x115   :  { %5299 = vmatprep.subr.bf16.mxu1 %v7716_v39  ;;  %v7812_v39 = vld [vmem:[%s11335_s1 + $0x1664] ss:$16 sps:$4 sm:$0xff]  }
 0x117   :  { %5257 = vmatpush1.bf16.msra.mxu0 %v7711_v40  ;;  %v7807_v40 = vld [vmem:[%s11335_s1 + $0x1460] ss:$16 sps:$4 sm:$0xff]  }
 0x118   :  { %5300 = vmatpush1.bf16.msra.mxu1 %v7714_v41  ;;  %5258 = vmatprep.subr.bf16.mxu0 %v7719_v42  ;;  %v7810_v41 = vld [vmem:[%s11335_s1 + $0x1660] ss:$16 sps:$4 sm:$0xff]   ;;  %v7815_v42 = vld [vmem:[%s11335_s1 + $0x1444] ss:$16 sps:$4 sm:$0xff]  }
 0x119   :  { %5301 = vmatprep.subr.bf16.mxu1 %v7722_v43  ;;  %v7818_v43 = vld [vmem:[%s11335_s1 + $0x1644] ss:$16 sps:$4 sm:$0xff]  }
 0x11b   :  { %5259 = vmatpush1.bf16.msra.mxu0 %v7717_v44  ;;  %v7813_v44 = vld [vmem:[%s11335_s1 + $0x1440] ss:$16 sps:$4 sm:$0xff]  }
 0x11c   :  { %5302 = vmatpush1.bf16.msra.mxu1 %v7720_v45  ;;  %5260 = vmatprep.subr.bf16.mxu0 %v7725_v46  ;;  %v7816_v45 = vld [vmem:[%s11335_s1 + $0x1640] ss:$16 sps:$4 sm:$0xff]   ;;  %v7821_v46 = vld [vmem:[%s11335_s1 + $0x1424] ss:$16 sps:$4 sm:$0xff]  }
 0x11d   :  { %5303 = vmatprep.subr.bf16.mxu1 %v7728_v47  ;;  %v7824_v47 = vld [vmem:[%s11335_s1 + $0x1624] ss:$16 sps:$4 sm:$0xff]  }
 0x11f   :  { %5261 = vmatpush1.bf16.msra.mxu0 %v7723_v48  ;;  %v7819_v48 = vld [vmem:[%s11335_s1 + $0x1420] ss:$16 sps:$4 sm:$0xff]  }
 0x120   :  { %5304 = vmatpush1.bf16.msra.mxu1 %v7726_v49  ;;  %5262 = vmatprep.subr.bf16.mxu0 %v7731_v50  ;;  %v7822_v49 = vld [vmem:[%s11335_s1 + $0x1620] ss:$16 sps:$4 sm:$0xff]   ;;  %v7827_v50 = vld [vmem:[%s11335_s1 + $0x1404] ss:$16 sps:$4 sm:$0xff]  }
 0x121   :  { %5305 = vmatprep.subr.bf16.mxu1 %v7734_v51  ;;  %v7830_v51 = vld [vmem:[%s11335_s1 + $0x1604] ss:$16 sps:$4 sm:$0xff]  }
 0x123   :  { %5263 = vmatpush2.bf16.msra.mxu0 %v7729_v52  ;;  %v7825_v52 = vld [vmem:[%s11335_s1 + $0x1400] ss:$16 sps:$4 sm:$0xff]  }
 0x124   :  { %5306 = vmatpush2.bf16.msra.mxu1 %v7732_v53  ;;  %5264 = vmatprep.subr.bf16.mxu0 %v7737_v54  ;;  %v7828_v53 = vld [vmem:[%s11335_s1 + $0x1600] ss:$16 sps:$4 sm:$0xff]   ;;  %v7833_v54 = vld [vmem:[%s11335_s1 + $0x15e4] ss:$16 sps:$4 sm:$0xff]  }
 0x125   :  { %5307 = vmatprep.subr.bf16.mxu1 %v7740_v55  ;;  %v7836_v55 = vld [vmem:[%s11335_s1 + $0x17e4] ss:$16 sps:$4 sm:$0xff]  }
 0x127   :  { %5265 = vmatpush2.bf16.msra.mxu0 %v7735_v56  ;;  %v7831_v56 = vld [vmem:[%s11335_s1 + $0x15e0] ss:$16 sps:$4 sm:$0xff]  }
 0x128   :  { %5308 = vmatpush2.bf16.msra.mxu1 %v7738_v57  ;;  %5266 = vmatprep.subr.bf16.mxu0 %v7743_v58  ;;  %v7834_v57 = vld [vmem:[%s11335_s1 + $0x17e0] ss:$16 sps:$4 sm:$0xff]   ;;  %v7839_v58 = vld [vmem:[%s11335_s1 + $0x15c4] ss:$16 sps:$4 sm:$0xff]  }
 0x129   :  { %5309 = vmatprep.subr.bf16.mxu1 %v7746_v59  ;;  %v7842_v59 = vld [vmem:[%s11335_s1 + $0x17c4] ss:$16 sps:$4 sm:$0xff]  }
 0x12b   :  { %5267 = vmatpush2.bf16.msra.mxu0 %v7741_v60  ;;  %v7837_v60 = vld [vmem:[%s11335_s1 + $0x15c0] ss:$16 sps:$4 sm:$0xff]  }
 0x12c   :  { %5310 = vmatpush2.bf16.msra.mxu1 %v7744_v61  ;;  %5268 = vmatprep.subr.bf16.mxu0 %v7749_v62  ;;  %v7840_v61 = vld [vmem:[%s11335_s1 + $0x17c0] ss:$16 sps:$4 sm:$0xff]   ;;  %v7845_v62 = vld [vmem:[%s11335_s1 + $0x15a4] ss:$16 sps:$4 sm:$0xff]  }
 0x12d   :  { %5311 = vmatprep.subr.bf16.mxu1 %v7752_v63  ;;  %v7848_v63 = vld [vmem:[%s11335_s1 + $0x17a4] ss:$16 sps:$4 sm:$0xff]  }
 0x12f   :  { %5269 = vmatpush2.bf16.msra.mxu0 %v7747_v0  ;;  %v7843_v0 = vld [vmem:[%s11335_s1 + $0x15a0] ss:$16 sps:$4 sm:$0xff]  }
 0x130   :  { %5312 = vmatpush2.bf16.msra.mxu1 %v7750_v1  ;;  %5270 = vmatprep.subr.bf16.mxu0 %v7755_v2  ;;  %v7846_v1 = vld [vmem:[%s11335_s1 + $0x17a0] ss:$16 sps:$4 sm:$0xff]   ;;  %v7851_v2 = vld [vmem:[%s11335_s1 + $0x1584] ss:$16 sps:$4 sm:$0xff]  }
 0x131   :  { %5313 = vmatprep.subr.bf16.mxu1 %v7758_v3  ;;  %v7854_v3 = vld [vmem:[%s11335_s1 + $0x1784] ss:$16 sps:$4 sm:$0xff]  }
 0x133   :  { %5271 = vmatpush2.bf16.msra.mxu0 %v7753_v4  ;;  %v7849_v4 = vld [vmem:[%s11335_s1 + $0x1580] ss:$16 sps:$4 sm:$0xff]  }
 0x134   :  { %5314 = vmatpush2.bf16.msra.mxu1 %v7756_v5  ;;  %5272 = vmatprep.subr.bf16.mxu0 %v7761_v6  ;;  %v7852_v5 = vld [vmem:[%s11335_s1 + $0x1780] ss:$16 sps:$4 sm:$0xff]   ;;  %v7857_v6 = vld [vmem:[%s11335_s1 + $0x1564] ss:$16 sps:$4 sm:$0xff]  }
 0x135   :  { %5315 = vmatprep.subr.bf16.mxu1 %v7764_v7  ;;  %v7860_v7 = vld [vmem:[%s11335_s1 + $0x1764] ss:$16 sps:$4 sm:$0xff]  }
 0x137   :  { %5273 = vmatpush2.bf16.msra.mxu0 %v7759_v8  ;;  %v7855_v8 = vld [vmem:[%s11335_s1 + $0x1560] ss:$16 sps:$4 sm:$0xff]  }
 0x138   :  { %5316 = vmatpush2.bf16.msra.mxu1 %v7762_v9  ;;  %5274 = vmatprep.subr.bf16.mxu0 %v7767_v10  ;;  %v7858_v9 = vld [vmem:[%s11335_s1 + $0x1760] ss:$16 sps:$4 sm:$0xff]   ;;  %v7863_v10 = vld [vmem:[%s11335_s1 + $0x1544] ss:$16 sps:$4 sm:$0xff]  }
 0x139   :  { %5317 = vmatprep.subr.bf16.mxu1 %v7770_v11  ;;  %v7866_v11 = vld [vmem:[%s11335_s1 + $0x1744] ss:$16 sps:$4 sm:$0xff]  }
 0x13b   :  { %5275 = vmatpush2.bf16.msra.mxu0 %v7765_v12  ;;  %v7861_v12 = vld [vmem:[%s11335_s1 + $0x1540] ss:$16 sps:$4 sm:$0xff]  }
 0x13c   :  { %5318 = vmatpush2.bf16.msra.mxu1 %v7768_v13  ;;  %5276 = vmatprep.subr.bf16.mxu0 %v7773_v14  ;;  %v7864_v13 = vld [vmem:[%s11335_s1 + $0x1740] ss:$16 sps:$4 sm:$0xff]   ;;  %v7869_v14 = vld [vmem:[%s11335_s1 + $0x1524] ss:$16 sps:$4 sm:$0xff]  }
 0x13d   :  { %5319 = vmatprep.subr.bf16.mxu1 %v7776_v15  ;;  %v7872_v15 = vld [vmem:[%s11335_s1 + $0x1724] ss:$16 sps:$4 sm:$0xff]  }
 0x13f   :  { %5277 = vmatpush2.bf16.msra.mxu0 %v7771_v16  ;;  %v7867_v16 = vld [vmem:[%s11335_s1 + $0x1520] ss:$16 sps:$4 sm:$0xff]  }
 0x140   :  { %5320 = vmatpush2.bf16.msra.mxu1 %v7774_v17  ;;  %5332 = vmatprep.subr.bf16.mxu0 %v7785_v20  ;;  %v7870_v17 = vld [vmem:[%s11335_s1 + $0x1720] ss:$16 sps:$4 sm:$0xff]  }
 0x141   :  { %5375 = vmatprep.subr.bf16.mxu1 %v7788_v21  ;;  %v7873_v20 = vld [vmem:[%s11335_s1 + $0x1500] ss:$16 sps:$4 sm:$0xff]  }
 0x142   :  { %5279 = vmatmul.mubr.bf16.vlgmr.msra.gmra.mxu0 %v7777_v18  ;;  %v7875_v18 = vld [vmem:[%s11335_s1 + $0x1504] ss:$16 sps:$4 sm:$0xff]   ;;  %v7876_v21 = vld [vmem:[%s11335_s1 + $0x1700] ss:$16 sps:$4 sm:$0xff]  }
 0x143   :  { %5322 = vmatmul.mubr.bf16.vlgmr.msra.gmra.mxu1 %v7780_v19  ;;  %5333 = vmatpush1.bf16.msra.mxu0 %v7783_v22  ;;  %v7878_v19 = vld [vmem:[%s11335_s1 + $0x1704] ss:$16 sps:$4 sm:$0xff]  }
 0x144   :  { %5376 = vmatpush1.bf16.msra.mxu1 %v7786_v23  ;;  %5334 = vmatprep.subr.bf16.mxu0 %v7791_v24  ;;  %v7879_v22 = vld [vmem:[%s11336_s0 + $0x50] ss:$100 sps:$4 sm:$0xff]   ;;  %v7882_v23 = vld [vmem:[%s11336_s0 + $0x58] ss:$100 sps:$4 sm:$0xff]  }
 0x145   :  { %5377 = vmatprep.subr.bf16.mxu1 %v7794_v25  ;;  %5364 = vmatprep.mubr.bf16.mxu0 %v7881_v28  ;;  %v7887_v24 = vld [vmem:[%s11335_s1 + $0x1864] ss:$16 sps:$4 sm:$0xff]   ;;  %v7890_v25 = vld [vmem:[%s11335_s1 + $0xec] ss:$16 sps:$4 sm:$0xff]  }
 0x146   :  { %5407 = vmatprep.mubr.bf16.mxu1 %v7884_v29  ;;  %v7893_v28 = vld [vmem:[%s11335_s1 + $0x1844] ss:$16 sps:$4 sm:$0xff]   ;;  %v7896_v29 = vld [vmem:[%s11335_s1 + $0xcc] ss:$16 sps:$4 sm:$0xff]  }
 0x147   :  { %5335 = vmatpush1.bf16.msra.mxu0 %v7789_v26  ;;  %v7885_v26 = vld [vmem:[%s11335_s1 + $0x1860] ss:$16 sps:$4 sm:$0xff]  }
 0x148   :  { %5378 = vmatpush1.bf16.msra.mxu1 %v7792_v27  ;;  %5336 = vmatprep.subr.bf16.mxu0 %v7797_v30  ;;  %v7888_v27 = vld [vmem:[%s11335_s1 + $0xe8] ss:$16 sps:$4 sm:$0xff]   ;;  %v7891_v30 = vld [vmem:[%s11335_s1 + $0x1840] ss:$16 sps:$4 sm:$0xff]  }
 0x149   :  { %5379 = vmatprep.subr.bf16.mxu1 %v7800_v31  ;;  %v7894_v31 = vld [vmem:[%s11335_s1 + $0xc8] ss:$16 sps:$4 sm:$0xff]  }
 0x14b   :  { %5337 = vmatpush1.bf16.msra.mxu0 %v7795_v32  ;;  %v7899_v32 = vld [vmem:[%s11335_s1 + $0x1824] ss:$16 sps:$4 sm:$0xff]  }
 0x14c   :  { %5380 = vmatpush1.bf16.msra.mxu1 %v7798_v33  ;;  %5338 = vmatprep.subr.bf16.mxu0 %v7803_v34  ;;  %v7902_v33 = vld [vmem:[%s11335_s1 + $0xac] ss:$16 sps:$4 sm:$0xff]   ;;  %v7897_v34 = vld [vmem:[%s11335_s1 + $0x1820] ss:$16 sps:$4 sm:$0xff]  }
 0x14d   :  { %5381 = vmatprep.subr.bf16.mxu1 %v7806_v35  ;;  %v7900_v35 = vld [vmem:[%s11335_s1 + $0xa8] ss:$16 sps:$4 sm:$0xff]  }
 0x14f   :  { %5339 = vmatpush1.bf16.msra.mxu0 %v7801_v36  ;;  %v8543_v36 = vmov 0  }
 0x150   :  { %5382 = vmatpush1.bf16.msra.mxu1 %v7804_v37  ;;  %5340 = vmatprep.subr.bf16.mxu0 %v7809_v38  ;;  %v8518_v37 = vld [vmem:[%s11336_s0 + $0x4] ss:$100 sps:$4 sm:$0xff]  }
 0x151   :  { %5383 = vmatprep.subr.bf16.mxu1 %v7812_v39  ;;  %v7905_v38 = vld [vmem:[%s11335_s1 + $0x1804] ss:$16 sps:$4 sm:$0xff]   ;;  %v7908_v39 = vld [vmem:[%s11335_s1 + $0x8c] ss:$16 sps:$4 sm:$0xff]  }
 0x153   :  { %5341 = vmatpush1.bf16.msra.mxu0 %v7807_v40  ;;  %v7903_v40 = vld [vmem:[%s11335_s1 + $0x1800] ss:$16 sps:$4 sm:$0xff]  }
 0x154   :  { %5384 = vmatpush1.bf16.msra.mxu1 %v7810_v41  ;;  %5342 = vmatprep.subr.bf16.mxu0 %v7815_v42  ;;  %v7906_v41 = vld [vmem:[%s11335_s1 + $0x88] ss:$16 sps:$4 sm:$0xff]   ;;  %v7909_v42 = vld [vmem:[%s11336_s0 + $0x60] ss:$100 sps:$4 sm:$0xff]  }
 0x155   :  { %5385 = vmatprep.subr.bf16.mxu1 %v7818_v43  ;;  %v7912_v43 = vld [vmem:[%s11335_s1 + $0x6c] ss:$16 sps:$4 sm:$0xff]  }
 0x157   :  { %5343 = vmatpush1.bf16.msra.mxu0 %v7813_v44  ;;  %v7915_v44 = vld [vmem:[%s11335_s1 + $0x2ec] ss:$16 sps:$4 sm:$0xff]  }
 0x158   :  { %5386 = vmatpush1.bf16.msra.mxu1 %v7816_v45  ;;  %5344 = vmatprep.subr.bf16.mxu0 %v7821_v46  ;;  %v7910_v45 = vld [vmem:[%s11335_s1 + $0x68] ss:$16 sps:$4 sm:$0xff]  }
 0x159   :  { %5387 = vmatprep.subr.bf16.mxu1 %v7824_v47  ;;  %v7913_v46 = vld [vmem:[%s11335_s1 + $0x2e8] ss:$16 sps:$4 sm:$0xff]   ;;  %v7918_v47 = vld [vmem:[%s11335_s1 + $0x4c] ss:$16 sps:$4 sm:$0xff]  }
 0x15b   :  { %5345 = vmatpush1.bf16.msra.mxu0 %v7819_v48  ;;  %v7921_v48 = vld [vmem:[%s11335_s1 + $0x2cc] ss:$16 sps:$4 sm:$0xff]  }
 0x15c   :  { %5388 = vmatpush1.bf16.msra.mxu1 %v7822_v49  ;;  %5346 = vmatprep.subr.bf16.mxu0 %v7827_v50  ;;  %v7916_v49 = vld [vmem:[%s11335_s1 + $0x48] ss:$16 sps:$4 sm:$0xff]  }
 0x15d   :  { %5389 = vmatprep.subr.bf16.mxu1 %v7830_v51  ;;  %v7919_v50 = vld [vmem:[%s11335_s1 + $0x2c8] ss:$16 sps:$4 sm:$0xff]   ;;  %v7924_v51 = vld [vmem:[%s11335_s1 + $0x2c] ss:$16 sps:$4 sm:$0xff]  }
 0x15f   :  { %5347 = vmatpush1.bf16.msra.mxu0 %v7825_v52  ;;  %v7927_v52 = vld [vmem:[%s11335_s1 + $0x2ac] ss:$16 sps:$4 sm:$0xff]  }
 0x160   :  { %5390 = vmatpush1.bf16.msra.mxu1 %v7828_v53  ;;  %5348 = vmatprep.subr.bf16.mxu0 %v7833_v54  ;;  %v8519_v53 = vld [vmem:[%s11336_s0 + $0xc] ss:$100 sps:$4 sm:$0xff]   ;;  %v7922_v54 = vld [vmem:[%s11335_s1 + $0x28] ss:$16 sps:$4 sm:$0xff]  }
 0x161   :  { %5391 = vmatprep.subr.bf16.mxu1 %v7836_v55  ;;  %v7925_v55 = vld [vmem:[%s11335_s1 + $0x2a8] ss:$16 sps:$4 sm:$0xff]  }
 0x163   :  { %5349 = vmatpush2.bf16.msra.mxu0 %v7831_v56  ;;  %v7930_v56 = vld [vmem:[%s11335_s1 + $0xc] ss:$16 sps:$4 sm:$0xff]  }
 0x164   :  { %5392 = vmatpush2.bf16.msra.mxu1 %v7834_v57  ;;  %5350 = vmatprep.subr.bf16.mxu0 %v7839_v58  ;;  %v7933_v57 = vld [vmem:[%s11335_s1 + $0x28c] ss:$16 sps:$4 sm:$0xff]   ;;  %v7928_v58 = vld [vmem:[%s11335_s1 + $0x8] ss:$16 sps:$4 sm:$0xff]  }
 0x165   :  { %5393 = vmatprep.subr.bf16.mxu1 %v7842_v59  ;;  %v7931_v59 = vld [vmem:[%s11335_s1 + $0x288] ss:$16 sps:$4 sm:$0xff]  }
 0x167   :  { %5351 = vmatpush2.bf16.msra.mxu0 %v7837_v60  ;;  %v7936_v60 = vld [vmem:[%s11335_s1 + $0x1ec] ss:$16 sps:$4 sm:$0xff]  }
 0x168   :  { %5394 = vmatpush2.bf16.msra.mxu1 %v7840_v61  ;;  %5352 = vmatprep.subr.bf16.mxu0 %v7845_v62  ;;  %v7939_v61 = vld [vmem:[%s11335_s1 + $0x26c] ss:$16 sps:$4 sm:$0xff]   ;;  %v7934_v62 = vld [vmem:[%s11335_s1 + $0x1e8] ss:$16 sps:$4 sm:$0xff]  }
 0x169   :  { %5395 = vmatprep.subr.bf16.mxu1 %v7848_v63  ;;  %v7937_v63 = vld [vmem:[%s11335_s1 + $0x268] ss:$16 sps:$4 sm:$0xff]  }
 0x16b   :  { %5353 = vmatpush2.bf16.msra.mxu0 %v7843_v0  ;;  %v7942_v0 = vld [vmem:[%s11335_s1 + $0x1cc] ss:$16 sps:$4 sm:$0xff]  }
 0x16c   :  { %5396 = vmatpush2.bf16.msra.mxu1 %v7846_v1  ;;  %5354 = vmatprep.subr.bf16.mxu0 %v7851_v2  ;;  %v7945_v1 = vld [vmem:[%s11335_s1 + $0x24c] ss:$16 sps:$4 sm:$0xff]   ;;  %v7940_v2 = vld [vmem:[%s11335_s1 + $0x1c8] ss:$16 sps:$4 sm:$0xff]  }
 0x16d   :  { %5397 = vmatprep.subr.bf16.mxu1 %v7854_v3  ;;  %v7943_v3 = vld [vmem:[%s11335_s1 + $0x248] ss:$16 sps:$4 sm:$0xff]  }
 0x16f   :  { %5355 = vmatpush2.bf16.msra.mxu0 %v7849_v4  ;;  %v7948_v4 = vld [vmem:[%s11335_s1 + $0x1ac] ss:$16 sps:$4 sm:$0xff]  }
 0x170   :  { %5398 = vmatpush2.bf16.msra.mxu1 %v7852_v5  ;;  %5356 = vmatprep.subr.bf16.mxu0 %v7857_v6  ;;  %v7951_v5 = vld [vmem:[%s11335_s1 + $0x22c] ss:$16 sps:$4 sm:$0xff]   ;;  %v7946_v6 = vld [vmem:[%s11335_s1 + $0x1a8] ss:$16 sps:$4 sm:$0xff]  }
 0x171   :  { %5399 = vmatprep.subr.bf16.mxu1 %v7860_v7  ;;  %v7949_v7 = vld [vmem:[%s11335_s1 + $0x228] ss:$16 sps:$4 sm:$0xff]  }
 0x173   :  { %5357 = vmatpush2.bf16.msra.mxu0 %v7855_v8  ;;  %v7954_v8 = vld [vmem:[%s11335_s1 + $0x18c] ss:$16 sps:$4 sm:$0xff]  }
 0x174   :  { %5400 = vmatpush2.bf16.msra.mxu1 %v7858_v9  ;;  %5358 = vmatprep.subr.bf16.mxu0 %v7863_v10  ;;  %v7957_v9 = vld [vmem:[%s11335_s1 + $0x20c] ss:$16 sps:$4 sm:$0xff]   ;;  %v7952_v10 = vld [vmem:[%s11335_s1 + $0x188] ss:$16 sps:$4 sm:$0xff]  }
 0x175   :  { %5401 = vmatprep.subr.bf16.mxu1 %v7866_v11  ;;  %v7955_v11 = vld [vmem:[%s11335_s1 + $0x208] ss:$16 sps:$4 sm:$0xff]  }
 0x177   :  { %5359 = vmatpush2.bf16.msra.mxu0 %v7861_v12  ;;  %v7960_v12 = vld [vmem:[%s11335_s1 + $0x16c] ss:$16 sps:$4 sm:$0xff]  }
 0x178   :  { %5402 = vmatpush2.bf16.msra.mxu1 %v7864_v13  ;;  %5360 = vmatprep.subr.bf16.mxu0 %v7869_v14  ;;  %v7963_v13 = vld [vmem:[%s11335_s1 + $0x3ec] ss:$16 sps:$4 sm:$0xff]   ;;  %v7958_v14 = vld [vmem:[%s11335_s1 + $0x168] ss:$16 sps:$4 sm:$0xff]  }
 0x179   :  { %5403 = vmatprep.subr.bf16.mxu1 %v7872_v15  ;;  %v7961_v15 = vld [vmem:[%s11335_s1 + $0x3e8] ss:$16 sps:$4 sm:$0xff]  }
 0x17b   :  { %5361 = vmatpush2.bf16.msra.mxu0 %v7867_v16  ;;  %v7966_v16 = vld [vmem:[%s11335_s1 + $0x14c] ss:$16 sps:$4 sm:$0xff]  }
 0x17c   :  { %5404 = vmatpush2.bf16.msra.mxu1 %v7870_v17  ;;  %5362 = vmatprep.subr.bf16.mxu0 %v7875_v18  ;;  %v7969_v17 = vld [vmem:[%s11335_s1 + $0x3cc] ss:$16 sps:$4 sm:$0xff]   ;;  %v7964_v18 = vld [vmem:[%s11335_s1 + $0x148] ss:$16 sps:$4 sm:$0xff]  }
 0x17d   :  { %5405 = vmatprep.subr.bf16.mxu1 %v7878_v19  ;;  %v7967_v19 = vld [vmem:[%s11335_s1 + $0x3c8] ss:$16 sps:$4 sm:$0xff]  }
 0x17f   :  { %5363 = vmatpush2.bf16.msra.mxu0 %v7873_v20  ;;  %v7972_v20 = vld [vmem:[%s11335_s1 + $0x12c] ss:$16 sps:$4 sm:$0xff]  }
 0x180   :  { %5406 = vmatpush2.bf16.msra.mxu1 %v7876_v21  ;;  %5426 = vmatprep.subr.bf16.mxu0 %v7887_v24  ;;  %v7975_v21 = vld [vmem:[%s11335_s1 + $0x3ac] ss:$16 sps:$4 sm:$0xff]  }
 0x181   :  { %5461 = vmatprep.subr.bf16.mxu1 %v7890_v25  ;;  %v7978_v24 = vld [vmem:[%s11335_s1 + $0x10c] ss:$16 sps:$4 sm:$0xff]  }
 0x182   :  { %5365 = vmatmul.mubr.bf16.vlgmr.msra.gmra.mxu0 %v7879_v22  ;;  %v7970_v22 = vld [vmem:[%s11335_s1 + $0x128] ss:$16 sps:$4 sm:$0xff]   ;;  %v7981_v25 = vld [vmem:[%s11335_s1 + $0x38c] ss:$16 sps:$4 sm:$0xff]  }
 0x183   :  { %5408 = vmatmul.mubr.bf16.vlgmr.msra.gmra.mxu1 %v7882_v23  ;;  %5427 = vmatpush1.bf16.msra.mxu0 %v7885_v26  ;;  %v7973_v23 = vld [vmem:[%s11335_s1 + $0x3a8] ss:$16 sps:$4 sm:$0xff]  }
 0x184   :  { %5462 = vmatpush1.bf16.msra.mxu1 %v7888_v27  ;;  %5428 = vmatprep.subr.bf16.mxu0 %v7893_v28  ;;  %v7976_v26 = vld [vmem:[%s11335_s1 + $0x108] ss:$16 sps:$4 sm:$0xff]   ;;  %v7984_v28 = vld [vmem:[%s11335_s1 + $0x36c] ss:$16 sps:$4 sm:$0xff]  }
 0x185   :  { %5463 = vmatprep.subr.bf16.mxu1 %v7896_v29  ;;  %5450 = vmatprep.mubr.bf16.mxu0 %v8543_v36  ;;  %v7979_v27 = vld [vmem:[%s11335_s1 + $0x388] ss:$16 sps:$4 sm:$0xff]   ;;  %v7987_v29 = vld [vmem:[%s11335_s1 + $0x4ec] ss:$16 sps:$4 sm:$0xff]  }
 0x186   :  { %5493 = vmatprep.mubr.bf16.mxu1 %v8518_v37  ;;  %v8520_v37 = vld [vmem:[%s11336_s0] ss:$100 sps:$4 sm:$0xff]  }
 0x187   :  { %5429 = vmatpush1.bf16.msra.mxu0 %v7891_v30  ;;  %v7982_v30 = vld [vmem:[%s11335_s1 + $0x368] ss:$16 sps:$4 sm:$0xff]  }
 0x188   :  { %5464 = vmatpush1.bf16.msra.mxu1 %v7894_v31  ;;  %5430 = vmatprep.subr.bf16.mxu0 %v7899_v32  ;;  %v7985_v31 = vld [vmem:[%s11335_s1 + $0x4e8] ss:$16 sps:$4 sm:$0xff]   ;;  %v7990_v32 = vld [vmem:[%s11335_s1 + $0x34c] ss:$16 sps:$4 sm:$0xff]  }
 0x189   :  { %5465 = vmatprep.subr.bf16.mxu1 %v7902_v33  ;;  %v7993_v33 = vld [vmem:[%s11335_s1 + $0x4cc] ss:$16 sps:$4 sm:$0xff]  }
 0x18b   :  { %5431 = vmatpush1.bf16.msra.mxu0 %v7897_v34  ;;  %v7988_v34 = vld [vmem:[%s11335_s1 + $0x348] ss:$16 sps:$4 sm:$0xff]  }
 0x18c   :  { %5466 = vmatpush1.bf16.msra.mxu1 %v7900_v35  ;;  %5432 = vmatprep.subr.bf16.mxu0 %v7905_v38  ;;  %v7991_v35 = vld [vmem:[%s11335_s1 + $0x4c8] ss:$16 sps:$4 sm:$0xff]   ;;  %v7996_v38 = vld [vmem:[%s11335_s1 + $0x32c] ss:$16 sps:$4 sm:$0xff]  }
 0x18d   :  { %5467 = vmatprep.subr.bf16.mxu1 %v7908_v39  ;;  %v7999_v39 = vld [vmem:[%s11335_s1 + $0x4ac] ss:$16 sps:$4 sm:$0xff]  }
 0x18f   :  { %5433 = vmatpush1.bf16.msra.mxu0 %v7903_v40  ;;  %v7994_v40 = vld [vmem:[%s11335_s1 + $0x328] ss:$16 sps:$4 sm:$0xff]  }
 0x190   :  { %5468 = vmatpush1.bf16.msra.mxu1 %v7906_v41  ;;  %5504 = vmatprep.subr.bf16.mxu0 %v7915_v44  ;;  %v7997_v41 = vld [vmem:[%s11335_s1 + $0x4a8] ss:$16 sps:$4 sm:$0xff]   ;;  %v8005_v44 = vld [vmem:[%s11335_s1 + $0x48c] ss:$16 sps:$4 sm:$0xff]  }
 0x191   :  { %5469 = vmatprep.subr.bf16.mxu1 %v7912_v43  ;;  %v8002_v43 = vld [vmem:[%s11335_s1 + $0x30c] ss:$16 sps:$4 sm:$0xff]  }
 0x192   :  { %7193 = vmatmul.mubr.msk.bf16.vlgmr.msra.gmra.mxu0 %vm4898_vm0, %v7909_v42  ;;  %v8521_v42 = vld [vmem:[%s11336_s0 + $0x14] ss:$100 sps:$4 sm:$0xff]  }
 0x193   :  { %5505 = vmatpush1.bf16.msra.mxu0 %v7913_v46  ;;  %5536 = vmatprep.mubr.bf16.mxu0 %v8519_v53  ;;  %v8003_v46 = vld [vmem:[%s11335_s1 + $0x488] ss:$16 sps:$4 sm:$0xff]  }
 0x194   :  { %5470 = vmatpush1.bf16.msra.mxu1 %v7910_v45  ;;  %5506 = vmatprep.subr.bf16.mxu0 %v7921_v48  ;;  %v8000_v45 = vld [vmem:[%s11335_s1 + $0x308] ss:$16 sps:$4 sm:$0xff]   ;;  %v8011_v48 = vld [vmem:[%s11335_s1 + $0x6ec] ss:$16 sps:$4 sm:$0xff]  }
 0x195   :  { %5471 = vmatprep.subr.bf16.mxu1 %v7918_v47  ;;  %v8008_v47 = vld [vmem:[%s11335_s1 + $0x46c] ss:$16 sps:$4 sm:$0xff]   ;;  %v8012_v53 = vld [vmem:[%s11335_s1 + $0x448] ss:$16 sps:$4 sm:$0xff]  }
 0x197   :  { %5507 = vmatpush1.bf16.msra.mxu0 %v7919_v50  ;;  %v8009_v50 = vld [vmem:[%s11335_s1 + $0x6e8] ss:$16 sps:$4 sm:$0xff]  }
 0x198   :  { %5472 = vmatpush1.bf16.msra.mxu1 %v7916_v49  ;;  %5508 = vmatprep.subr.bf16.mxu0 %v7927_v52  ;;  %v8006_v49 = vld [vmem:[%s11335_s1 + $0x468] ss:$16 sps:$4 sm:$0xff]   ;;  %v8017_v52 = vld [vmem:[%s11335_s1 + $0x6cc] ss:$16 sps:$4 sm:$0xff]  }
 0x199   :  { %5473 = vmatprep.subr.bf16.mxu1 %v7924_v51  ;;  %v8014_v51 = vld [vmem:[%s11335_s1 + $0x44c] ss:$16 sps:$4 sm:$0xff]  }
 0x19b   :  { %5509 = vmatpush1.bf16.msra.mxu0 %v7925_v55  ;;  %v8522_v55 = vld [vmem:[%s11336_s0 + $0x8] ss:$100 sps:$4 sm:$0xff]  }
 0x19c   :  { %5474 = vmatpush1.bf16.msra.mxu1 %v7922_v54  ;;  %5510 = vmatprep.subr.bf16.mxu0 %v7933_v57  ;;  %v8015_v54 = vld [vmem:[%s11335_s1 + $0x6c8] ss:$16 sps:$4 sm:$0xff]   ;;  %v8023_v57 = vld [vmem:[%s11335_s1 + $0x6ac] ss:$16 sps:$4 sm:$0xff]  }
 0x19d   :  { %5475 = vmatprep.subr.bf16.mxu1 %v7930_v56  ;;  %v8020_v56 = vld [vmem:[%s11335_s1 + $0x42c] ss:$16 sps:$4 sm:$0xff]  }
 0x19f   :  { %5511 = vmatpush1.bf16.msra.mxu0 %v7931_v59  ;;  %v8021_v59 = vld [vmem:[%s11335_s1 + $0x6a8] ss:$16 sps:$4 sm:$0xff]  }
 0x1a0   :  { %5476 = vmatpush1.bf16.msra.mxu1 %v7928_v58  ;;  %5512 = vmatprep.subr.bf16.mxu0 %v7939_v61  ;;  %v8018_v58 = vld [vmem:[%s11335_s1 + $0x428] ss:$16 sps:$4 sm:$0xff]   ;;  %v8026_v61 = vld [vmem:[%s11335_s1 + $0x40c] ss:$16 sps:$4 sm:$0xff]  }
 0x1a1   :  { %5477 = vmatprep.subr.bf16.mxu1 %v7936_v60  ;;  %v8523_v60 = vld [vmem:[%s11336_s0 + $0x1c] ss:$100 sps:$4 sm:$0xff]  }
 0x1a3   :  { %5513 = vmatpush1.bf16.msra.mxu0 %v7937_v63  ;;  %v8024_v63 = vld [vmem:[%s11335_s1 + $0x408] ss:$16 sps:$4 sm:$0xff]  }
 0x1a4   :  { %5478 = vmatpush2.bf16.msra.mxu1 %v7934_v62  ;;  %5514 = vmatprep.subr.bf16.mxu0 %v7945_v1  ;;  %v8029_v62 = vld [vmem:[%s11335_s1 + $0x68c] ss:$16 sps:$4 sm:$0xff]  }
 0x1a5   :  { %5479 = vmatprep.subr.bf16.mxu1 %v7942_v0  ;;  %v8027_v0 = vld [vmem:[%s11335_s1 + $0x688] ss:$16 sps:$4 sm:$0xff]   ;;  %v8032_v1 = vld [vmem:[%s11335_s1 + $0x5ec] ss:$16 sps:$4 sm:$0xff]  }
 0x1a7   :  { %5515 = vmatpush1.bf16.msra.mxu0 %v7943_v3  ;;  %v8030_v3 = vld [vmem:[%s11335_s1 + $0x5e8] ss:$16 sps:$4 sm:$0xff]  }
 0x1a8   :  { %5480 = vmatpush2.bf16.msra.mxu1 %v7940_v2  ;;  %5516 = vmatprep.subr.bf16.mxu0 %v7951_v5  ;;  %v8035_v2 = vld [vmem:[%s11335_s1 + $0x66c] ss:$16 sps:$4 sm:$0xff]  }
 0x1a9   :  { %5481 = vmatprep.subr.bf16.mxu1 %v7948_v4  ;;  %v8033_v4 = vld [vmem:[%s11335_s1 + $0x668] ss:$16 sps:$4 sm:$0xff]   ;;  %v8038_v5 = vld [vmem:[%s11335_s1 + $0x5cc] ss:$16 sps:$4 sm:$0xff]  }
 0x1ab   :  { %5517 = vmatpush1.bf16.msra.mxu0 %v7949_v7  ;;  %v8036_v7 = vld [vmem:[%s11335_s1 + $0x5c8] ss:$16 sps:$4 sm:$0xff]  }
 0x1ac   :  { %5482 = vmatpush2.bf16.msra.mxu1 %v7946_v6  ;;  %5518 = vmatprep.subr.bf16.mxu0 %v7957_v9  ;;  %v8041_v6 = vld [vmem:[%s11335_s1 + $0x64c] ss:$16 sps:$4 sm:$0xff]  }
 0x1ad   :  { %5483 = vmatprep.subr.bf16.mxu1 %v7954_v8  ;;  %v8039_v8 = vld [vmem:[%s11335_s1 + $0x648] ss:$16 sps:$4 sm:$0xff]   ;;  %v8044_v9 = vld [vmem:[%s11335_s1 + $0x5ac] ss:$16 sps:$4 sm:$0xff]  }
 0x1af   :  { %5519 = vmatpush1.bf16.msra.mxu0 %v7955_v11  ;;  %v8042_v11 = vld [vmem:[%s11335_s1 + $0x5a8] ss:$16 sps:$4 sm:$0xff]  }
 0x1b0   :  { %5484 = vmatpush2.bf16.msra.mxu1 %v7952_v10  ;;  %5520 = vmatprep.subr.bf16.mxu0 %v7963_v13  ;;  %v8047_v10 = vld [vmem:[%s11335_s1 + $0x62c] ss:$16 sps:$4 sm:$0xff]  }
 0x1b1   :  { %5485 = vmatprep.subr.bf16.mxu1 %v7960_v12  ;;  %v8045_v12 = vld [vmem:[%s11335_s1 + $0x628] ss:$16 sps:$4 sm:$0xff]   ;;  %v8050_v13 = vld [vmem:[%s11335_s1 + $0x58c] ss:$16 sps:$4 sm:$0xff]  }
 0x1b3   :  { %5521 = vmatpush2.bf16.msra.mxu0 %v7961_v15  ;;  %v8048_v15 = vld [vmem:[%s11335_s1 + $0x588] ss:$16 sps:$4 sm:$0xff]  }
 0x1b4   :  { %5486 = vmatpush2.bf16.msra.mxu1 %v7958_v14  ;;  %5522 = vmatprep.subr.bf16.mxu0 %v7969_v17  ;;  %v8053_v14 = vld [vmem:[%s11335_s1 + $0x60c] ss:$16 sps:$4 sm:$0xff]  }
 0x1b5   :  { %5487 = vmatprep.subr.bf16.mxu1 %v7966_v16  ;;  %v8051_v16 = vld [vmem:[%s11335_s1 + $0x608] ss:$16 sps:$4 sm:$0xff]   ;;  %v8056_v17 = vld [vmem:[%s11335_s1 + $0x56c] ss:$16 sps:$4 sm:$0xff]  }
 0x1b7   :  { %5523 = vmatpush2.bf16.msra.mxu0 %v7967_v19  ;;  %v8054_v19 = vld [vmem:[%s11335_s1 + $0x568] ss:$16 sps:$4 sm:$0xff]  }
 0x1b8   :  { %5488 = vmatpush2.bf16.msra.mxu1 %v7964_v18  ;;  %5524 = vmatprep.subr.bf16.mxu0 %v7975_v21  ;;  %v8059_v18 = vld [vmem:[%s11335_s1 + $0x7ec] ss:$16 sps:$4 sm:$0xff]  }
 0x1b9   :  { %5489 = vmatprep.subr.bf16.mxu1 %v7972_v20  ;;  %v8057_v20 = vld [vmem:[%s11335_s1 + $0x7e8] ss:$16 sps:$4 sm:$0xff]   ;;  %v8062_v21 = vld [vmem:[%s11335_s1 + $0x54c] ss:$16 sps:$4 sm:$0xff]  }
 0x1bb   :  { %5525 = vmatpush2.bf16.msra.mxu0 %v7973_v23  ;;  %v8060_v23 = vld [vmem:[%s11335_s1 + $0x548] ss:$16 sps:$4 sm:$0xff]  }
 0x1bc   :  { %5490 = vmatpush2.bf16.msra.mxu1 %v7970_v22  ;;  %5526 = vmatprep.subr.bf16.mxu0 %v7981_v25  ;;  %v8065_v22 = vld [vmem:[%s11335_s1 + $0x7cc] ss:$16 sps:$4 sm:$0xff]  }
 0x1bd   :  { %5491 = vmatprep.subr.bf16.mxu1 %v7978_v24  ;;  %v8063_v24 = vld [vmem:[%s11335_s1 + $0x7c8] ss:$16 sps:$4 sm:$0xff]   ;;  %v8068_v25 = vld [vmem:[%s11335_s1 + $0x52c] ss:$16 sps:$4 sm:$0xff]  }
 0x1bf   :  { %5527 = vmatpush2.bf16.msra.mxu0 %v7979_v27  ;;  %v8066_v27 = vld [vmem:[%s11335_s1 + $0x528] ss:$16 sps:$4 sm:$0xff]  }
 0x1c0   :  { %5492 = vmatpush2.bf16.msra.mxu1 %v7976_v26  ;;  %5528 = vmatprep.subr.bf16.mxu0 %v7984_v28  ;;  %v8071_v26 = vld [vmem:[%s11335_s1 + $0x7ac] ss:$16 sps:$4 sm:$0xff]   ;;  %v8069_v28 = vld [vmem:[%s11335_s1 + $0x7a8] ss:$16 sps:$4 sm:$0xff]  }
 0x1c1   :  { %5547 = vmatprep.subr.bf16.mxu1 %v7987_v29  ;;  %v8074_v29 = vld [vmem:[%s11335_s1 + $0x50c] ss:$16 sps:$4 sm:$0xff]  }
 0x1c3   :  { %5494 = vmatmul.mubr.bf16.vlgmr.msra.gmra.mxu1 %v8520_v37  ;;  %5529 = vmatpush2.bf16.msra.mxu0 %v7982_v30  ;;  %v8077_v30 = vld [vmem:[%s11335_s1 + $0x78c] ss:$16 sps:$4 sm:$0xff]   ;;  %v8081_v37 = vld [vmem:[%s11335_s1 + $0x8e8] ss:$16 sps:$4 sm:$0xff]  }
 0x1c4   :  { %5548 = vmatpush1.bf16.msra.mxu1 %v7985_v31  ;;  %5530 = vmatprep.subr.bf16.mxu0 %v7990_v32  ;;  %v8072_v31 = vld [vmem:[%s11335_s1 + $0x508] ss:$16 sps:$4 sm:$0xff]  }
 0x1c5   :  { %5549 = vmatprep.subr.bf16.mxu1 %v7993_v33  ;;  %5579 = vmatprep.mubr.bf16.mxu1 %v8521_v42  ;;  %v8075_v32 = vld [vmem:[%s11335_s1 + $0x788] ss:$16 sps:$4 sm:$0xff]   ;;  %v8080_v33 = vld [vmem:[%s11335_s1 + $0x76c] ss:$16 sps:$4 sm:$0xff]  }
 0x1c6   :  { %v8087_v42 = vld [vmem:[%s11335_s1 + $0x8c8] ss:$16 sps:$4 sm:$0xff]  }
 0x1c7   :  { %5531 = vmatpush2.bf16.msra.mxu0 %v7988_v34  ;;  %v8083_v34 = vld [vmem:[%s11335_s1 + $0x8ec] ss:$16 sps:$4 sm:$0xff]  }
 0x1c8   :  { %5550 = vmatpush1.bf16.msra.mxu1 %v7991_v35  ;;  %5532 = vmatprep.subr.bf16.mxu0 %v7996_v38  ;;  %v8078_v35 = vld [vmem:[%s11335_s1 + $0x768] ss:$16 sps:$4 sm:$0xff]   ;;  %v8086_v38 = vld [vmem:[%s11335_s1 + $0x74c] ss:$16 sps:$4 sm:$0xff]  }
 0x1c9   :  { %5551 = vmatprep.subr.bf16.mxu1 %v7999_v39  ;;  %v8089_v39 = vld [vmem:[%s11335_s1 + $0x8cc] ss:$16 sps:$4 sm:$0xff]  }
 0x1cb   :  { %5533 = vmatpush2.bf16.msra.mxu0 %v7994_v40  ;;  %v8524_v40 = vld [vmem:[%s11336_s0 + $0x10] ss:$100 sps:$4 sm:$0xff]  }
 0x1cc   :  { %5552 = vmatpush1.bf16.msra.mxu1 %v7997_v41  ;;  %5534 = vmatprep.subr.bf16.mxu0 %v8002_v43  ;;  %v8084_v41 = vld [vmem:[%s11335_s1 + $0x748] ss:$16 sps:$4 sm:$0xff]   ;;  %v8092_v43 = vld [vmem:[%s11335_s1 + $0x72c] ss:$16 sps:$4 sm:$0xff]  }
 0x1cd   :  { %5553 = vmatprep.subr.bf16.mxu1 %v8005_v44  ;;  %v8095_v44 = vld [vmem:[%s11335_s1 + $0x8ac] ss:$16 sps:$4 sm:$0xff]  }
 0x1cf   :  { %5535 = vmatpush2.bf16.msra.mxu0 %v8000_v45  ;;  %v8525_v45 = vld [vmem:[%s11336_s0 + $0x24] ss:$100 sps:$4 sm:$0xff]  }
 0x1d0   :  { %5554 = vmatpush1.bf16.msra.mxu1 %v8003_v46  ;;  %5590 = vmatprep.subr.bf16.mxu0 %v8011_v48  ;;  %v8090_v46 = vld [vmem:[%s11335_s1 + $0x728] ss:$16 sps:$4 sm:$0xff]   ;;  %v8098_v48 = vld [vmem:[%s11335_s1 + $0x70c] ss:$16 sps:$4 sm:$0xff]  }
 0x1d1   :  { %5555 = vmatprep.subr.bf16.mxu1 %v8008_v47  ;;  %v8093_v47 = vld [vmem:[%s11335_s1 + $0x8a8] ss:$16 sps:$4 sm:$0xff]  }
 0x1d2   :  { %5537 = vmatmul.mubr.bf16.vlgmr.msra.gmra.mxu0 %v8522_v55  ;;  %v8105_v55 = vld [vmem:[%s11335_s1 + $0xae8] ss:$16 sps:$4 sm:$0xff]  }
 0x1d3   :  { %5591 = vmatpush1.bf16.msra.mxu0 %v8009_v50  ;;  %5622 = vmatprep.mubr.bf16.mxu0 %v8523_v60  ;;  %v8096_v50 = vld [vmem:[%s11335_s1 + $0x708] ss:$16 sps:$4 sm:$0xff]  }
 0x1d4   :  { %5556 = vmatpush1.bf16.msra.mxu1 %v8006_v49  ;;  %5592 = vmatprep.subr.bf16.mxu0 %v8017_v52  ;;  %v8101_v49 = vld [vmem:[%s11335_s1 + $0x88c] ss:$16 sps:$4 sm:$0xff]   ;;  %v8111_v60 = vld [vmem:[%s11335_s1 + $0xac8] ss:$16 sps:$4 sm:$0xff]  }
 0x1d5   :  { %5557 = vmatprep.subr.bf16.mxu1 %v8014_v51  ;;  %v8099_v51 = vld [vmem:[%s11335_s1 + $0x888] ss:$16 sps:$4 sm:$0xff]   ;;  %v8104_v52 = vld [vmem:[%s11335_s1 + $0x86c] ss:$16 sps:$4 sm:$0xff]  }
 0x1d7   :  { %5593 = vmatpush1.bf16.msra.mxu0 %v8015_v54  ;;  %v8102_v54 = vld [vmem:[%s11335_s1 + $0x868] ss:$16 sps:$4 sm:$0xff]  }
 0x1d8   :  { %5558 = vmatpush1.bf16.msra.mxu1 %v8012_v53  ;;  %5594 = vmatprep.subr.bf16.mxu0 %v8023_v57  ;;  %v8107_v53 = vld [vmem:[%s11335_s1 + $0xaec] ss:$16 sps:$4 sm:$0xff]  }
 0x1d9   :  { %5559 = vmatprep.subr.bf16.mxu1 %v8020_v56  ;;  %v8110_v56 = vld [vmem:[%s11335_s1 + $0x84c] ss:$16 sps:$4 sm:$0xff]  }
 0x1da   :  { %v8113_v57 = vld [vmem:[%s11335_s1 + $0xacc] ss:$16 sps:$4 sm:$0xff]  }
 0x1db   :  { %5595 = vmatpush1.bf16.msra.mxu0 %v8021_v59  ;;  %v8108_v59 = vld [vmem:[%s11335_s1 + $0x848] ss:$16 sps:$4 sm:$0xff]  }
 0x1dc   :  { %5560 = vmatpush1.bf16.msra.mxu1 %v8018_v58  ;;  %5596 = vmatprep.subr.bf16.mxu0 %v8029_v62  ;;  %v8526_v58 = vld [vmem:[%s11336_s0 + $0x18] ss:$100 sps:$4 sm:$0xff]  }
 0x1dd   :  { %5561 = vmatprep.subr.bf16.mxu1 %v8026_v61  ;;  %v8116_v61 = vld [vmem:[%s11335_s1 + $0x82c] ss:$16 sps:$4 sm:$0xff]  }
 0x1de   :  { %v8119_v62 = vld [vmem:[%s11335_s1 + $0xaac] ss:$16 sps:$4 sm:$0xff]  }
 0x1df   :  { %5597 = vmatpush1.bf16.msra.mxu0 %v8027_v0  ;;  %v8114_v0 = vld [vmem:[%s11335_s1 + $0x828] ss:$16 sps:$4 sm:$0xff]  }
 0x1e0   :  { %5562 = vmatpush1.bf16.msra.mxu1 %v8024_v63  ;;  %5598 = vmatprep.subr.bf16.mxu0 %v8035_v2  ;;  %v8527_v63 = vld [vmem:[%s11336_s0 + $0x2c] ss:$100 sps:$4 sm:$0xff]  }
 0x1e1   :  { %5563 = vmatprep.subr.bf16.mxu1 %v8032_v1  ;;  %v8117_v1 = vld [vmem:[%s11335_s1 + $0xaa8] ss:$16 sps:$4 sm:$0xff]   ;;  %v8122_v2 = vld [vmem:[%s11335_s1 + $0x80c] ss:$16 sps:$4 sm:$0xff]  }
 0x1e3   :  { %5599 = vmatpush1.bf16.msra.mxu0 %v8033_v4  ;;  %v8120_v4 = vld [vmem:[%s11335_s1 + $0x808] ss:$16 sps:$4 sm:$0xff]  }
 0x1e4   :  { %5564 = vmatpush2.bf16.msra.mxu1 %v8030_v3  ;;  %5600 = vmatprep.subr.bf16.mxu0 %v8041_v6  ;;  %v8125_v3 = vld [vmem:[%s11335_s1 + $0xa8c] ss:$16 sps:$4 sm:$0xff]  }
 0x1e5   :  { %5565 = vmatprep.subr.bf16.mxu1 %v8038_v5  ;;  %v8123_v5 = vld [vmem:[%s11335_s1 + $0xa88] ss:$16 sps:$4 sm:$0xff]   ;;  %v8128_v6 = vld [vmem:[%s11335_s1 + $0x9ec] ss:$16 sps:$4 sm:$0xff]  }
 0x1e7   :  { %5601 = vmatpush1.bf16.msra.mxu0 %v8039_v8  ;;  %v8126_v8 = vld [vmem:[%s11335_s1 + $0x9e8] ss:$16 sps:$4 sm:$0xff]  }
 0x1e8   :  { %5566 = vmatpush2.bf16.msra.mxu1 %v8036_v7  ;;  %5602 = vmatprep.subr.bf16.mxu0 %v8047_v10  ;;  %v8131_v7 = vld [vmem:[%s11335_s1 + $0xa6c] ss:$16 sps:$4 sm:$0xff]  }
 0x1e9   :  { %5567 = vmatprep.subr.bf16.mxu1 %v8044_v9  ;;  %v8129_v9 = vld [vmem:[%s11335_s1 + $0xa68] ss:$16 sps:$4 sm:$0xff]   ;;  %v8134_v10 = vld [vmem:[%s11335_s1 + $0x9cc] ss:$16 sps:$4 sm:$0xff]  }
 0x1eb   :  { %5603 = vmatpush1.bf16.msra.mxu0 %v8045_v12  ;;  %v8132_v12 = vld [vmem:[%s11335_s1 + $0x9c8] ss:$16 sps:$4 sm:$0xff]  }
 0x1ec   :  { %5568 = vmatpush2.bf16.msra.mxu1 %v8042_v11  ;;  %5604 = vmatprep.subr.bf16.mxu0 %v8053_v14  ;;  %v8137_v11 = vld [vmem:[%s11335_s1 + $0xa4c] ss:$16 sps:$4 sm:$0xff]  }
 0x1ed   :  { %5569 = vmatprep.subr.bf16.mxu1 %v8050_v13  ;;  %v8135_v13 = vld [vmem:[%s11335_s1 + $0xa48] ss:$16 sps:$4 sm:$0xff]   ;;  %v8140_v14 = vld [vmem:[%s11335_s1 + $0x9ac] ss:$16 sps:$4 sm:$0xff]  }
 0x1ef   :  { %5605 = vmatpush1.bf16.msra.mxu0 %v8051_v16  ;;  %v8138_v16 = vld [vmem:[%s11335_s1 + $0x9a8] ss:$16 sps:$4 sm:$0xff]  }
 0x1f0   :  { %5570 = vmatpush2.bf16.msra.mxu1 %v8048_v15  ;;  %5606 = vmatprep.subr.bf16.mxu0 %v8059_v18  ;;  %v8143_v15 = vld [vmem:[%s11335_s1 + $0xa2c] ss:$16 sps:$4 sm:$0xff]  }
 0x1f1   :  { %5571 = vmatprep.subr.bf16.mxu1 %v8056_v17  ;;  %v8141_v17 = vld [vmem:[%s11335_s1 + $0xa28] ss:$16 sps:$4 sm:$0xff]   ;;  %v8146_v18 = vld [vmem:[%s11335_s1 + $0x98c] ss:$16 sps:$4 sm:$0xff]  }
 0x1f3   :  { %5607 = vmatpush2.bf16.msra.mxu0 %v8057_v20  ;;  %v8144_v20 = vld [vmem:[%s11335_s1 + $0x988] ss:$16 sps:$4 sm:$0xff]  }
 0x1f4   :  { %5572 = vmatpush2.bf16.msra.mxu1 %v8054_v19  ;;  %5608 = vmatprep.subr.bf16.mxu0 %v8065_v22  ;;  %v8149_v19 = vld [vmem:[%s11335_s1 + $0xa0c] ss:$16 sps:$4 sm:$0xff]  }
 0x1f5   :  { %5573 = vmatprep.subr.bf16.mxu1 %v8062_v21  ;;  %v8147_v21 = vld [vmem:[%s11335_s1 + $0xa08] ss:$16 sps:$4 sm:$0xff]   ;;  %v8152_v22 = vld [vmem:[%s11335_s1 + $0x96c] ss:$16 sps:$4 sm:$0xff]  }
 0x1f7   :  { %5609 = vmatpush2.bf16.msra.mxu0 %v8063_v24  ;;  %v8150_v24 = vld [vmem:[%s11335_s1 + $0x968] ss:$16 sps:$4 sm:$0xff]  }
 0x1f8   :  { %5574 = vmatpush2.bf16.msra.mxu1 %v8060_v23  ;;  %5610 = vmatprep.subr.bf16.mxu0 %v8071_v26  ;;  %v8155_v23 = vld [vmem:[%s11335_s1 + $0xbec] ss:$16 sps:$4 sm:$0xff]  }
 0x1f9   :  { %5575 = vmatprep.subr.bf16.mxu1 %v8068_v25  ;;  %v8153_v25 = vld [vmem:[%s11335_s1 + $0xbe8] ss:$16 sps:$4 sm:$0xff]   ;;  %v8158_v26 = vld [vmem:[%s11335_s1 + $0x94c] ss:$16 sps:$4 sm:$0xff]  }
 0x1fb   :  { %5611 = vmatpush2.bf16.msra.mxu0 %v8069_v28  ;;  %v8156_v28 = vld [vmem:[%s11335_s1 + $0x948] ss:$16 sps:$4 sm:$0xff]  }
 0x1fc   :  { %5576 = vmatpush2.bf16.msra.mxu1 %v8066_v27  ;;  %5612 = vmatprep.subr.bf16.mxu0 %v8077_v30  ;;  %v8161_v27 = vld [vmem:[%s11335_s1 + $0xbcc] ss:$16 sps:$4 sm:$0xff]  }
 0x1fd   :  { %5577 = vmatprep.subr.bf16.mxu1 %v8074_v29  ;;  %v8159_v29 = vld [vmem:[%s11335_s1 + $0xbc8] ss:$16 sps:$4 sm:$0xff]   ;;  %v8164_v30 = vld [vmem:[%s11335_s1 + $0x92c] ss:$16 sps:$4 sm:$0xff]  }
 0x1ff   :  { %5613 = vmatpush2.bf16.msra.mxu0 %v8075_v32  ;;  %v8162_v32 = vld [vmem:[%s11335_s1 + $0x928] ss:$16 sps:$4 sm:$0xff]  }
 0x200   :  { %5578 = vmatpush2.bf16.msra.mxu1 %v8072_v31  ;;  %5614 = vmatprep.subr.bf16.mxu0 %v8080_v33  ;;  %v8167_v31 = vld [vmem:[%s11335_s1 + $0xbac] ss:$16 sps:$4 sm:$0xff]   ;;  %v8165_v33 = vld [vmem:[%s11335_s1 + $0xba8] ss:$16 sps:$4 sm:$0xff]  }
 0x201   :  { %5633 = vmatprep.subr.bf16.mxu1 %v8083_v34  ;;  %v8170_v34 = vld [vmem:[%s11335_s1 + $0x90c] ss:$16 sps:$4 sm:$0xff]  }
 0x203   :  { %5580 = vmatmul.mubr.bf16.vlgmr.msra.gmra.mxu1 %v8524_v40  ;;  %5615 = vmatpush2.bf16.msra.mxu0 %v8078_v35  ;;  %v8173_v35 = vld [vmem:[%s11335_s1 + $0xb8c] ss:$16 sps:$4 sm:$0xff]  }
 0x204   :  { %5634 = vmatpush1.bf16.msra.mxu1 %v8081_v37  ;;  %5616 = vmatprep.subr.bf16.mxu0 %v8086_v38  ;;  %v8168_v37 = vld [vmem:[%s11335_s1 + $0x908] ss:$16 sps:$4 sm:$0xff]   ;;  %v8179_v40 = vld [vmem:[%s11335_s1 + $0xcec] ss:$16 sps:$4 sm:$0xff]  }
 0x205   :  { %5635 = vmatprep.subr.bf16.mxu1 %v8089_v39  ;;  %5665 = vmatprep.mubr.bf16.mxu1 %v8525_v45  ;;  %v8171_v38 = vld [vmem:[%s11335_s1 + $0xb88] ss:$16 sps:$4 sm:$0xff]   ;;  %v8176_v39 = vld [vmem:[%s11335_s1 + $0xb6c] ss:$16 sps:$4 sm:$0xff]   ;;  %v8528_v45 = vld [vmem:[%s11336_s0 + $0x20] ss:$100 sps:$4 sm:$0xff]  }
 0x207   :  { %5617 = vmatpush2.bf16.msra.mxu0 %v8084_v41  ;;  %v8174_v41 = vld [vmem:[%s11335_s1 + $0xb68] ss:$16 sps:$4 sm:$0xff]  }
 0x208   :  { %5636 = vmatpush1.bf16.msra.mxu1 %v8087_v42  ;;  %5618 = vmatprep.subr.bf16.mxu0 %v8092_v43  ;;  %v8177_v42 = vld [vmem:[%s11335_s1 + $0xce8] ss:$16 sps:$4 sm:$0xff]   ;;  %v8182_v43 = vld [vmem:[%s11335_s1 + $0xb4c] ss:$16 sps:$4 sm:$0xff]  }
 0x209   :  { %5637 = vmatprep.subr.bf16.mxu1 %v8095_v44  ;;  %v8185_v44 = vld [vmem:[%s11335_s1 + $0xccc] ss:$16 sps:$4 sm:$0xff]  }
 0x20b   :  { %5619 = vmatpush2.bf16.msra.mxu0 %v8090_v46  ;;  %v8180_v46 = vld [vmem:[%s11335_s1 + $0xb48] ss:$16 sps:$4 sm:$0xff]  }
 0x20c   :  { %5638 = vmatpush1.bf16.msra.mxu1 %v8093_v47  ;;  %5620 = vmatprep.subr.bf16.mxu0 %v8098_v48  ;;  %v8183_v47 = vld [vmem:[%s11335_s1 + $0xcc8] ss:$16 sps:$4 sm:$0xff]   ;;  %v8188_v48 = vld [vmem:[%s11335_s1 + $0xb2c] ss:$16 sps:$4 sm:$0xff]  }
 0x20d   :  { %5639 = vmatprep.subr.bf16.mxu1 %v8101_v49  ;;  %v8191_v49 = vld [vmem:[%s11335_s1 + $0xcac] ss:$16 sps:$4 sm:$0xff]  }
 0x20f   :  { %5621 = vmatpush2.bf16.msra.mxu0 %v8096_v50  ;;  %v8529_v50 = vld [vmem:[%s11336_s0 + $0x34] ss:$100 sps:$4 sm:$0xff]  }
 0x210   :  { %5640 = vmatpush1.bf16.msra.mxu1 %v8099_v51  ;;  %5676 = vmatprep.subr.bf16.mxu0 %v8107_v53  ;;  %v8186_v51 = vld [vmem:[%s11335_s1 + $0xb28] ss:$16 sps:$4 sm:$0xff]   ;;  %v8194_v53 = vld [vmem:[%s11335_s1 + $0xb0c] ss:$16 sps:$4 sm:$0xff]  }
 0x211   :  { %5641 = vmatprep.subr.bf16.mxu1 %v8104_v52  ;;  %v8189_v52 = vld [vmem:[%s11335_s1 + $0xca8] ss:$16 sps:$4 sm:$0xff]  }
 0x212   :  { %5623 = vmatmul.mubr.bf16.vlgmr.msra.gmra.mxu0 %v8526_v58  ;;  %v8203_v58 = vld [vmem:[%s11335_s1 + $0xeec] ss:$16 sps:$4 sm:$0xff]  }
 0x213   :  { %5677 = vmatpush1.bf16.msra.mxu0 %v8105_v55  ;;  %5708 = vmatprep.mubr.bf16.mxu0 %v8527_v63  ;;  %v8192_v55 = vld [vmem:[%s11335_s1 + $0xb08] ss:$16 sps:$4 sm:$0xff]  }
 0x214   :  { %5642 = vmatpush1.bf16.msra.mxu1 %v8102_v54  ;;  %5678 = vmatprep.subr.bf16.mxu0 %v8113_v57  ;;  %v8197_v54 = vld [vmem:[%s11335_s1 + $0xc8c] ss:$16 sps:$4 sm:$0xff]  }
 0x215   :  { %5643 = vmatprep.subr.bf16.mxu1 %v8110_v56  ;;  %v8195_v56 = vld [vmem:[%s11335_s1 + $0xc88] ss:$16 sps:$4 sm:$0xff]   ;;  %v8200_v57 = vld [vmem:[%s11335_s1 + $0xc6c] ss:$16 sps:$4 sm:$0xff]  }
 0x216   :  { %v8530_v63 = vld [vmem:[%s11336_s0 + $0x28] ss:$100 sps:$4 sm:$0xff]  }
 0x217   :  { %5679 = vmatpush1.bf16.msra.mxu0 %v8111_v60  ;;  %v8201_v60 = vld [vmem:[%s11335_s1 + $0xee8] ss:$16 sps:$4 sm:$0xff]  }
 0x218   :  { %5644 = vmatpush1.bf16.msra.mxu1 %v8108_v59  ;;  %5680 = vmatprep.subr.bf16.mxu0 %v8119_v62  ;;  %v8198_v59 = vld [vmem:[%s11335_s1 + $0xc68] ss:$16 sps:$4 sm:$0xff]   ;;  %v8209_v62 = vld [vmem:[%s11335_s1 + $0xecc] ss:$16 sps:$4 sm:$0xff]  }
 0x219   :  { %5645 = vmatprep.subr.bf16.mxu1 %v8116_v61  ;;  %v8206_v61 = vld [vmem:[%s11335_s1 + $0xc4c] ss:$16 sps:$4 sm:$0xff]  }
 0x21b   :  { %5681 = vmatpush1.bf16.msra.mxu0 %v8117_v1  ;;  %v8207_v1 = vld [vmem:[%s11335_s1 + $0xec8] ss:$16 sps:$4 sm:$0xff]  }
 0x21c   :  { %5646 = vmatpush1.bf16.msra.mxu1 %v8114_v0  ;;  %5682 = vmatprep.subr.bf16.mxu0 %v8125_v3  ;;  %v8204_v0 = vld [vmem:[%s11335_s1 + $0xc48] ss:$16 sps:$4 sm:$0xff]   ;;  %v8215_v3 = vld [vmem:[%s11335_s1 + $0xeac] ss:$16 sps:$4 sm:$0xff]  }
 0x21d   :  { %5647 = vmatprep.subr.bf16.mxu1 %v8122_v2  ;;  %v8212_v2 = vld [vmem:[%s11335_s1 + $0xc2c] ss:$16 sps:$4 sm:$0xff]  }
 0x21f   :  { %5683 = vmatpush1.bf16.msra.mxu0 %v8123_v5  ;;  %v8210_v5 = vld [vmem:[%s11335_s1 + $0xc28] ss:$16 sps:$4 sm:$0xff]  }
 0x220   :  { %5648 = vmatpush1.bf16.msra.mxu1 %v8120_v4  ;;  %5684 = vmatprep.subr.bf16.mxu0 %v8131_v7  ;;  %v8531_v4 = vld [vmem:[%s11336_s0 + $0x3c] ss:$100 sps:$4 sm:$0xff]  }
 0x221   :  { %5649 = vmatprep.subr.bf16.mxu1 %v8128_v6  ;;  %v8213_v6 = vld [vmem:[%s11335_s1 + $0xea8] ss:$16 sps:$4 sm:$0xff]   ;;  %v8218_v7 = vld [vmem:[%s11335_s1 + $0xc0c] ss:$16 sps:$4 sm:$0xff]  }
 0x223   :  { %5685 = vmatpush1.bf16.msra.mxu0 %v8129_v9  ;;  %v8216_v9 = vld [vmem:[%s11335_s1 + $0xc08] ss:$16 sps:$4 sm:$0xff]  }
 0x224   :  { %5650 = vmatpush2.bf16.msra.mxu1 %v8126_v8  ;;  %5686 = vmatprep.subr.bf16.mxu0 %v8137_v11  ;;  %v8221_v8 = vld [vmem:[%s11335_s1 + $0xe8c] ss:$16 sps:$4 sm:$0xff]  }
 0x225   :  { %5651 = vmatprep.subr.bf16.mxu1 %v8134_v10  ;;  %v8219_v10 = vld [vmem:[%s11335_s1 + $0xe88] ss:$16 sps:$4 sm:$0xff]   ;;  %v8224_v11 = vld [vmem:[%s11335_s1 + $0xdec] ss:$16 sps:$4 sm:$0xff]  }
 0x227   :  { %5687 = vmatpush1.bf16.msra.mxu0 %v8135_v13  ;;  %v8222_v13 = vld [vmem:[%s11335_s1 + $0xde8] ss:$16 sps:$4 sm:$0xff]  }
 0x228   :  { %5652 = vmatpush2.bf16.msra.mxu1 %v8132_v12  ;;  %5688 = vmatprep.subr.bf16.mxu0 %v8143_v15  ;;  %v8227_v12 = vld [vmem:[%s11335_s1 + $0xe6c] ss:$16 sps:$4 sm:$0xff]  }
 0x229   :  { %5653 = vmatprep.subr.bf16.mxu1 %v8140_v14  ;;  %v8225_v14 = vld [vmem:[%s11335_s1 + $0xe68] ss:$16 sps:$4 sm:$0xff]   ;;  %v8230_v15 = vld [vmem:[%s11335_s1 + $0xdcc] ss:$16 sps:$4 sm:$0xff]  }
 0x22b   :  { %5689 = vmatpush1.bf16.msra.mxu0 %v8141_v17  ;;  %v8228_v17 = vld [vmem:[%s11335_s1 + $0xdc8] ss:$16 sps:$4 sm:$0xff]  }
 0x22c   :  { %5654 = vmatpush2.bf16.msra.mxu1 %v8138_v16  ;;  %5690 = vmatprep.subr.bf16.mxu0 %v8149_v19  ;;  %v8233_v16 = vld [vmem:[%s11335_s1 + $0xe4c] ss:$16 sps:$4 sm:$0xff]  }
 0x22d   :  { %5655 = vmatprep.subr.bf16.mxu1 %v8146_v18  ;;  %v8231_v18 = vld [vmem:[%s11335_s1 + $0xe48] ss:$16 sps:$4 sm:$0xff]   ;;  %v8236_v19 = vld [vmem:[%s11335_s1 + $0xdac] ss:$16 sps:$4 sm:$0xff]  }
 0x22f   :  { %5691 = vmatpush1.bf16.msra.mxu0 %v8147_v21  ;;  %v8234_v21 = vld [vmem:[%s11335_s1 + $0xda8] ss:$16 sps:$4 sm:$0xff]  }
 0x230   :  { %5656 = vmatpush2.bf16.msra.mxu1 %v8144_v20  ;;  %5692 = vmatprep.subr.bf16.mxu0 %v8155_v23  ;;  %v8239_v20 = vld [vmem:[%s11335_s1 + $0xe2c] ss:$16 sps:$4 sm:$0xff]  }
 0x231   :  { %5657 = vmatprep.subr.bf16.mxu1 %v8152_v22  ;;  %v8237_v22 = vld [vmem:[%s11335_s1 + $0xe28] ss:$16 sps:$4 sm:$0xff]   ;;  %v8242_v23 = vld [vmem:[%s11335_s1 + $0xd8c] ss:$16 sps:$4 sm:$0xff]  }
 0x233   :  { %5693 = vmatpush2.bf16.msra.mxu0 %v8153_v25  ;;  %v8240_v25 = vld [vmem:[%s11335_s1 + $0xd88] ss:$16 sps:$4 sm:$0xff]  }
 0x234   :  { %5658 = vmatpush2.bf16.msra.mxu1 %v8150_v24  ;;  %5694 = vmatprep.subr.bf16.mxu0 %v8161_v27  ;;  %v8245_v24 = vld [vmem:[%s11335_s1 + $0xe0c] ss:$16 sps:$4 sm:$0xff]  }
 0x235   :  { %5659 = vmatprep.subr.bf16.mxu1 %v8158_v26  ;;  %v8243_v26 = vld [vmem:[%s11335_s1 + $0xe08] ss:$16 sps:$4 sm:$0xff]   ;;  %v8248_v27 = vld [vmem:[%s11335_s1 + $0xd6c] ss:$16 sps:$4 sm:$0xff]  }
 0x237   :  { %5695 = vmatpush2.bf16.msra.mxu0 %v8159_v29  ;;  %v8246_v29 = vld [vmem:[%s11335_s1 + $0xd68] ss:$16 sps:$4 sm:$0xff]  }
 0x238   :  { %5660 = vmatpush2.bf16.msra.mxu1 %v8156_v28  ;;  %5696 = vmatprep.subr.bf16.mxu0 %v8167_v31  ;;  %v8251_v28 = vld [vmem:[%s11335_s1 + $0xfec] ss:$16 sps:$4 sm:$0xff]  }
 0x239   :  { %5661 = vmatprep.subr.bf16.mxu1 %v8164_v30  ;;  %v8249_v30 = vld [vmem:[%s11335_s1 + $0xfe8] ss:$16 sps:$4 sm:$0xff]   ;;  %v8254_v31 = vld [vmem:[%s11335_s1 + $0xd4c] ss:$16 sps:$4 sm:$0xff]  }
 0x23b   :  { %5697 = vmatpush2.bf16.msra.mxu0 %v8165_v33  ;;  %v8252_v33 = vld [vmem:[%s11335_s1 + $0xd48] ss:$16 sps:$4 sm:$0xff]  }
 0x23c   :  { %5662 = vmatpush2.bf16.msra.mxu1 %v8162_v32  ;;  %5698 = vmatprep.subr.bf16.mxu0 %v8173_v35  ;;  %v8257_v32 = vld [vmem:[%s11335_s1 + $0xfcc] ss:$16 sps:$4 sm:$0xff]  }
 0x23d   :  { %5663 = vmatprep.subr.bf16.mxu1 %v8170_v34  ;;  %v8255_v34 = vld [vmem:[%s11335_s1 + $0xfc8] ss:$16 sps:$4 sm:$0xff]   ;;  %v8260_v35 = vld [vmem:[%s11335_s1 + $0xd2c] ss:$16 sps:$4 sm:$0xff]  }
 0x23f   :  { %5699 = vmatpush2.bf16.msra.mxu0 %v8171_v38  ;;  %v8258_v38 = vld [vmem:[%s11335_s1 + $0xd28] ss:$16 sps:$4 sm:$0xff]  }
 0x240   :  { %5664 = vmatpush2.bf16.msra.mxu1 %v8168_v37  ;;  %5700 = vmatprep.subr.bf16.mxu0 %v8176_v39  ;;  %v8263_v37 = vld [vmem:[%s11335_s1 + $0xfac] ss:$16 sps:$4 sm:$0xff]   ;;  %v8261_v39 = vld [vmem:[%s11335_s1 + $0xfa8] ss:$16 sps:$4 sm:$0xff]  }
 0x241   :  { %5719 = vmatprep.subr.bf16.mxu1 %v8179_v40  ;;  %v8266_v40 = vld [vmem:[%s11335_s1 + $0xd0c] ss:$16 sps:$4 sm:$0xff]  }
 0x243   :  { %5666 = vmatmul.mubr.bf16.vlgmr.msra.gmra.mxu1 %v8528_v45  ;;  %5701 = vmatpush2.bf16.msra.mxu0 %v8174_v41  ;;  %v8269_v41 = vld [vmem:[%s11335_s1 + $0xf8c] ss:$16 sps:$4 sm:$0xff]  }
 0x244   :  { %5720 = vmatpush1.bf16.msra.mxu1 %v8177_v42  ;;  %5702 = vmatprep.subr.bf16.mxu0 %v8182_v43  ;;  %v8264_v42 = vld [vmem:[%s11335_s1 + $0xd08] ss:$16 sps:$4 sm:$0xff]   ;;  %v8275_v45 = vld [vmem:[%s11335_s1 + $0x10ec] ss:$16 sps:$4 sm:$0xff]  }
 0x245   :  { %5721 = vmatprep.subr.bf16.mxu1 %v8185_v44  ;;  %5751 = vmatprep.mubr.bf16.mxu1 %v8529_v50  ;;  %v8267_v43 = vld [vmem:[%s11335_s1 + $0xf88] ss:$16 sps:$4 sm:$0xff]   ;;  %v8272_v44 = vld [vmem:[%s11335_s1 + $0xf6c] ss:$16 sps:$4 sm:$0xff]   ;;  %v8532_v50 = vld [vmem:[%s11336_s0 + $0x30] ss:$100 sps:$4 sm:$0xff]  }
 0x247   :  { %5703 = vmatpush2.bf16.msra.mxu0 %v8180_v46  ;;  %v8270_v46 = vld [vmem:[%s11335_s1 + $0xf68] ss:$16 sps:$4 sm:$0xff]  }
 0x248   :  { %5722 = vmatpush1.bf16.msra.mxu1 %v8183_v47  ;;  %5704 = vmatprep.subr.bf16.mxu0 %v8188_v48  ;;  %v8273_v47 = vld [vmem:[%s11335_s1 + $0x10e8] ss:$16 sps:$4 sm:$0xff]   ;;  %v8278_v48 = vld [vmem:[%s11335_s1 + $0xf4c] ss:$16 sps:$4 sm:$0xff]  }
 0x249   :  { %5723 = vmatprep.subr.bf16.mxu1 %v8191_v49  ;;  %v8281_v49 = vld [vmem:[%s11335_s1 + $0x10cc] ss:$16 sps:$4 sm:$0xff]  }
 0x24b   :  { %5705 = vmatpush2.bf16.msra.mxu0 %v8186_v51  ;;  %v8276_v51 = vld [vmem:[%s11335_s1 + $0xf48] ss:$16 sps:$4 sm:$0xff]  }
 0x24c   :  { %5724 = vmatpush1.bf16.msra.mxu1 %v8189_v52  ;;  %5706 = vmatprep.subr.bf16.mxu0 %v8194_v53  ;;  %v8279_v52 = vld [vmem:[%s11335_s1 + $0x10c8] ss:$16 sps:$4 sm:$0xff]   ;;  %v8284_v53 = vld [vmem:[%s11335_s1 + $0xf2c] ss:$16 sps:$4 sm:$0xff]  }
 0x24d   :  { %5725 = vmatprep.subr.bf16.mxu1 %v8197_v54  ;;  %v8287_v54 = vld [vmem:[%s11335_s1 + $0x10ac] ss:$16 sps:$4 sm:$0xff]  }
 0x24f   :  { %5707 = vmatpush2.bf16.msra.mxu0 %v8192_v55  ;;  %v8533_v55 = vld [vmem:[%s11336_s0 + $0x44] ss:$100 sps:$4 sm:$0xff]  }
 0x250   :  { %5726 = vmatpush1.bf16.msra.mxu1 %v8195_v56  ;;  %5762 = vmatprep.subr.bf16.mxu0 %v8203_v58  ;;  %v8282_v56 = vld [vmem:[%s11335_s1 + $0xf28] ss:$16 sps:$4 sm:$0xff]   ;;  %v8290_v58 = vld [vmem:[%s11335_s1 + $0xf0c] ss:$16 sps:$4 sm:$0xff]  }
 0x251   :  { %5727 = vmatprep.subr.bf16.mxu1 %v8200_v57  ;;  %v8285_v57 = vld [vmem:[%s11335_s1 + $0x10a8] ss:$16 sps:$4 sm:$0xff]  }
 0x252   :  { %5709 = vmatmul.mubr.bf16.vlgmr.msra.gmra.mxu0 %v8530_v63  ;;  %v8299_v63 = vld [vmem:[%s11335_s1 + $0x12ec] ss:$16 sps:$4 sm:$0xff]  }
 0x253   :  { %5763 = vmatpush1.bf16.msra.mxu0 %v8201_v60  ;;  %5794 = vmatprep.mubr.bf16.mxu0 %v8531_v4  ;;  %v8288_v60 = vld [vmem:[%s11335_s1 + $0xf08] ss:$16 sps:$4 sm:$0xff]  }
 0x254   :  { %5728 = vmatpush1.bf16.msra.mxu1 %v8198_v59  ;;  %5764 = vmatprep.subr.bf16.mxu0 %v8209_v62  ;;  %v8293_v59 = vld [vmem:[%s11335_s1 + $0x108c] ss:$16 sps:$4 sm:$0xff]   ;;  %v8300_v4 = vld [vmem:[%s11335_s1 + $0x1048] ss:$16 sps:$4 sm:$0xff]  }
 0x255   :  { %5729 = vmatprep.subr.bf16.mxu1 %v8206_v61  ;;  %v8291_v61 = vld [vmem:[%s11335_s1 + $0x1088] ss:$16 sps:$4 sm:$0xff]   ;;  %v8296_v62 = vld [vmem:[%s11335_s1 + $0x106c] ss:$16 sps:$4 sm:$0xff]  }
 0x257   :  { %5765 = vmatpush1.bf16.msra.mxu0 %v8207_v1  ;;  %v8297_v1 = vld [vmem:[%s11335_s1 + $0x12e8] ss:$16 sps:$4 sm:$0xff]  }
 0x258   :  { %5730 = vmatpush1.bf16.msra.mxu1 %v8204_v0  ;;  %5766 = vmatprep.subr.bf16.mxu0 %v8215_v3  ;;  %v8294_v0 = vld [vmem:[%s11335_s1 + $0x1068] ss:$16 sps:$4 sm:$0xff]   ;;  %v8305_v3 = vld [vmem:[%s11335_s1 + $0x12cc] ss:$16 sps:$4 sm:$0xff]  }
 0x259   :  { %5731 = vmatprep.subr.bf16.mxu1 %v8212_v2  ;;  %v8302_v2 = vld [vmem:[%s11335_s1 + $0x104c] ss:$16 sps:$4 sm:$0xff]  }
 0x25b   :  { %5767 = vmatpush1.bf16.msra.mxu0 %v8213_v6  ;;  %v8534_v6 = vld [vmem:[%s11336_s0 + $0x38] ss:$100 sps:$4 sm:$0xff]  }
 0x25c   :  { %5732 = vmatpush1.bf16.msra.mxu1 %v8210_v5  ;;  %5768 = vmatprep.subr.bf16.mxu0 %v8221_v8  ;;  %v8303_v5 = vld [vmem:[%s11335_s1 + $0x12c8] ss:$16 sps:$4 sm:$0xff]   ;;  %v8311_v8 = vld [vmem:[%s11335_s1 + $0x12ac] ss:$16 sps:$4 sm:$0xff]  }
 0x25d   :  { %5733 = vmatprep.subr.bf16.mxu1 %v8218_v7  ;;  %v8308_v7 = vld [vmem:[%s11335_s1 + $0x102c] ss:$16 sps:$4 sm:$0xff]  }
 0x25f   :  { %5769 = vmatpush1.bf16.msra.mxu0 %v8219_v10  ;;  %v8309_v10 = vld [vmem:[%s11335_s1 + $0x12a8] ss:$16 sps:$4 sm:$0xff]  }
 0x260   :  { %5734 = vmatpush1.bf16.msra.mxu1 %v8216_v9  ;;  %5770 = vmatprep.subr.bf16.mxu0 %v8227_v12  ;;  %v8306_v9 = vld [vmem:[%s11335_s1 + $0x1028] ss:$16 sps:$4 sm:$0xff]   ;;  %v8314_v12 = vld [vmem:[%s11335_s1 + $0x100c] ss:$16 sps:$4 sm:$0xff]  }
 0x261   :  { %5735 = vmatprep.subr.bf16.mxu1 %v8224_v11  ;;  %v8535_v11 = vld [vmem:[%s11336_s0 + $0x4c] ss:$100 sps:$4 sm:$0xff]  }
 0x263   :  { %5771 = vmatpush1.bf16.msra.mxu0 %v8225_v14  ;;  %v8312_v14 = vld [vmem:[%s11335_s1 + $0x1008] ss:$16 sps:$4 sm:$0xff]  }
 0x264   :  { %5736 = vmatpush2.bf16.msra.mxu1 %v8222_v13  ;;  %5772 = vmatprep.subr.bf16.mxu0 %v8233_v16  ;;  %v8317_v13 = vld [vmem:[%s11335_s1 + $0x128c] ss:$16 sps:$4 sm:$0xff]  }
 0x265   :  { %5737 = vmatprep.subr.bf16.mxu1 %v8230_v15  ;;  %v8315_v15 = vld [vmem:[%s11335_s1 + $0x1288] ss:$16 sps:$4 sm:$0xff]   ;;  %v8320_v16 = vld [vmem:[%s11335_s1 + $0x11ec] ss:$16 sps:$4 sm:$0xff]  }
 0x267   :  { %5773 = vmatpush1.bf16.msra.mxu0 %v8231_v18  ;;  %v8318_v18 = vld [vmem:[%s11335_s1 + $0x11e8] ss:$16 sps:$4 sm:$0xff]  }
 0x268   :  { %5738 = vmatpush2.bf16.msra.mxu1 %v8228_v17  ;;  %5774 = vmatprep.subr.bf16.mxu0 %v8239_v20  ;;  %v8323_v17 = vld [vmem:[%s11335_s1 + $0x126c] ss:$16 sps:$4 sm:$0xff]  }
 0x269   :  { %5739 = vmatprep.subr.bf16.mxu1 %v8236_v19  ;;  %v8321_v19 = vld [vmem:[%s11335_s1 + $0x1268] ss:$16 sps:$4 sm:$0xff]   ;;  %v8326_v20 = vld [vmem:[%s11335_s1 + $0x11cc] ss:$16 sps:$4 sm:$0xff]  }
 0x26b   :  { %5775 = vmatpush1.bf16.msra.mxu0 %v8237_v22  ;;  %v8324_v22 = vld [vmem:[%s11335_s1 + $0x11c8] ss:$16 sps:$4 sm:$0xff]  }
 0x26c   :  { %5740 = vmatpush2.bf16.msra.mxu1 %v8234_v21  ;;  %5776 = vmatprep.subr.bf16.mxu0 %v8245_v24  ;;  %v8329_v21 = vld [vmem:[%s11335_s1 + $0x124c] ss:$16 sps:$4 sm:$0xff]  }
 0x26d   :  { %5741 = vmatprep.subr.bf16.mxu1 %v8242_v23  ;;  %v8327_v23 = vld [vmem:[%s11335_s1 + $0x1248] ss:$16 sps:$4 sm:$0xff]   ;;  %v8332_v24 = vld [vmem:[%s11335_s1 + $0x11ac] ss:$16 sps:$4 sm:$0xff]  }
 0x26f   :  { %5777 = vmatpush1.bf16.msra.mxu0 %v8243_v26  ;;  %v8330_v26 = vld [vmem:[%s11335_s1 + $0x11a8] ss:$16 sps:$4 sm:$0xff]  }
 0x270   :  { %5742 = vmatpush2.bf16.msra.mxu1 %v8240_v25  ;;  %5778 = vmatprep.subr.bf16.mxu0 %v8251_v28  ;;  %v8335_v25 = vld [vmem:[%s11335_s1 + $0x122c] ss:$16 sps:$4 sm:$0xff]   ;;  %v10757_v28 = vpop.f32.mrf.mxu0 }
 0x271   :  { %5743 = vmatprep.subr.bf16.mxu1 %v8248_v27  ;;  %v8333_v27 = vld [vmem:[%s11335_s1 + $0x1228] ss:$16 sps:$4 sm:$0xff]  }
 0x273   :  { %5779 = vmatpush2.bf16.msra.mxu0 %v8249_v30  ;;  %v8341_v30 = vld [vmem:[%s11335_s1 + $0x120c] ss:$16 sps:$4 sm:$0xff]  }
 0x274   :  { %5744 = vmatpush2.bf16.msra.mxu1 %v8246_v29  ;;  %5780 = vmatprep.subr.bf16.mxu0 %v8257_v32  ;;  %v8338_v29 = vld [vmem:[%s11335_s1 + $0x118c] ss:$16 sps:$4 sm:$0xff]   ;;  %v8336_v32 = vld [vmem:[%s11335_s1 + $0x1188] ss:$16 sps:$4 sm:$0xff]  }
 0x275   :  { %5745 = vmatprep.subr.bf16.mxu1 %v8254_v31  ;;  %v10765_v31 = vpop.f32.mrf.mxu0 }
 0x277   :  { %5781 = vmatpush2.bf16.msra.mxu0 %v8255_v34  ;;  %v8344_v34 = vld [vmem:[%s11335_s1 + $0x116c] ss:$16 sps:$4 sm:$0xff]  }
 0x278   :  { %5746 = vmatpush2.bf16.msra.mxu1 %v8252_v33  ;;  %5782 = vmatprep.subr.bf16.mxu0 %v8263_v37  ;;  %v8339_v33 = vld [vmem:[%s11335_s1 + $0x1208] ss:$16 sps:$4 sm:$0xff]   ;;  %v10779_v37 = vpop.f32.mrf.mxu0 }
 0x279   :  { %5747 = vmatprep.subr.bf16.mxu1 %v8260_v35  ;;  %v8347_v35 = vld [vmem:[%s11335_s1 + $0x13ec] ss:$16 sps:$4 sm:$0xff]  }
 0x27b   :  { %5783 = vmatpush2.bf16.msra.mxu0 %v8261_v39  ;;  %v8345_v39 = vld [vmem:[%s11335_s1 + $0x13e8] ss:$16 sps:$4 sm:$0xff]  }
 0x27c   :  { %5748 = vmatpush2.bf16.msra.mxu1 %v8258_v38  ;;  %5784 = vmatprep.subr.bf16.mxu0 %v8269_v41  ;;  %v8342_v38 = vld [vmem:[%s11335_s1 + $0x1168] ss:$16 sps:$4 sm:$0xff]   ;;  %v8353_v41 = vld [vmem:[%s11335_s1 + $0x13cc] ss:$16 sps:$4 sm:$0xff]  }
 0x27d   :  { %5749 = vmatprep.subr.bf16.mxu1 %v8266_v40  ;;  %v8350_v40 = vld [vmem:[%s11335_s1 + $0x114c] ss:$16 sps:$4 sm:$0xff]  }
 0x27f   :  { %5785 = vmatpush2.bf16.msra.mxu0 %v8267_v43  ;;  %v8348_v43 = vld [vmem:[%s11335_s1 + $0x1148] ss:$16 sps:$4 sm:$0xff]  }
 0x280   :  { %5750 = vmatpush2.bf16.msra.mxu1 %v8264_v42  ;;  %5786 = vmatprep.subr.bf16.mxu0 %v8272_v44  ;;  %v10793_v42 = vpop.f32.mrf.mxu0  ;;  %v8351_v44 = vld [vmem:[%s11335_s1 + $0x13c8] ss:$16 sps:$4 sm:$0xff]  }
 0x281   :  { %5805 = vmatprep.subr.bf16.mxu1 %v8275_v45  ;;  %v10801_v45 = vpop.f32.mrf.mxu1 }
 0x283   :  { %5752 = vmatmul.mubr.bf16.vlgmr.msra.gmra.mxu1 %v8532_v50  ;;  %5787 = vmatpush2.bf16.msra.mxu0 %v8270_v46  ;;  %v10803_v46 = vpop.f32.mrf.mxu0  ;;  %v8357_v50 = vld [vmem:[%s11335_s1 + $0x13a8] ss:$16 sps:$4 sm:$0xff]  }
 0x284   :  { %5806 = vmatpush1.bf16.msra.mxu1 %v8273_v47  ;;  %5788 = vmatprep.subr.bf16.mxu0 %v8278_v48  ;;  %v8356_v47 = vld [vmem:[%s11335_s1 + $0x112c] ss:$16 sps:$4 sm:$0xff]  }
 0x285   :  { %5807 = vmatprep.subr.bf16.mxu1 %v8281_v49  ;;  %5837 = vmatprep.mubr.bf16.mxu1 %v8533_v55  ;;  %v8359_v48 = vld [vmem:[%s11335_s1 + $0x13ac] ss:$16 sps:$4 sm:$0xff]   ;;  %v8354_v49 = vld [vmem:[%s11335_s1 + $0x1128] ss:$16 sps:$4 sm:$0xff]  }
 0x286   :  { %v8360_v55 = vld [vmem:[%s11335_s1 + $0x1108] ss:$16 sps:$4 sm:$0xff]  }
 0x287   :  { %5789 = vmatpush2.bf16.msra.mxu0 %v8276_v51  ;;  %v10817_v51 = vpop.f32.mrf.mxu1 }
 0x288   :  { %5808 = vmatpush1.bf16.msra.mxu1 %v8279_v52  ;;  %5790 = vmatprep.subr.bf16.mxu0 %v8284_v53  ;;  %v10819_v52 = vpop.f32.mrf.mxu0  ;;  %v8362_v53 = vld [vmem:[%s11335_s1 + $0x110c] ss:$16 sps:$4 sm:$0xff]  }
 0x289   :  { %5809 = vmatprep.subr.bf16.mxu1 %v8287_v54  ;;  %v8365_v54 = vld [vmem:[%s11335_s1 + $0x138c] ss:$16 sps:$4 sm:$0xff]  }
 0x28b   :  { %5791 = vmatpush2.bf16.msra.mxu0 %v8282_v56  ;;  %v8363_v56 = vld [vmem:[%s11335_s1 + $0x1388] ss:$16 sps:$4 sm:$0xff]  }
 0x28c   :  { %5810 = vmatpush1.bf16.msra.mxu1 %v8285_v57  ;;  %5792 = vmatprep.subr.bf16.mxu0 %v8290_v58  ;;  %v10833_v57 = vpop.f32.mrf.mxu1  ;;  %v10835_v58 = vpop.f32.mrf.mxu0 }
 0x28d   :  { %5811 = vmatprep.subr.bf16.mxu1 %v8293_v59  ;;  %v8368_v59 = vld [vmem:[%s11335_s1 + $0x136c] ss:$16 sps:$4 sm:$0xff]  }
 0x28f   :  { %5793 = vmatpush2.bf16.msra.mxu0 %v8288_v60  ;;  %v8371_v60 = vld [vmem:[%s11335_s1 + $0x14ec] ss:$16 sps:$4 sm:$0xff]  }
 0x290   :  { %5812 = vmatpush1.bf16.msra.mxu1 %v8291_v61  ;;  %5848 = vmatprep.subr.bf16.mxu0 %v8299_v63  ;;  %v8366_v61 = vld [vmem:[%s11335_s1 + $0x1368] ss:$16 sps:$4 sm:$0xff]   ;;  %v10849_v63 = vpop.f32.mrf.mxu1 }
 0x291   :  { %5813 = vmatprep.subr.bf16.mxu1 %v8296_v62  ;;  %v8369_v62 = vld [vmem:[%s11335_s1 + $0x14e8] ss:$16 sps:$4 sm:$0xff]  }
 0x292   :  { %5795 = vmatmul.mubr.bf16.vlgmr.msra.gmra.mxu0 %v8534_v6  ;;  %v8372_v6 = vld [vmem:[%s11335_s1 + $0x1348] ss:$16 sps:$4 sm:$0xff]  }
 0x293   :  { %5849 = vmatpush1.bf16.msra.mxu0 %v8297_v1  ;;  %5880 = vmatprep.mubr.bf16.mxu0 %v8535_v11  ;;  %v8374_v1 = vld [vmem:[%s11335_s1 + $0x134c] ss:$16 sps:$4 sm:$0xff]  }
 0x294   :  { %5814 = vmatpush1.bf16.msra.mxu1 %v8294_v0  ;;  %5850 = vmatprep.subr.bf16.mxu0 %v8305_v3  ;;  %v10851_v0 = vpop.f32.mrf.mxu0  ;;  %v10859_v3 = vpop.f32.mrf.mxu1 }
 0x295   :  { %5815 = vmatprep.subr.bf16.mxu1 %v8302_v2  ;;  %v8377_v2 = vld [vmem:[%s11335_s1 + $0x14cc] ss:$16 sps:$4 sm:$0xff]  }
 0x296   :  { %v10881_v11 = vpop.f32.mrf.mxu1 }
 0x297   :  { %5851 = vmatpush1.bf16.msra.mxu0 %v8303_v5  ;;  %v8536_v5 = vld [vmem:[%s11336_s0 + $0x40] ss:$100 sps:$4 sm:$0xff]  }
 0x298   :  { %5816 = vmatpush1.bf16.msra.mxu1 %v8300_v4  ;;  %5852 = vmatprep.subr.bf16.mxu0 %v8311_v8  ;;  %v10861_v4 = vpop.f32.mrf.mxu0  ;;  %v8380_v8 = vld [vmem:[%s11335_s1 + $0x132c] ss:$16 sps:$4 sm:$0xff]  }
 0x299   :  { %5817 = vmatprep.subr.bf16.mxu1 %v8308_v7  ;;  %v8375_v7 = vld [vmem:[%s11335_s1 + $0x14c8] ss:$16 sps:$4 sm:$0xff]  }
 0x29b   :  { %5853 = vmatpush1.bf16.msra.mxu0 %v8309_v10  ;;  %v8537_v10 = vld [vmem:[%s11336_s0 + $0x54] ss:$100 sps:$4 sm:$0xff]  }
 0x29c   :  { %5818 = vmatpush1.bf16.msra.mxu1 %v8306_v9  ;;  %5854 = vmatprep.subr.bf16.mxu0 %v8317_v13  ;;  %v8383_v9 = vld [vmem:[%s11335_s1 + $0x14ac] ss:$16 sps:$4 sm:$0xff]   ;;  %v8378_v13 = vld [vmem:[%s11335_s1 + $0x1328] ss:$16 sps:$4 sm:$0xff]  }
 0x29d   :  { %5819 = vmatprep.subr.bf16.mxu1 %v8314_v12  ;;  %v10883_v12 = vpop.f32.mrf.mxu0 }
 0x29f   :  { %5855 = vmatpush1.bf16.msra.mxu0 %v8315_v15  ;;  %v8386_v15 = vld [vmem:[%s11335_s1 + $0x130c] ss:$16 sps:$4 sm:$0xff]  }
 0x2a0   :  { %5820 = vmatpush1.bf16.msra.mxu1 %v8312_v14  ;;  %5856 = vmatprep.subr.bf16.mxu0 %v8323_v17  ;;  %v8381_v14 = vld [vmem:[%s11335_s1 + $0x14a8] ss:$16 sps:$4 sm:$0xff]   ;;  %v10897_v17 = vpop.f32.mrf.mxu1 }
 0x2a1   :  { %5821 = vmatprep.subr.bf16.mxu1 %v8320_v16  ;;  %v8389_v16 = vld [vmem:[%s11335_s1 + $0x148c] ss:$16 sps:$4 sm:$0xff]  }
 0x2a3   :  { %5857 = vmatpush1.bf16.msra.mxu0 %v8321_v19  ;;  %v8384_v19 = vld [vmem:[%s11335_s1 + $0x1308] ss:$16 sps:$4 sm:$0xff]  }
 0x2a4   :  { %5822 = vmatpush2.bf16.msra.mxu1 %v8318_v18  ;;  %5858 = vmatprep.subr.bf16.mxu0 %v8329_v21  ;;  %v10899_v18 = vpop.f32.mrf.mxu0  ;;  %v8392_v21 = vld [vmem:[%s11335_s1 + $0x146c] ss:$16 sps:$4 sm:$0xff]  }
 0x2a5   :  { %5823 = vmatprep.subr.bf16.mxu1 %v8326_v20  ;;  %v8387_v20 = vld [vmem:[%s11335_s1 + $0x1488] ss:$16 sps:$4 sm:$0xff]  }
 0x2a7   :  { %5859 = vmatpush1.bf16.msra.mxu0 %v8327_v23  ;;  %v10913_v23 = vpop.f32.mrf.mxu1 }
 0x2a8   :  { %5824 = vmatpush2.bf16.msra.mxu1 %v8324_v22  ;;  %5860 = vmatprep.subr.bf16.mxu0 %v8335_v25  ;;  %v8395_v22 = vld [vmem:[%s11335_s1 + $0x16ec] ss:$16 sps:$4 sm:$0xff]   ;;  %v8390_v25 = vld [vmem:[%s11335_s1 + $0x1468] ss:$16 sps:$4 sm:$0xff]  }
 0x2a9   :  { %5825 = vmatprep.subr.bf16.mxu1 %v8332_v24  ;;  %v10915_v24 = vpop.f32.mrf.mxu0 }
 0x2ab   :  { %5861 = vmatpush1.bf16.msra.mxu0 %v8333_v27  ;;  %v10923_v27 = vpop.f32.mrf.mxu1 }
 0x2ac   :  { %5826 = vmatpush2.bf16.msra.mxu1 %v8330_v26  ;;  %5862 = vmatprep.subr.bf16.mxu0 %v8341_v30  ;;  %v8393_v26 = vld [vmem:[%s11335_s1 + $0x16e8] ss:$16 sps:$4 sm:$0xff]   ;;  %v8398_v30 = vld [vmem:[%s11335_s1 + $0x144c] ss:$16 sps:$4 sm:$0xff]  }
 0x2ad   :  { %5827 = vmatprep.subr.bf16.mxu1 %v8338_v29  ;;  %v10925_v29 = vpop.f32.mrf.mxu0 }
 0x2af   :  { %5863 = vmatpush1.bf16.msra.mxu0 %v8339_v33  ;;  %v8538_v33 = vld [vmem:[%s11336_s0 + $0x48] ss:$100 sps:$4 sm:$0xff]  }
 0x2b0   :  { %5828 = vmatpush2.bf16.msra.mxu1 %v8336_v32  ;;  %5864 = vmatprep.subr.bf16.mxu0 %v8347_v35  ;;  %v8401_v32 = vld [vmem:[%s11335_s1 + $0x16cc] ss:$16 sps:$4 sm:$0xff]   ;;  %v8399_v35 = vld [vmem:[%s11335_s1 + $0x16c8] ss:$16 sps:$4 sm:$0xff]  }
 0x2b1   :  { %5829 = vmatprep.subr.bf16.mxu1 %v8344_v34  ;;  %v8396_v34 = vld [vmem:[%s11335_s1 + $0x1448] ss:$16 sps:$4 sm:$0xff]  }
 0x2b3   :  { %5865 = vmatpush2.bf16.msra.mxu0 %v8345_v39  ;;  %v10944_v39 = vpop.f32.mrf.mxu0 }
 0x2b4   :  { %5830 = vmatpush2.bf16.msra.mxu1 %v8342_v38  ;;  %5866 = vmatprep.subr.bf16.mxu0 %v8353_v41  ;;  %v10942_v38 = vpop.f32.mrf.mxu1  ;;  %v8407_v41 = vld [vmem:[%s11335_s1 + $0x16ac] ss:$16 sps:$4 sm:$0xff]  }
 0x2b5   :  { %5831 = vmatprep.subr.bf16.mxu1 %v8350_v40  ;;  %v8404_v40 = vld [vmem:[%s11335_s1 + $0x142c] ss:$16 sps:$4 sm:$0xff]  }
 0x2b7   :  { %5867 = vmatpush2.bf16.msra.mxu0 %v8351_v44  ;;  %v833_v44 = vlaneseq }
 0x2b8   :  { %5832 = vmatpush2.bf16.msra.mxu1 %v8348_v43  ;;  %5868 = vmatprep.subr.bf16.mxu0 %v8359_v48  ;;  %v8539_v43 = vld [vmem:[%s11336_s0 + $0x5c] ss:$100 sps:$4 sm:$0xff]   ;;  %v8405_v48 = vld [vmem:[%s11335_s1 + $0x16a8] ss:$16 sps:$4 sm:$0xff]  }
 0x2b9   :  { %5833 = vmatprep.subr.bf16.mxu1 %v8356_v47  ;;  %v8402_v47 = vld [vmem:[%s11335_s1 + $0x1428] ss:$16 sps:$4 sm:$0xff]  }
 0x2bb   :  { %5869 = vmatpush2.bf16.msra.mxu0 %v8357_v50  ;;  %v10963_v50 = vpop.f32.mrf.mxu0 }
 0x2bc   :  { %5834 = vmatpush2.bf16.msra.mxu1 %v8354_v49  ;;  %5870 = vmatprep.subr.bf16.mxu0 %v8365_v54  ;;  %v10961_v49 = vpop.f32.mrf.mxu1  ;;  %v8413_v54 = vld [vmem:[%s11335_s1 + $0x168c] ss:$16 sps:$4 sm:$0xff]  }
 0x2bd   :  { %5835 = vmatprep.subr.bf16.mxu1 %v8362_v53  ;;  %v8410_v53 = vld [vmem:[%s11335_s1 + $0x140c] ss:$16 sps:$4 sm:$0xff]  }
 0x2bf   :  { %5871 = vmatpush2.bf16.msra.mxu0 %v8363_v56  ;;  %v8408_v56 = vld [vmem:[%s11335_s1 + $0x1408] ss:$16 sps:$4 sm:$0xff]  }
 0x2c0   :  { %5836 = vmatpush2.bf16.msra.mxu1 %v8360_v55  ;;  %5872 = vmatprep.subr.bf16.mxu0 %v8368_v59  ;;  %v10971_v55 = vshrl.u32 %v833_v44, 7  ;;  %v8411_v59 = vld [vmem:[%s11335_s1 + $0x1688] ss:$16 sps:$4 sm:$0xff]  }
 0x2c1   :  { %5891 = vmatprep.subr.bf16.mxu1 %v8371_v60  ;;  %v10979_v60 = vpop.f32.mrf.mxu1 }
 0x2c3   :  { %5838 = vmatmul.mubr.bf16.vlgmr.msra.gmra.mxu1 %v8536_v5  ;;  %5873 = vmatpush2.bf16.msra.mxu0 %v8366_v61  ;;  %v10981_v61 = vpop.f32.mrf.mxu0 }
 0x2c4   :  { %5892 = vmatpush1.bf16.msra.mxu1 %v8369_v62  ;;  %5874 = vmatprep.subr.bf16.mxu0 %v8374_v1  ;;  %v8416_v62 = vld [vmem:[%s11335_s1 + $0x15ec] ss:$16 sps:$4 sm:$0xff]  }
 0x2c5   :  { %5893 = vmatprep.subr.bf16.mxu1 %v8377_v2  ;;  %5923 = vmatprep.mubr.bf16.mxu1 %v8537_v10  ;;  %v8419_v1 = vld [vmem:[%s11335_s1 + $0x166c] ss:$16 sps:$4 sm:$0xff]   ;;  %v10989_v2 = vpop.f32.mrf.mxu1  ;;  %v10991_v5 = vpop.f32.mrf.mxu0 }
 0x2c6   :  { %v8422_v10 = vld [vmem:[%s11335_s1 + $0x15cc] ss:$16 sps:$4 sm:$0xff]  }
 0x2c7   :  { %5875 = vmatpush2.bf16.msra.mxu0 %v8372_v6  ;;  %v839_v6 = vsub.s32 1, %v10971_v55 }
 0x2c8   :  { %5894 = vmatpush1.bf16.msra.mxu1 %v8375_v7  ;;  %5876 = vmatprep.subr.bf16.mxu0 %v8380_v8  ;;  %v8414_v7 = vld [vmem:[%s11335_s1 + $0x15e8] ss:$16 sps:$4 sm:$0xff]  }
 0x2c9   :  { %5895 = vmatprep.subr.bf16.mxu1 %v8383_v9  ;;  %v8417_v8 = vld [vmem:[%s11335_s1 + $0x1668] ss:$16 sps:$4 sm:$0xff]   ;;  %v11003_v9 = vld [vmem:[%s11338_s2] sm:$0xf] }
 0x2cb   :  { %5877 = vmatpush2.bf16.msra.mxu0 %v8378_v13  ;;  %v8425_v13 = vld [vmem:[%s11335_s1 + $0x164c] ss:$16 sps:$4 sm:$0xff]  }
 0x2cc   :  { %5896 = vmatpush1.bf16.msra.mxu1 %v8381_v14  ;;  %5878 = vmatprep.subr.bf16.mxu0 %v8386_v15  ;;  %v11011_v14 = vpop.f32.mrf.mxu1  ;;  %v11013_v15 = vpop.f32.mrf.mxu0 }
 0x2cd   :  { %5897 = vmatprep.subr.bf16.mxu1 %v8389_v16  ;;  %v840_v16 = vrot.slane %v11003_v9, %v839_v6 }
 0x2cf   :  { %5879 = vmatpush2.bf16.msra.mxu0 %v8384_v19  ;;  %v8420_v19 = vld [vmem:[%s11335_s1 + $0x15c8] ss:$16 sps:$4 sm:$0xff]  }
 0x2d0   :  { %5898 = vmatpush1.bf16.msra.mxu1 %v8387_v20  ;;  %5934 = vmatprep.subr.bf16.mxu0 %v8395_v22  ;;  %v8423_v20 = vld [vmem:[%s11335_s1 + $0x1648] ss:$16 sps:$4 sm:$0xff]   ;;  %v8431_v22 = vld [vmem:[%s11335_s1 + $0x162c] ss:$16 sps:$4 sm:$0xff]  }
 0x2d1   :  { %5899 = vmatprep.subr.bf16.mxu1 %v8392_v21  ;;  %v8428_v21 = vld [vmem:[%s11335_s1 + $0x15ac] ss:$16 sps:$4 sm:$0xff]  }
 0x2d2   :  { %5881 = vmatmul.mubr.bf16.vlgmr.msra.gmra.mxu0 %v8538_v33  ;;  %v8426_v33 = vld [vmem:[%s11335_s1 + $0x15a8] ss:$16 sps:$4 sm:$0xff]  }
 0x2d3   :  { %5935 = vmatpush1.bf16.msra.mxu0 %v8393_v26  ;;  %5966 = vmatprep.mubr.bf16.mxu0 %v8539_v43  ;;  %v11029_v26 = vpop.f32.mrf.mxu1 }
 0x2d4   :  { %5900 = vmatpush1.bf16.msra.mxu1 %v8390_v25  ;;  %5936 = vmatprep.subr.bf16.mxu0 %v8401_v32  ;;  %v4943_v25 = vadd.f32 %v10793_v42, %v840_v16  ;;  %v4939_v32 = vadd.f32 %v10765_v31, %v840_v16  ;;  %v8434_v42 = vld [vmem:[%s11335_s1 + $0x158c] ss:$16 sps:$4 sm:$0xff]   ;;  %v8447_v16 = vld [vmem:[%s11335_s1 + $0x17c8] ss:$16 sps:$4 sm:$0xff]  }
 0x2d5   :  { %5901 = vmatprep.subr.bf16.mxu1 %v8398_v30  ;;  %v11031_v30 = vpop.f32.mrf.mxu0  ;;  %v8437_v31 = vld [vmem:[%s11335_s1 + $0x160c] ss:$16 sps:$4 sm:$0xff]  }
 0x2d6   :  { %v4982_v43 = vadd.f32 %v10817_v51, %v4939_v32  ;;  %v8440_v51 = vld [vmem:[%s11335_s1 + $0x156c] ss:$16 sps:$4 sm:$0xff]   ;;  %v8453_v32 = vld [vmem:[%s11335_s1 + $0x17a8] ss:$16 sps:$4 sm:$0xff]  }
 0x2d7   :  { %5937 = vmatpush1.bf16.msra.mxu0 %v8399_v35  ;;  %v4986_v35 = vadd.f32 %v10849_v63, %v4943_v25  ;;  %v8450_v25 = vld [vmem:[%s11335_s1 + $0x1528] ss:$16 sps:$4 sm:$0xff]  }
 0x2d8   :  { %5902 = vmatpush1.bf16.msra.mxu1 %v8396_v34  ;;  %5938 = vmatprep.subr.bf16.mxu0 %v8407_v41  ;;  %v8429_v34 = vld [vmem:[%s11335_s1 + $0x1628] ss:$16 sps:$4 sm:$0xff]   ;;  %v11047_v41 = vpop.f32.mrf.mxu0 }
 0x2d9   :  { %5903 = vmatprep.subr.bf16.mxu1 %v8404_v40  ;;  %v5243_v40 = vpop.f32.mrf.mxu1  ;;  %v5029_v44 = vadd.f32 %v10851_v0, %v4986_v35  ;;  %v8443_v0 = vld [vmem:[%s11335_s1 + $0x17ec] ss:$16 sps:$4 sm:$0xff]  }
 0x2da   :  { %v11059_v63 = vpop.f32.mrf.mxu0 }
 0x2db   :  { %5939 = vmatpush1.bf16.msra.mxu0 %v8405_v48  ;;  %v8435_v48 = vld [vmem:[%s11335_s1 + $0x1608] ss:$16 sps:$4 sm:$0xff]  }
 0x2dc   :  { %5904 = vmatpush1.bf16.msra.mxu1 %v8402_v47  ;;  %5940 = vmatprep.subr.bf16.mxu0 %v8413_v54  ;;  %v8432_v47 = vld [vmem:[%s11335_s1 + $0x1588] ss:$16 sps:$4 sm:$0xff]   ;;  %v5025_v54 = vadd.f32 %v10819_v52, %v4982_v43  ;;  %v11077_v6 = vpop.f32.mrf.mxu0  ;;  %v8446_v52 = vld [vmem:[%s11335_s1 + $0x154c] ss:$16 sps:$4 sm:$0xff]  }
 0x2dd   :  { %5905 = vmatprep.subr.bf16.mxu1 %v8410_v53  ;;  %v11057_v53 = vpop.f32.mrf.mxu1  ;;  %v8456_v43 = vld [vmem:[%s11335_s1 + $0x1508] ss:$16 sps:$4 sm:$0xff]  }
 0x2df   :  { %5941 = vmatpush1.bf16.msra.mxu0 %v8411_v59  ;;  %v8438_v59 = vld [vmem:[%s11335_s1 + $0x1568] ss:$16 sps:$4 sm:$0xff]  }
 0x2e0   :  { %5906 = vmatpush1.bf16.msra.mxu1 %v8408_v56  ;;  %5942 = vmatprep.subr.bf16.mxu0 %v8419_v1  ;;  %v5072_v56 = vadd.f32 %v10913_v23, %v5029_v44  ;;  %v11075_v1 = vpop.f32.mrf.mxu1  ;;  %v8449_v23 = vld [vmem:[%s11335_s1 + $0x17cc] ss:$16 sps:$4 sm:$0xff]   ;;  %v8459_v44 = vld [vmem:[%s11335_s1 + $0x1788] ss:$16 sps:$4 sm:$0xff]  }
 0x2e1   :  { %5907 = vmatprep.subr.bf16.mxu1 %v8416_v62  ;;  %v8441_v62 = vld [vmem:[%s11335_s1 + $0x17e8] ss:$16 sps:$4 sm:$0xff]  }
 0x2e3   :  { %5943 = vmatpush1.bf16.msra.mxu0 %v8417_v8  ;;  %v5115_v8 = vadd.f32 %v10915_v24, %v5072_v56 }
 0x2e4   :  { %5908 = vmatpush2.bf16.msra.mxu1 %v8414_v7  ;;  %5944 = vmatprep.subr.bf16.mxu0 %v8425_v13  ;;  %v5068_v7 = vadd.f32 %v10881_v11, %v5025_v54  ;;  %v8444_v13 = vld [vmem:[%s11335_s1 + $0x1548] ss:$16 sps:$4 sm:$0xff]   ;;  %v8452_v11 = vld [vmem:[%s11335_s1 + $0x152c] ss:$16 sps:$4 sm:$0xff]  }
 0x2e5   :  { %5909 = vmatprep.subr.bf16.mxu1 %v8422_v10  ;;  %v5158_v24 = vadd.f32 %v10979_v60, %v5115_v8  ;;  %v8461_v60 = vld [vmem:[%s11335_s1 + $0x178c] ss:$16 sps:$4 sm:$0xff]   ;;  %v8540_v8 = vld [vmem:[%s11336_s0 + $0x50] ss:$100 sps:$4 sm:$0xff]  }
 0x2e6   :  { %v5111_v10 = vadd.f32 %v10883_v12, %v5068_v7  ;;  %v8455_v12 = vld [vmem:[%s11335_s1 + $0x17ac] ss:$16 sps:$4 sm:$0xff]  }
 0x2e7   :  { %5945 = vmatpush1.bf16.msra.mxu0 %v8423_v20  ;;  %v11096_v20 = vpop.f32.mrf.mxu0 }
 0x2e8   :  { %5910 = vmatpush2.bf16.msra.mxu1 %v8420_v19  ;;  %5946 = vmatprep.subr.bf16.mxu0 %v8431_v22  ;;  %v11094_v19 = vpop.f32.mrf.mxu1  ;;  %v5201_v22 = vadd.f32 %v10981_v61, %v5158_v24  ;;  %v8476_v24 = vld [vmem:[%s11335_s1 + $0x172c] ss:$16 sps:$4 sm:$0xff]  }
 0x2e9   :  { %5911 = vmatprep.subr.bf16.mxu1 %v8428_v21  ;;  %v5154_v21 = vadd.f32 %v10942_v38, %v5111_v10  ;;  %v8458_v38 = vld [vmem:[%s11335_s1 + $0x150c] ss:$16 sps:$4 sm:$0xff]  }
 0x2ea   :  { %v5244_v35 = vadd.f32 %v5243_v40, %v5201_v22  ;;  %v8467_v40 = vld [vmem:[%s11335_s1 + $0x186c] ss:$16 sps:$4 sm:$0xff]  }
 0x2eb   :  { %5947 = vmatpush1.bf16.msra.mxu0 %v8429_v34  ;;  %v5372_v34 = vpop.f32.mrf.mxu0  ;;  %v5197_v61 = vadd.f32 %v10944_v39, %v5154_v21  ;;  %v8464_v39 = vld [vmem:[%s11335_s1 + $0x176c] ss:$16 sps:$4 sm:$0xff]  }
 0x2ec   :  { %5912 = vmatpush2.bf16.msra.mxu1 %v8426_v33  ;;  %5948 = vmatprep.subr.bf16.mxu0 %v8437_v31  ;;  %v5329_v33 = vpop.f32.mrf.mxu1 }
 0x2ed   :  { %5913 = vmatprep.subr.bf16.mxu1 %v8434_v42  ;;  %v11122_v31 = vpop.f32.mrf.mxu0 }
 0x2ee   :  { %v11120_v42 = vpop.f32.mrf.mxu1 }
 0x2ef   :  { %5949 = vmatpush1.bf16.msra.mxu0 %v8435_v48  ;;  %v5287_v48 = vadd.f32 %v11047_v41, %v5244_v35  ;;  %v5454_v54 = vpop.f32.mrf.mxu0 }
 0x2f0   :  { %5914 = vmatpush2.bf16.msra.mxu1 %v8432_v47  ;;  %5950 = vmatprep.subr.bf16.mxu0 %v8443_v0  ;;  %v5240_v47 = vadd.f32 %v11011_v14, %v5197_v61  ;;  %v5411_v0 = vpop.f32.mrf.mxu1  ;;  %v8470_v14 = vld [vmem:[%s11335_s1 + $0x174c] ss:$16 sps:$4 sm:$0xff]  }
 0x2f1   :  { %5915 = vmatprep.subr.bf16.mxu1 %v8440_v51  ;;  %v835_v51 = vsub.s32 0, %v10971_v55  ;;  %v5330_v41 = vadd.f32 %v5329_v33, %v5287_v48  ;;  %v11155_v7 = vpop.f32.mrf.mxu0  ;;  %v8487_v48 = vld [vmem:[%s11337_s3 + $0x38] sm:$0xff]  }
 0x2f2   :  { %v5283_v56 = vadd.f32 %v11013_v15, %v5240_v47  ;;  %v8473_v15 = vld [vmem:[%s11335_s1 + $0x184c] ss:$16 sps:$4 sm:$0xff]  }
 0x2f3   :  { %5951 = vmatpush2.bf16.msra.mxu0 %v8441_v62  ;;  %v8465_v62 = vld [vmem:[%s11335_s1 + $0x1868] ss:$16 sps:$4 sm:$0xff]  }
 0x2f4   :  { %5916 = vmatpush2.bf16.msra.mxu1 %v8438_v59  ;;  %5952 = vmatprep.subr.bf16.mxu0 %v8449_v23  ;;  %v8462_v59 = vld [vmem:[%s11335_s1 + $0x1768] ss:$16 sps:$4 sm:$0xff]   ;;  %v11153_v23 = vpop.f32.mrf.mxu1  ;;  %v5326_v10 = vadd.f32 %v11075_v1, %v5283_v56  ;;  %v8479_v1 = vld [vmem:[%s11335_s1 + $0x182c] ss:$16 sps:$4 sm:$0xff]  }
 0x2f5   :  { %5917 = vmatprep.subr.bf16.mxu1 %v8446_v52  ;;  %v836_v52 = vrot.slane %v11003_v9, %v835_v51 }
 0x2f6   :  { %v5369_v21 = vadd.f32 %v11077_v6, %v5326_v10 }
 0x2f7   :  { %5953 = vmatpush2.bf16.msra.mxu0 %v8447_v16  ;;  %v8468_v16 = vld [vmem:[%s11335_s1 + $0x1748] ss:$16 sps:$4 sm:$0xff]   ;;  %v4937_v22 = vadd.f32 %v10757_v28, %v836_v52  ;;  %v8485_v28 = vld [vmem:[%s11335_s1 + $0x180c] ss:$16 sps:$4 sm:$0xff]  }
 0x2f8   :  { %5918 = vmatpush2.bf16.msra.mxu1 %v8444_v13  ;;  %5954 = vmatprep.subr.bf16.mxu0 %v8455_v12  ;;  %v5373_v13 = vadd.f32 %v5372_v34, %v5330_v41  ;;  %v4941_v12 = vadd.f32 %v10779_v37, %v836_v52  ;;  %v8474_v37 = vld [vmem:[%s11335_s1 + $0x1728] ss:$16 sps:$4 sm:$0xff]   ;;  %v5412_v6 = vadd.f32 %v5411_v0, %v5369_v21  ;;  %v8488_v0 = vld [vmem:[%s11337_s3 + $0x70] sm:$0xff]  }
 0x2f9   :  { %5919 = vmatprep.subr.bf16.mxu1 %v8452_v11  ;;  %v8471_v11 = vld [vmem:[%s11335_s1 + $0x1848] ss:$16 sps:$4 sm:$0xff]   ;;  %v4980_v61 = vadd.f32 %v10801_v45, %v4937_v22 }
 0x2fa   :  { %v8477_v34 = vld [vmem:[%s11335_s1 + $0x1828] ss:$16 sps:$4 sm:$0xff]  }
 0x2fb   :  { %5955 = vmatpush2.bf16.msra.mxu0 %v8453_v32  ;;  %v5458_v32 = vpop.f32.mrf.mxu0  ;;  %v8486_v45 = vld [vmem:[%s11337_s3 + $0x78] sm:$0xff]  }
 0x2fc   :  { %5920 = vmatpush2.bf16.msra.mxu1 %v8450_v25  ;;  %5956 = vmatprep.subr.bf16.mxu0 %v8461_v60  ;;  %v5415_v25 = vpop.f32.mrf.mxu1 }
 0x2fd   :  { %5921 = vmatprep.subr.bf16.mxu1 %v8458_v38  ;;  %v5416_v33 = vadd.f32 %v5415_v25, %v5373_v13  ;;  %v4984_v38 = vadd.f32 %v10833_v57, %v4941_v12  ;;  %v8480_v57 = vld [vmem:[%s11335_s1 + $0x1708] ss:$16 sps:$4 sm:$0xff]  }
 0x2ff   :  { %5957 = vmatpush2.bf16.msra.mxu0 %v8459_v44  ;;  %v5459_v60 = vadd.f32 %v5458_v32, %v5416_v33  ;;  %v5027_v35 = vadd.f32 %v10835_v58, %v4984_v38  ;;  %v8483_v44 = vld [vmem:[%s11335_s1 + $0x1808] ss:$16 sps:$4 sm:$0xff]   ;;  %v8505_v32 = vld [vmem:[%s11337_s3 + $0xb0] sm:$0xff]   ;;  %v8509_v38 = vld [vmem:[%s11337_s3 + $0xa0] sm:$0xff]  }
 0x300   :  { %5922 = vmatpush2.bf16.msra.mxu1 %v8456_v43  ;;  %5958 = vmatprep.subr.bf16.mxu0 %v8464_v39  ;;  %v5455_v43 = vadd.f32 %v5454_v54, %v5412_v6  ;;  %v5023_v39 = vadd.f32 %v10803_v46, %v4980_v61  ;;  %v8506_v33 = vld [vmem:[%s11337_s3 + $0xe8] sm:$0xff]   ;;  %v8512_v6 = vld [vmem:[%s11337_s3 + $0xd0] sm:$0xff]  }
 0x301   :  { %5985 = vmatprep.subr.bf16.mxu1 %v8467_v40  ;;  %v6025_v58 = vmax.f32 %v5459_v60, 0.0  ;;  %v5070_v40 = vadd.f32 %v10897_v17, %v5027_v35  ;;  %v8541_v17 = vld [vmem:[%s11336_s0 + $0x58] ss:$100 sps:$4 sm:$0xff]   ;;  %v8513_v60 = vld [vmem:[%s11337_s3 + $0x90] sm:$0xff]   ;;  %v8514_v61 = vld [vmem:[%s11337_s3 + $0xc8] sm:$0xff]  }
 0x302   :  { %v6021_v47 = vmax.f32 %v5455_v43, 0.0  ;;  %v5066_v51 = vadd.f32 %v10859_v3, %v5023_v39  ;;  %v8489_v3 = vld [vmem:[%s11337_s3 + $0x30] sm:$0xff]   ;;  %v8515_v35 = vld [vmem:[%s11337_s3 + $0x88] sm:$0xff]   ;;  %v8516_v43 = vld [vmem:[%s11337_s3 + $0xc0] sm:$0xff]  }
 0x303   :  { %5924 = vmatmul.mubr.bf16.vlgmr.msra.gmra.mxu1 %v8540_v8  ;;  %5959 = vmatpush2.bf16.msra.mxu0 %v8462_v59  ;;  %v5113_v46 = vadd.f32 %v10899_v18, %v5070_v40  ;;  %v8542_v59 = vld [vmem:[%s11336_s0 + $0x60] ss:$100 sps:$4 sm:$0xff]   ;;  %v5538_v40 = vpop.f32.mrf.mxu0 }
 0x304   :  { %5986 = vmatpush1.bf16.msra.mxu1 %v8465_v62  ;;  %5960 = vmatprep.subr.bf16.mxu0 %v8470_v14  ;;  %v6029_v54 = vpack.c.bf16 %v6025_v58, %v6021_v47  ;;  %v5109_v56 = vadd.f32 %v10861_v4, %v5066_v51  ;;  %v8490_v4 = vld [vmem:[%s11337_s3 + $0x68] sm:$0xff]  }
 0x305   :  { %5987 = vmatprep.subr.bf16.mxu1 %v8473_v15  ;;  %6009 = vmatprep.mubr.bf16.mxu1 %v8543_v36  ;;  %v8482_v36 = vld [vmem:[%s11335_s1 + $0x170c] ss:$16 sps:$4 sm:$0xff]   ;;  %v5156_v18 = vadd.f32 %v10961_v49, %v5113_v46  ;;  %v8492_v49 = vld [vmem:[%s11337_s3 + $0x60] sm:$0xff]  }
 0x306   :  { %v5152_v62 = vadd.f32 %v10923_v27, %v5109_v56  ;;  %v8491_v15 = vld [vmem:[%s11337_s3 + $0x28] sm:$0xff]   ;;  %v8493_v27 = vld [vmem:[%s11337_s3 + $0x20] sm:$0xff]  }
 0x307   :  { %5961 = vmatpush2.bf16.msra.mxu0 %v8468_v16  ;;  %v5199_v14 = vadd.f32 %v10963_v50, %v5156_v18 }
 0x308   :  { %5988 = vmatpush1.bf16.msra.mxu1 %v8471_v11  ;;  %5962 = vmatprep.subr.bf16.mxu0 %v8476_v24  ;;  %v5195_v41 = vadd.f32 %v10925_v29, %v5152_v62  ;;  %v8494_v29 = vld [vmem:[%s11337_s3 + $0x58] sm:$0xff]  }
 0x309   :  { %5989 = vmatprep.subr.bf16.mxu1 %v8479_v1  ;;  %v5242_v52 = vadd.f32 %v11029_v26, %v5199_v14  ;;  %v8495_v26 = vld [vmem:[%s11337_s3 + $0x18] sm:$0xff]  }
 0x30a   :  { %v5238_v50 = vadd.f32 %v10989_v2, %v5195_v41  ;;  %v8496_v2 = vld [vmem:[%s11337_s3 + $0x50] sm:$0xff]  }
 0x30b   :  { %5963 = vmatpush2.bf16.msra.mxu0 %v8474_v37  ;;  %v5285_v8 = vadd.f32 %v11031_v30, %v5242_v52  ;;  %v8507_v37 = vld [vmem:[%s11337_s3 + $0xa8] sm:$0xff]  }
 0x30c   :  { %5990 = vmatpush1.bf16.msra.mxu1 %v8477_v34  ;;  %5964 = vmatprep.subr.bf16.mxu0 %v8482_v36  ;;  %v5281_v10 = vadd.f32 %v10991_v5, %v5238_v50  ;;  %v8497_v5 = vld [vmem:[%s11337_s3 + $0x10] sm:$0xff]   ;;  %v8508_v34 = vld [vmem:[%s11337_s3 + $0xe0] sm:$0xff]   ;;  %v8510_v36 = vld [vmem:[%s11337_s3 + $0xd8] sm:$0xff]  }
 0x30d   :  { %5991 = vmatprep.subr.bf16.mxu1 %v8485_v28  ;;  %v5328_v13 = vadd.f32 %v11094_v19, %v5285_v8  ;;  %v8498_v19 = vld [vmem:[%s11337_s3 + $0x48] sm:$0xff]   ;;  %v8511_v28 = vld [vmem:[%s11337_s3 + $0x98] sm:$0xff]  }
 0x30e   :  { %v5324_v30 = vadd.f32 %v11057_v53, %v5281_v10  ;;  %v8499_v53 = vld [vmem:[%s11337_s3 + $0x8] sm:$0xff]  }
 0x30f   :  { %5965 = vmatpush2.bf16.msra.mxu0 %v8480_v57  ;;  %v5371_v16 = vadd.f32 %v11096_v20, %v5328_v13  ;;  %v8517_v57 = vld [vmem:[%s11337_s3 + $0x80] sm:$0xff]  }
 0x310   :  { %5992 = vmatpush1.bf16.msra.mxu1 %v8483_v44  ;;  %7228 = vmatprep.subr.bf16.mxu0 %v8486_v45  ;;  %v5367_v11 = vadd.f32 %v11059_v63, %v5324_v30  ;;  %v8500_v63 = vld [vmem:[%s11337_s3 + $0x40] sm:$0xff]   ;;  %v5495_v44 = vpop.f32.mrf.mxu1  ;;  %v843_v30 = vsub.s32 2, %v10971_v55 }
 0x311   :  { %v5414_v12 = vadd.f32 %v11153_v23, %v5371_v16  ;;  %v8501_v23 = vld [vmem:[%s11337_s3] sm:$0xff]  }
 0x312   :  { %5967 = vmatmul.mubr.bf16.vlgmr.msra.gmra.mxu0 %v8541_v17  ;;  %v5410_v20 = vadd.f32 %v11120_v42, %v5367_v11  ;;  %v8502_v42 = vld [vmem:[%s11337_s3 + $0xf8] sm:$0xff]   ;;  %v5497_v39 = vpop.f32.mrf.mxu1 }
 0x313   :  { %7194 = vmatmul.mubr.msk.bf16.vlgmr.msra.gmra.mxu1 %vm4898_vm0, %v8542_v59  ;;  %7229 = vmatpush3.bf16.msra.mxu0 %v8487_v48  ;;  %v5457_v24 = vadd.f32 %v11155_v7, %v5414_v12  ;;  %v8503_v7 = vld [vmem:[%s11337_s3 + $0xb8] sm:$0xff]   ;;  %v5540_v48 = vpop.f32.mrf.mxu0 }
 0x314   :  { %6327 = vmatprep.mubr.bf16.mxu0 %v6029_v54  ;;  %7230 = vmatprep.subr.bf16.mxu0 %v8488_v0  ;;  %v5453_v1 = vadd.f32 %v11122_v31, %v5410_v20  ;;  %v8504_v31 = vld [vmem:[%s11337_s3 + $0xf0] sm:$0xff]   ;;  %v5499_v45 = vpop.f32.mrf.mxu1 }
 0x315   :  { %v6024_v21 = vmax.f32 %v5457_v24, 0.0  ;;  %7250 = vmatprep.subr.bf16.mxu1 %v8502_v42  ;;  %v5542_v46 = vpop.f32.mrf.mxu0 }
 0x316   :  { %v6020_v22 = vmax.f32 %v5453_v1, 0.0  ;;  %7251 = vmatpush3.bf16.msra.mxu1 %v8503_v7  ;;  %v5501_v58 = vpop.f32.mrf.mxu1 }
 0x317   :  { %7231 = vmatpush3.bf16.msra.mxu0 %v8489_v3  ;;  %7252 = vmatprep.subr.bf16.mxu1 %v8504_v31  ;;  %v5544_v54 = vpop.f32.mrf.mxu0 }
 0x318   :  { %7232 = vmatprep.subr.bf16.mxu0 %v8490_v4  ;;  %v6028_v25 = vpack.c.bf16 %v6024_v21, %v6020_v22  ;;  %v5581_v47 = vpop.f32.mrf.mxu1 }
 0x319   :  { %v5624_v17 = vpop.f32.mrf.mxu0 }
 0x31a   :  { %7253 = vmatpush3.bf16.msra.mxu1 %v8505_v32  ;;  %v5583_v51 = vpop.f32.mrf.mxu1 }
 0x31b   :  { %7233 = vmatpush3.bf16.msra.mxu0 %v8491_v15  ;;  %7254 = vmatprep.subr.bf16.mxu1 %v8506_v33  ;;  %v5626_v3 = vpop.f32.mrf.mxu0 }
 0x31c   :  { %7234 = vmatprep.subr.bf16.mxu0 %v8492_v49  ;;  %v5585_v0 = vpop.f32.mrf.mxu1 }
 0x31d   :  { %v5628_v4 = vpop.f32.mrf.mxu0 }
 0x31e   :  { %7255 = vmatpush3.bf16.msra.mxu1 %v8507_v37  ;;  %v5587_v56 = vpop.f32.mrf.mxu1 }
 0x31f   :  { %7235 = vmatpush3.bf16.msra.mxu0 %v8493_v27  ;;  %7256 = vmatprep.subr.bf16.mxu1 %v8508_v34  ;;  %v5630_v14 = vpop.f32.mrf.mxu0 }
 0x320   :  { %7236 = vmatprep.subr.bf16.mxu0 %v8494_v29  ;;  %v5667_v59 = vpop.f32.mrf.mxu1 }
 0x321   :  { %v5710_v41 = vpop.f32.mrf.mxu0 }
 0x322   :  { %7257 = vmatpush3.bf16.msra.mxu1 %v8509_v38  ;;  %v5669_v18 = vpop.f32.mrf.mxu1 }
 0x323   :  { %7237 = vmatpush3.bf16.msra.mxu0 %v8495_v26  ;;  %7258 = vmatprep.subr.bf16.mxu1 %v8510_v36  ;;  %v5712_v52 = vpop.f32.mrf.mxu0 }
 0x324   :  { %7238 = vmatprep.subr.bf16.mxu0 %v8496_v2  ;;  %v5671_v62 = vpop.f32.mrf.mxu1  ;;  %v847_v2 = vsub.s32 3, %v10971_v55 }
 0x325   :  { %v5714_v50 = vpop.f32.mrf.mxu0 }
 0x326   :  { %7259 = vmatpush3.bf16.msra.mxu1 %v8511_v28  ;;  %v5673_v15 = vpop.f32.mrf.mxu1  ;;  %v848_v11 = vrot.slane %v11003_v9, %v847_v2 }
 0x327   :  { %7239 = vmatpush3.bf16.msra.mxu0 %v8497_v5  ;;  %7260 = vmatprep.subr.bf16.mxu1 %v8512_v6  ;;  %v5716_v29 = vpop.f32.mrf.mxu0 }
 0x328   :  { %7240 = vmatprep.subr.bf16.mxu0 %v8498_v19  ;;  %v844_v19 = vrot.slane %v11003_v9, %v843_v30  ;;  %v5498_v20 = vadd.f32 %v5497_v39, %v848_v11 }
 0x32a   :  { %7261 = vmatpush3.bf16.msra.mxu1 %v8513_v60  ;;  %v5496_v24 = vadd.f32 %v5495_v44, %v844_v19  ;;  %v5541_v1 = vadd.f32 %v5540_v48, %v5498_v20 }
 0x32b   :  { %7241 = vmatpush3.bf16.msra.mxu0 %v8499_v53  ;;  %7262 = vmatprep.subr.bf16.mxu1 %v8514_v61 }
 0x32c   :  { %7242 = vmatprep.subr.bf16.mxu0 %v8500_v63  ;;  %v5500_v63 = vadd.f32 %v5499_v45, %v844_v19  ;;  %v5584_v7 = vadd.f32 %v5583_v51, %v5541_v1 }
 0x32e   :  { %7263 = vmatpush3.bf16.msra.mxu1 %v8515_v35  ;;  %v5543_v42 = vadd.f32 %v5542_v46, %v5500_v63  ;;  %v5627_v34 = vadd.f32 %v5626_v3, %v5584_v7 }
 0x32f   :  { %7243 = vmatpush3.bf16.msra.mxu0 %v8501_v23  ;;  %7264 = vmatprep.subr.bf16.mxu1 %v8516_v43  ;;  %v5539_v23 = vadd.f32 %v5538_v40, %v5496_v24 }
 0x330   :  { %v5586_v37 = vadd.f32 %v5585_v0, %v5543_v42  ;;  %v5670_v28 = vadd.f32 %v5669_v18, %v5627_v34 }
 0x331   :  { %v5582_v31 = vadd.f32 %v5581_v47, %v5539_v23 }
 0x332   :  { %6328 = vmatmul.mubr.bf16.vlgmr.msra.gmra.mxu0 %v6028_v25  ;;  %7265 = vmatpush3.bf16.msra.mxu1 %v8517_v57  ;;  %v5502_v25 = vadd.f32 %v5501_v58, %v848_v11  ;;  %v5629_v36 = vadd.f32 %v5628_v4, %v5586_v37  ;;  %v5713_v57 = vadd.f32 %v5712_v52, %v5670_v28 }
 0x333   :  { %v5625_v38 = vadd.f32 %v5624_v17, %v5582_v31 }
 0x334   :  { %v5545_v33 = vadd.f32 %v5544_v54, %v5502_v25  ;;  %v5672_v43 = vadd.f32 %v5671_v62, %v5629_v36 }
 0x335   :  { %v5668_v6 = vadd.f32 %v5667_v59, %v5625_v38  ;;  %v7195_v38 = vld [vmem:[%s11339_s4] ss:$0 sm:$0xff] }
 0x336   :  { %v5588_v9 = vadd.f32 %v5587_v56, %v5545_v33  ;;  %v5715_v45 = vadd.f32 %v5714_v50, %v5672_v43 }
 0x337   :  { %v5711_v44 = vadd.f32 %v5710_v41, %v5668_v6 }
 0x338   :  { %v5631_v35 = vadd.f32 %v5630_v14, %v5588_v9 }
 0x33a   :  { %v5674_v39 = vadd.f32 %v5673_v15, %v5631_v35 }
 0x33c   :  { %v5717_v51 = vadd.f32 %v5716_v29, %v5674_v39 }
 0x343   :  { %v5753_v49 = vpop.f32.mrf.mxu1 }
 0x344   :  { %v5754_v40 = vadd.f32 %v5753_v49, %v5711_v44 }
 0x345   :  { %v5755_v27 = vpop.f32.mrf.mxu1 }
 0x346   :  { %v5756_v58 = vadd.f32 %v5755_v27, %v5713_v57 }
 0x347   :  { %v5757_v8 = vpop.f32.mrf.mxu1 }
 0x348   :  { %v5758_v46 = vadd.f32 %v5757_v8, %v5715_v45 }
 0x349   :  { %v5759_v10 = vpop.f32.mrf.mxu1 }
 0x34a   :  { %v5760_v56 = vadd.f32 %v5759_v10, %v5717_v51 }
 0x352   :  { %v5796_v26 = vpop.f32.mrf.mxu0 }
 0x353   :  { %v5797_v54 = vadd.f32 %v5796_v26, %v5754_v40 }
 0x354   :  { %v5798_v16 = vpop.f32.mrf.mxu0 }
 0x355   :  { %v5799_v0 = vadd.f32 %v5798_v16, %v5756_v58 }
 0x356   :  { %v5800_v12 = vpop.f32.mrf.mxu0 }
 0x357   :  { %v5801_v17 = vadd.f32 %v5800_v12, %v5758_v46 }
 0x358   :  { %v5802_v21 = vpop.f32.mrf.mxu0 }
 0x359   :  { %v5803_v14 = vadd.f32 %v5802_v21, %v5760_v56 }
 0x383   :  { %v5839_v13 = vpop.f32.mrf.mxu1 }
 0x384   :  { %v5840_v59 = vadd.f32 %v5839_v13, %v5797_v54 }
 0x385   :  { %v5841_v5 = vpop.f32.mrf.mxu1 }
 0x386   :  { %v5842_v3 = vadd.f32 %v5841_v5, %v5799_v0 }
 0x387   :  { %v5843_v53 = vpop.f32.mrf.mxu1 }
 0x388   :  { %v5844_v62 = vadd.f32 %v5843_v53, %v5801_v17 }
 0x389   :  { %v5845_v22 = vpop.f32.mrf.mxu1 }
 0x38a   :  { %v5846_v27 = vadd.f32 %v5845_v22, %v5803_v14 }
 0x392   :  { %v5882_v55 = vpop.f32.mrf.mxu0 }
 0x393   :  { %v5883_v41 = vadd.f32 %v5882_v55, %v5840_v59 }
 0x394   :  { %v5884_v60 = vpop.f32.mrf.mxu0 }
 0x395   :  { %v5885_v52 = vadd.f32 %v5884_v60, %v5842_v3 }
 0x396   :  { %v5886_v47 = vpop.f32.mrf.mxu0 }
 0x397   :  { %v5887_v49 = vadd.f32 %v5886_v47, %v5844_v62 }
 0x398   :  { %v5888_v18 = vpop.f32.mrf.mxu0 }
 0x399   :  { %v5889_v16 = vadd.f32 %v5888_v18, %v5846_v27 }
 0x3c3   :  { %v5925_v32 = vpop.f32.mrf.mxu1 }
 0x3c4   :  { %v5926_v30 = vadd.f32 %v5925_v32, %v5883_v41 }
 0x3c5   :  { %v5927_v61 = vpop.f32.mrf.mxu1 }
 0x3c6   :  { %v5928_v2 = vadd.f32 %v5927_v61, %v5885_v52 }
 0x3c7   :  { %v5929_v48 = vpop.f32.mrf.mxu1 }
 0x3c8   :  { %v5930_v26 = vadd.f32 %v5929_v48, %v5887_v49 }
 0x3c9   :  { %v5931_v4 = vpop.f32.mrf.mxu1 }
 0x3ca   :  { %v5932_v19 = vadd.f32 %v5931_v4, %v5889_v16 }
 0x3d2   :  { %v5968_v15 = vpop.f32.mrf.mxu0 }
 0x3d3   :  { %v6011_v50 = vpop.f32.mrf.mxu1  ;;  %v5969_v11 = vadd.f32 %v5968_v15, %v5926_v30 }
 0x3d4   :  { %v5970_v29 = vpop.f32.mrf.mxu0 }
 0x3d5   :  { %v6013_v8 = vpop.f32.mrf.mxu1  ;;  %v5971_v10 = vadd.f32 %v5970_v29, %v5928_v2  ;;  %v6012_v1 = vadd.f32 %v6011_v50, %v5969_v11 }
 0x3d6   :  { %v5972_v5 = vpop.f32.mrf.mxu0 }
 0x3d7   :  { %v6015_v13 = vpop.f32.mrf.mxu1  ;;  %v5973_v12 = vadd.f32 %v5972_v5, %v5930_v26  ;;  %v6014_v53 = vadd.f32 %v6013_v8, %v5971_v10  ;;  %v6022_v7 = vmax.f32 %v6012_v1, 0.0 }
 0x3d8   :  { %v5974_v20 = vpop.f32.mrf.mxu0 }
 0x3d9   :  { %v6016_v24 = vadd.f32 %v6015_v13, %v5973_v12  ;;  %v5975_v63 = vadd.f32 %v5974_v20, %v5932_v19  ;;  %v6017_v23 = vpop.f32.mrf.mxu1  ;;  %v6023_v25 = vmax.f32 %v6014_v53, 0.0 }
 0x3db   :  { %v6018_v21 = vadd.f32 %v6017_v23, %v5975_v63  ;;  %v6026_v22 = vmax.f32 %v6016_v24, 0.0 }
 0x3dd   :  { %v6027_v42 = vmax.f32 %v6018_v21, 0.0  ;;  %v6030_v55 = vpack.c.bf16 %v6026_v22, %v6022_v7 }
 0x3df   :  { %v6031_v31 = vpack.c.bf16 %v6027_v42, %v6023_v25 }
 0x3e1   :  { %6368 = vmatprep.mubr.bf16.mxu1 %v6031_v31 }
 0x3e2   :  { %6369 = vmatmul.mubr.bf16.vlgmr.msra.gmra.mxu1 %v6030_v55 }
 0x3f2   :  { %v7244_v32 = vpop.f32.mrf.mxu0 }
 0x3f4   :  { %v7245_v33 = vpop.f32.mrf.mxu0 }
 0x3f5   :  { %v7246_v34 = vadd.f32 %v7245_v33, %v7244_v32 }
 0x3f6   :  { %v7247_v37 = vpop.f32.mrf.mxu0 }
 0x3f7   :  { %v6330_v6 = vadd.f32 %v7246_v34, %v7195_v38 }
 0x3f8   :  { %v7248_v9 = vpop.f32.mrf.mxu0 }
 0x3f9   :  { %v7249_v60 = vadd.f32 %v7248_v9, %v7247_v37 }
 0x3fb   :  { %v6333_v44 = vadd.f32 %v7249_v60, %v7195_v38 }
 0x4a2   :  { %v7266_v36 = vpop.f32.mrf.mxu1 }
 0x4a4   :  { %v7267_v28 = vpop.f32.mrf.mxu1 }
 0x4a5   :  { %v7268_v61 = vadd.f32 %v7267_v28, %v7266_v36 }
 0x4a6   :  { %v7269_v35 = vpop.f32.mrf.mxu1 }
 0x4a7   :  { %v6371_v43 = vadd.f32 %v7268_v61, %v6330_v6 }
 0x4a8   :  { %v7270_v57 = vpop.f32.mrf.mxu1 }
 0x4a9   :  { %6378 = vst.msk [vmem:[%s11340_s5] sm:$0xff] %vm6377_vm1, %v6371_v43  ;;  %v7271_v39 = vadd.f32 %v7270_v57, %v7269_v35 }
 0x4ab   :  { %v6374_v45 = vadd.f32 %v7271_v39, %v6333_v44 }
 0x4ad   :  { %6379 = vst.msk [vmem:[%s11340_s5 + $0x8] sm:$0xff] %vm6377_vm1, %v6374_v45 }

</bundles_post_ra>
